<compile_context>
chip_gen: v5e
topology: v5e:2x2
jax: 0.10.0
libtpu: 0.0.40
codegen_flags: <defaults>
</compile_context>

<pallas_src>
import functools
import math

import jax
import jax.numpy as jnp
from jax.experimental import pallas as pl
from jax.experimental.pallas import tpu as pltpu


def _gelu_tanh(x):
    # TODO(synk): PyTorch nn.GELU() defaults to the exact erf form; Mosaic erf
    # lowering is not guaranteed, so we use the tanh approximation (max abs
    # error ~5e-4), which stays on the EUP tanh path.
    c = 0.7978845608028654  # sqrt(2/pi)
    return 0.5 * x * (1.0 + jnp.tanh(c * (x + 0.044715 * x * x * x)))


def _upsampling_kernel(xp_ref, wt_ref, b_ref, ew_ref, o_ref, *,
                       K, stride, W_out, rows_per_step):
    # xp_ref: (H_pad, C_in, W_pad)            padded image of this batch element
    # wt_ref: (K*K, C_out, C_in)              conv weight, one (C_out,C_in) slab per tap
    # b_ref : (C_out, 1)                      conv bias
    # ew_ref: (W_out, 2*W_out)                0/1 nearest-upsample expansion matrix
    # o_ref : (C_out, 2*rows_per_step, 2*W_out)   NCHW output rows for this grid step
    row_block = pl.program_id(1)
    row0 = row_block * rows_per_step          # first conv-output row of this step
    c_out = o_ref.shape[0]

    for r in range(rows_per_step):            # static unroll
        acc = jnp.zeros((c_out, W_out), dtype=jnp.float32)
        for ky in range(K):
            src_row = (row0 + r) * stride + ky            # dynamic major-axis index
            for kx in range(K):
                if stride == 1:
                    patch = xp_ref[src_row, :, kx:kx + W_out]               # (C_in, W_out)
                else:
                    patch = xp_ref[src_row, :, pl.ds(kx, W_out, stride=stride)]
                acc = acc + jnp.dot(wt_ref[ky * K + kx], patch,
                                    preferred_element_type=jnp.float32)     # (C_out, W_out)
        act = _gelu_tanh(acc + b_ref[...])                                  # (C_out, W_out)
        up = jnp.dot(act, ew_ref[...],
                     preferred_element_type=jnp.float32).astype(o_ref.dtype)  # (C_out, 2*W_out)
        # nearest upsample along H: both duplicated output rows get the same data
        o_ref[:, 2 * r, :] = up
        o_ref[:, 2 * r + 1, :] = up


def upsampling_forward(x_nhwc, weight, bias, *, stride=1, padding=0,
                       rows_per_step=None, interpret=False):
    """Fused Conv2d + GELU + 2x nearest-upsample; returns NCHW like the PyTorch module."""
    B, H, W, C_in = x_nhwc.shape
    C_out, C_in_w, K, K_w = weight.shape
    assert C_in_w == C_in and K == K_w, "weight shape mismatch"

    H_out = (H + 2 * padding - K) // stride + 1
    W_out = (W + 2 * padding - K) // stride + 1
    H_pad, W_pad = H + 2 * padding, W + 2 * padding

    # Conv-output rows per grid step: 2*rows_per_step is the output block's
    # sublane extent, so keep it a multiple of 8 (or fall back to full extent).
    if rows_per_step is None:
        rows_per_step = next((c for c in (8, 4) if H_out % c == 0), H_out)
    assert H_out % rows_per_step == 0

    # (B, H_pad, C_in, W_pad): a conv row slice is a ready-to-matmul (C_in, W_out)
    # tile with lane axis = W (mirrors the PyTorch permute; pad is the conv's own
    # zero padding applied once to the small input tensor).
    xp = jnp.transpose(x_nhwc, (0, 1, 3, 2)).astype(jnp.float32)
    if padding > 0:
        xp = jnp.pad(xp, ((0, 0), (padding, padding), (0, 0), (padding, padding)))

    wt = jnp.transpose(weight, (2, 3, 0, 1)).reshape(K * K, C_out, C_in).astype(jnp.float32)
    b2 = bias.reshape(C_out, 1).astype(jnp.float32)
    # ew[j, k] = 1 iff k // 2 == j   (2x nearest upsample along W as a matmul)
    ew = (jnp.arange(2 * W_out)[None, :] // 2 == jnp.arange(W_out)[:, None]).astype(jnp.float32)

    grid = (B, H_out // rows_per_step)
    kernel = functools.partial(_upsampling_kernel, K=K, stride=stride,
                               W_out=W_out, rows_per_step=rows_per_step)

    flops = (2 * B * H_out * W_out * C_out * C_in * K * K          # conv
             + 2 * B * H_out * C_out * W_out * 2 * W_out)          # upsample matmul
    bytes_accessed = 4 * (xp.size + wt.size + b2.size + ew.size
                          + B * C_out * 2 * H_out * 2 * W_out)
    transcendentals = B * H_out * W_out * C_out                    # one tanh per conv output

    return pl.pallas_call(
        kernel,
        out_shape=jax.ShapeDtypeStruct((B, C_out, 2 * H_out, 2 * W_out), jnp.float32),
        grid=grid,
        in_specs=[
            # full padded image per batch element; block index constant in i, so it
            # is DMA'd once per batch and reused across the row axis
            pl.BlockSpec((None, H_pad, C_in, W_pad), lambda b, i: (b, 0, 0, 0)),
            # weights / bias / expansion matrix stay resident in VMEM for the whole grid
            pl.BlockSpec((K * K, C_out, C_in), lambda b, i: (0, 0, 0)),
            pl.BlockSpec((C_out, 1), lambda b, i: (0, 0)),
            pl.BlockSpec((W_out, 2 * W_out), lambda b, i: (0, 0)),
        ],
        out_specs=pl.BlockSpec((None, C_out, 2 * rows_per_step, 2 * W_out),
                               lambda b, i: (b, 0, i, 0)),
        compiler_params=pltpu.CompilerParams(
            # batch axis shards across TensorCores (v7x megacore); row axis stays
            # sequential so the per-batch input block is fetched only once.
            dimension_semantics=("parallel", "arbitrary"),
            vmem_limit_bytes=32 * 1024 * 1024,   # safe on v5e/v6e/v7x; blocks here are KB-scale
        ),
        cost_estimate=pl.CostEstimate(flops=flops, transcendentals=transcendentals,
                                      bytes_accessed=bytes_accessed),
        interpret=interpret,
    )(xp, wt, b2, ew)


class Upsampling:
    """JAX/Pallas port of the PyTorch `upsampling` decoder block."""

    def __init__(self, in_channels, out_channels, kernel_size, stride=1, padding=0,
                 pre_norm=None, post_norm=None, pre_permute=False, *, key=None):
        if pre_norm is not None or post_norm is not None:
            # TODO(synk): only the default Identity pre/post norms are implemented
            # (the reference forward never applies post_norm anyway).
            raise NotImplementedError("only pre_norm=None / post_norm=None supported")
        self.stride = stride
        self.padding = padding
        self.pre_permute = pre_permute  # stored but unused by forward, as in the reference

        key = jax.random.PRNGKey(0) if key is None else key
        wkey, bkey = jax.random.split(key)
        fan_in = in_channels * kernel_size * kernel_size
        bound = 1.0 / math.sqrt(fan_in)  # PyTorch Conv2d default init bounds
        self.weight = jax.random.uniform(
            wkey, (out_channels, in_channels, kernel_size, kernel_size),
            minval=-bound, maxval=bound, dtype=jnp.float32)
        self.bias = jax.random.uniform(
            bkey, (out_channels,), minval=-bound, maxval=bound, dtype=jnp.float32)

    def __call__(self, x_nhwc):
        # forward: pre_norm (Identity) -> permute + conv -> GELU -> 2x nearest upsample
        return upsampling_forward(x_nhwc, self.weight, self.bias,
                                  stride=self.stride, padding=self.padding)


if __name__ == "__main__":
    key = jax.random.PRNGKey(0)
    xkey, mkey = jax.random.split(key)

    B, H, W, C_in, C_out, K = 2, 16, 16, 4, 8, 3
    x = jax.random.normal(xkey, (B, H, W, C_in), dtype=jnp.float32)   # module expects NHWC

    mod = Upsampling(C_in, C_out, K, stride=1, padding=1, key=mkey)
    y = jax.block_until_ready(mod(x))

    # Pure-JAX reference of the PyTorch forward (exact erf GELU, full-precision conv).
    x_nchw = jnp.transpose(x, (0, 3, 1, 2))
    ref = jax.lax.conv_general_dilated(
        x_nchw, mod.weight, window_strides=(1, 1), padding=[(1, 1), (1, 1)],
        dimension_numbers=("NCHW", "OIHW", "NCHW"),
        precision=jax.lax.Precision.HIGHEST)
    ref = ref + mod.bias[None, :, None, None]
    ref = jax.nn.gelu(ref, approximate=False)
    ref = jnp.repeat(jnp.repeat(ref, 2, axis=2), 2, axis=3)           # nearest 2x upsample

    assert y.shape == ref.shape == (B, C_out, 2 * H, 2 * W)
    assert y.dtype == jnp.float32
    # Tolerance covers the in-kernel tanh-GELU approximation (~5e-4) and any
    # MXU f32-via-bf16 pass rounding in the small matmuls.
    err = float(jnp.max(jnp.abs(y - ref)))
    assert err < 1e-2, f"mismatch vs reference: max abs err {err}"

    print("KERNEL_OK")
</pallas_src>

<mosaic_0001>
module attributes {stable_mosaic.version = 11 : i64} {
  func.func @_upsampling_kernel(%arg0: i32, %arg1: i32, %arg2: memref<1x18x4x18xf32, #tpu.memory_space<vmem>>, %arg3: memref<9x8x4xf32, #tpu.memory_space<vmem>>, %arg4: memref<8x1xf32, #tpu.memory_space<vmem>>, %arg5: memref<16x32xf32, #tpu.memory_space<vmem>>, %arg6: memref<1x8x16x32xf32, #tpu.memory_space<vmem>>) attributes {dimension_semantics = [#tpu.dimension_semantics<parallel>, #tpu.dimension_semantics<arbitrary>], iteration_bounds = array<i64: 2, 2>, scalar_prefetch = 0 : i64, scratch_operands = 0 : i64, tpu.core_type = #tpu.core_type<tc>, window_params = [{transform_indices = @transform_0, window_bounds = array<i64: 1, 18, 4, 18>}, {pipeline_mode = #tpu.pipeline_mode<synchronous>, transform_indices = @transform_1, window_bounds = array<i64: 9, 8, 4>}, {pipeline_mode = #tpu.pipeline_mode<synchronous>, transform_indices = @transform_2, window_bounds = array<i64: 8, 1>}, {pipeline_mode = #tpu.pipeline_mode<synchronous>, transform_indices = @transform_3, window_bounds = array<i64: 16, 32>}, {transform_indices = @transform_4, window_bounds = array<i64: 1, 8, 16, 32>}]} {
    %c8_i32 = arith.constant 8 : i32
    %0 = arith.muli %arg1, %c8_i32 : i32
    %cst = arith.constant 0.000000e+00 : f32
    %1 = vector.broadcast %cst : f32 to vector<8x16xf32>
    %c0_i32 = arith.constant 0 : i32
    %2 = arith.addi %0, %c0_i32 : i32
    %c1_i32 = arith.constant 1 : i32
    %3 = arith.muli %2, %c1_i32 : i32
    %c0_i32_0 = arith.constant 0 : i32
    %4 = arith.addi %3, %c0_i32_0 : i32
    %c0 = arith.constant 0 : index
    %5 = arith.index_cast %4 : i32 to index
    %c0_1 = arith.constant 0 : index
    %c0_2 = arith.constant 0 : index
    %6 = vector.load %arg2[%c0, %5, %c0_1, %c0_2] : memref<1x18x4x18xf32, #tpu.memory_space<vmem>>, vector<1x1x4x16xf32>
    %7 = vector.shape_cast %6 : vector<1x1x4x16xf32> to vector<4x16xf32>
    %c0_3 = arith.constant 0 : index
    %c0_4 = arith.constant 0 : index
    %c0_5 = arith.constant 0 : index
    %8 = vector.load %arg3[%c0_3, %c0_4, %c0_5] : memref<9x8x4xf32, #tpu.memory_space<vmem>>, vector<1x8x4xf32>
    %9 = vector.shape_cast %8 : vector<1x8x4xf32> to vector<8x4xf32>
    %cst_6 = arith.constant dense<0.000000e+00> : vector<8x16xf32>
    %10 = tpu.matmul %9, %7, %cst_6 {dimension_numbers = #tpu.dot_dimension_numbers<[1], [0], [0], [1], [0, 0, 1, 1], [], []>} : vector<8x4xf32>, vector<4x16xf32>, vector<8x16xf32> -> vector<8x16xf32>
    %11 = arith.addf %1, %10 : vector<8x16xf32>
    %c0_7 = arith.constant 0 : index
    %12 = arith.index_cast %4 : i32 to index
    %c0_8 = arith.constant 0 : index
    %c1 = arith.constant 1 : index
    %13 = vector.load %arg2[%c0_7, %12, %c0_8, %c1] : memref<1x18x4x18xf32, #tpu.memory_space<vmem>>, vector<1x1x4x16xf32>
    %14 = vector.shape_cast %13 : vector<1x1x4x16xf32> to vector<4x16xf32>
    %c1_9 = arith.constant 1 : index
    %c0_10 = arith.constant 0 : index
    %c0_11 = arith.constant 0 : index
    %15 = vector.load %arg3[%c1_9, %c0_10, %c0_11] : memref<9x8x4xf32, #tpu.memory_space<vmem>>, vector<1x8x4xf32>
    %16 = vector.shape_cast %15 : vector<1x8x4xf32> to vector<8x4xf32>
    %cst_12 = arith.constant dense<0.000000e+00> : vector<8x16xf32>
    %17 = tpu.matmul %16, %14, %cst_12 {dimension_numbers = #tpu.dot_dimension_numbers<[1], [0], [0], [1], [0, 0, 1, 1], [], []>} : vector<8x4xf32>, vector<4x16xf32>, vector<8x16xf32> -> vector<8x16xf32>
    %18 = arith.addf %11, %17 : vector<8x16xf32>
    %c0_13 = arith.constant 0 : index
    %19 = arith.index_cast %4 : i32 to index
    %c0_14 = arith.constant 0 : index
    %c2 = arith.constant 2 : index
    %20 = vector.load %arg2[%c0_13, %19, %c0_14, %c2] : memref<1x18x4x18xf32, #tpu.memory_space<vmem>>, vector<1x1x4x16xf32>
    %21 = vector.shape_cast %20 : vector<1x1x4x16xf32> to vector<4x16xf32>
    %c2_15 = arith.constant 2 : index
    %c0_16 = arith.constant 0 : index
    %c0_17 = arith.constant 0 : index
    %22 = vector.load %arg3[%c2_15, %c0_16, %c0_17] : memref<9x8x4xf32, #tpu.memory_space<vmem>>, vector<1x8x4xf32>
    %23 = vector.shape_cast %22 : vector<1x8x4xf32> to vector<8x4xf32>
    %cst_18 = arith.constant dense<0.000000e+00> : vector<8x16xf32>
    %24 = tpu.matmul %23, %21, %cst_18 {dimension_numbers = #tpu.dot_dimension_numbers<[1], [0], [0], [1], [0, 0, 1, 1], [], []>} : vector<8x4xf32>, vector<4x16xf32>, vector<8x16xf32> -> vector<8x16xf32>
    %25 = arith.addf %18, %24 : vector<8x16xf32>
    %c0_i32_19 = arith.constant 0 : i32
    %26 = arith.addi %0, %c0_i32_19 : i32
    %c1_i32_20 = arith.constant 1 : i32
    %27 = arith.muli %26, %c1_i32_20 : i32
    %c1_i32_21 = arith.constant 1 : i32
    %28 = arith.addi %27, %c1_i32_21 : i32
    %c0_22 = arith.constant 0 : index
    %29 = arith.index_cast %28 : i32 to index
    %c0_23 = arith.constant 0 : index
    %c0_24 = arith.constant 0 : index
    %30 = vector.load %arg2[%c0_22, %29, %c0_23, %c0_24] : memref<1x18x4x18xf32, #tpu.memory_space<vmem>>, vector<1x1x4x16xf32>
    %31 = vector.shape_cast %30 : vector<1x1x4x16xf32> to vector<4x16xf32>
    %c3 = arith.constant 3 : index
    %c0_25 = arith.constant 0 : index
    %c0_26 = arith.constant 0 : index
    %32 = vector.load %arg3[%c3, %c0_25, %c0_26] : memref<9x8x4xf32, #tpu.memory_space<vmem>>, vector<1x8x4xf32>
    %33 = vector.shape_cast %32 : vector<1x8x4xf32> to vector<8x4xf32>
    %cst_27 = arith.constant dense<0.000000e+00> : vector<8x16xf32>
    %34 = tpu.matmul %33, %31, %cst_27 {dimension_numbers = #tpu.dot_dimension_numbers<[1], [0], [0], [1], [0, 0, 1, 1], [], []>} : vector<8x4xf32>, vector<4x16xf32>, vector<8x16xf32> -> vector<8x16xf32>
    %35 = arith.addf %25, %34 : vector<8x16xf32>
    %c0_28 = arith.constant 0 : index
    %36 = arith.index_cast %28 : i32 to index
    %c0_29 = arith.constant 0 : index
    %c1_30 = arith.constant 1 : index
    %37 = vector.load %arg2[%c0_28, %36, %c0_29, %c1_30] : memref<1x18x4x18xf32, #tpu.memory_space<vmem>>, vector<1x1x4x16xf32>
    %38 = vector.shape_cast %37 : vector<1x1x4x16xf32> to vector<4x16xf32>
    %c4 = arith.constant 4 : index
    %c0_31 = arith.constant 0 : index
    %c0_32 = arith.constant 0 : index
    %39 = vector.load %arg3[%c4, %c0_31, %c0_32] : memref<9x8x4xf32, #tpu.memory_space<vmem>>, vector<1x8x4xf32>
    %40 = vector.shape_cast %39 : vector<1x8x4xf32> to vector<8x4xf32>
    %cst_33 = arith.constant dense<0.000000e+00> : vector<8x16xf32>
    %41 = tpu.matmul %40, %38, %cst_33 {dimension_numbers = #tpu.dot_dimension_numbers<[1], [0], [0], [1], [0, 0, 1, 1], [], []>} : vector<8x4xf32>, vector<4x16xf32>, vector<8x16xf32> -> vector<8x16xf32>
    %42 = arith.addf %35, %41 : vector<8x16xf32>
    %c0_34 = arith.constant 0 : index
    %43 = arith.index_cast %28 : i32 to index
    %c0_35 = arith.constant 0 : index
    %c2_36 = arith.constant 2 : index
    %44 = vector.load %arg2[%c0_34, %43, %c0_35, %c2_36] : memref<1x18x4x18xf32, #tpu.memory_space<vmem>>, vector<1x1x4x16xf32>
    %45 = vector.shape_cast %44 : vector<1x1x4x16xf32> to vector<4x16xf32>
    %c5 = arith.constant 5 : index
    %c0_37 = arith.constant 0 : index
    %c0_38 = arith.constant 0 : index
    %46 = vector.load %arg3[%c5, %c0_37, %c0_38] : memref<9x8x4xf32, #tpu.memory_space<vmem>>, vector<1x8x4xf32>
    %47 = vector.shape_cast %46 : vector<1x8x4xf32> to vector<8x4xf32>
    %cst_39 = arith.constant dense<0.000000e+00> : vector<8x16xf32>
    %48 = tpu.matmul %47, %45, %cst_39 {dimension_numbers = #tpu.dot_dimension_numbers<[1], [0], [0], [1], [0, 0, 1, 1], [], []>} : vector<8x4xf32>, vector<4x16xf32>, vector<8x16xf32> -> vector<8x16xf32>
    %49 = arith.addf %42, %48 : vector<8x16xf32>
    %c0_i32_40 = arith.constant 0 : i32
    %50 = arith.addi %0, %c0_i32_40 : i32
    %c1_i32_41 = arith.constant 1 : i32
    %51 = arith.muli %50, %c1_i32_41 : i32
    %c2_i32 = arith.constant 2 : i32
    %52 = arith.addi %51, %c2_i32 : i32
    %c0_42 = arith.constant 0 : index
    %53 = arith.index_cast %52 : i32 to index
    %c0_43 = arith.constant 0 : index
    %c0_44 = arith.constant 0 : index
    %54 = vector.load %arg2[%c0_42, %53, %c0_43, %c0_44] : memref<1x18x4x18xf32, #tpu.memory_space<vmem>>, vector<1x1x4x16xf32>
    %55 = vector.shape_cast %54 : vector<1x1x4x16xf32> to vector<4x16xf32>
    %c6 = arith.constant 6 : index
    %c0_45 = arith.constant 0 : index
    %c0_46 = arith.constant 0 : index
    %56 = vector.load %arg3[%c6, %c0_45, %c0_46] : memref<9x8x4xf32, #tpu.memory_space<vmem>>, vector<1x8x4xf32>
    %57 = vector.shape_cast %56 : vector<1x8x4xf32> to vector<8x4xf32>
    %cst_47 = arith.constant dense<0.000000e+00> : vector<8x16xf32>
    %58 = tpu.matmul %57, %55, %cst_47 {dimension_numbers = #tpu.dot_dimension_numbers<[1], [0], [0], [1], [0, 0, 1, 1], [], []>} : vector<8x4xf32>, vector<4x16xf32>, vector<8x16xf32> -> vector<8x16xf32>
    %59 = arith.addf %49, %58 : vector<8x16xf32>
    %c0_48 = arith.constant 0 : index
    %60 = arith.index_cast %52 : i32 to index
    %c0_49 = arith.constant 0 : index
    %c1_50 = arith.constant 1 : index
    %61 = vector.load %arg2[%c0_48, %60, %c0_49, %c1_50] : memref<1x18x4x18xf32, #tpu.memory_space<vmem>>, vector<1x1x4x16xf32>
    %62 = vector.shape_cast %61 : vector<1x1x4x16xf32> to vector<4x16xf32>
    %c7 = arith.constant 7 : index
    %c0_51 = arith.constant 0 : index
    %c0_52 = arith.constant 0 : index
    %63 = vector.load %arg3[%c7, %c0_51, %c0_52] : memref<9x8x4xf32, #tpu.memory_space<vmem>>, vector<1x8x4xf32>
    %64 = vector.shape_cast %63 : vector<1x8x4xf32> to vector<8x4xf32>
    %cst_53 = arith.constant dense<0.000000e+00> : vector<8x16xf32>
    %65 = tpu.matmul %64, %62, %cst_53 {dimension_numbers = #tpu.dot_dimension_numbers<[1], [0], [0], [1], [0, 0, 1, 1], [], []>} : vector<8x4xf32>, vector<4x16xf32>, vector<8x16xf32> -> vector<8x16xf32>
    %66 = arith.addf %59, %65 : vector<8x16xf32>
    %c0_54 = arith.constant 0 : index
    %67 = arith.index_cast %52 : i32 to index
    %c0_55 = arith.constant 0 : index
    %c2_56 = arith.constant 2 : index
    %68 = vector.load %arg2[%c0_54, %67, %c0_55, %c2_56] : memref<1x18x4x18xf32, #tpu.memory_space<vmem>>, vector<1x1x4x16xf32>
    %69 = vector.shape_cast %68 : vector<1x1x4x16xf32> to vector<4x16xf32>
    %c8 = arith.constant 8 : index
    %c0_57 = arith.constant 0 : index
    %c0_58 = arith.constant 0 : index
    %70 = vector.load %arg3[%c8, %c0_57, %c0_58] : memref<9x8x4xf32, #tpu.memory_space<vmem>>, vector<1x8x4xf32>
    %71 = vector.shape_cast %70 : vector<1x8x4xf32> to vector<8x4xf32>
    %cst_59 = arith.constant dense<0.000000e+00> : vector<8x16xf32>
    %72 = tpu.matmul %71, %69, %cst_59 {dimension_numbers = #tpu.dot_dimension_numbers<[1], [0], [0], [1], [0, 0, 1, 1], [], []>} : vector<8x4xf32>, vector<4x16xf32>, vector<8x16xf32> -> vector<8x16xf32>
    %73 = arith.addf %66, %72 : vector<8x16xf32>
    %c0_60 = arith.constant 0 : index
    %c0_61 = arith.constant 0 : index
    %74 = vector.load %arg4[%c0_60, %c0_61] : memref<8x1xf32, #tpu.memory_space<vmem>>, vector<8x1xf32>
    %75 = vector.broadcast %74 : vector<8x1xf32> to vector<8x16xf32>
    %76 = arith.addf %73, %75 : vector<8x16xf32>
    %cst_62 = arith.constant 5.000000e-01 : f32
    %77 = vector.broadcast %cst_62 : f32 to vector<8x16xf32>
    %78 = arith.mulf %77, %76 : vector<8x16xf32>
    %cst_63 = arith.constant 4.471500e-02 : f32
    %79 = vector.broadcast %cst_63 : f32 to vector<8x16xf32>
    %80 = arith.mulf %79, %76 : vector<8x16xf32>
    %81 = arith.mulf %80, %76 : vector<8x16xf32>
    %82 = arith.mulf %81, %76 : vector<8x16xf32>
    %83 = arith.addf %76, %82 : vector<8x16xf32>
    %cst_64 = arith.constant 0.797884583 : f32
    %84 = vector.broadcast %cst_64 : f32 to vector<8x16xf32>
    %85 = arith.mulf %84, %83 : vector<8x16xf32>
    %86 = math.tanh %85 : vector<8x16xf32>
    %cst_65 = arith.constant 1.000000e+00 : f32
    %87 = vector.broadcast %cst_65 : f32 to vector<8x16xf32>
    %88 = arith.addf %87, %86 : vector<8x16xf32>
    %89 = arith.mulf %78, %88 : vector<8x16xf32>
    %c0_66 = arith.constant 0 : index
    %c0_67 = arith.constant 0 : index
    %90 = vector.load %arg5[%c0_66, %c0_67] : memref<16x32xf32, #tpu.memory_space<vmem>>, vector<16x32xf32>
    %cst_68 = arith.constant dense<0.000000e+00> : vector<8x32xf32>
    %91 = tpu.matmul %89, %90, %cst_68 {dimension_numbers = #tpu.dot_dimension_numbers<[1], [0], [0], [1], [0, 0, 1, 1], [], []>} : vector<8x16xf32>, vector<16x32xf32>, vector<8x32xf32> -> vector<8x32xf32>
    %c0_69 = arith.constant 0 : index
    %c0_70 = arith.constant 0 : index
    %c0_71 = arith.constant 0 : index
    %c0_72 = arith.constant 0 : index
    %92 = vector.load %arg6[%c0_69, %c0_70, %c0_71, %c0_72] : memref<1x8x16x32xf32, #tpu.memory_space<vmem>>, vector<1x8x1x32xf32>
    %93 = vector.shape_cast %92 : vector<1x8x1x32xf32> to vector<8x32xf32>
    %94 = vector.shape_cast %91 : vector<8x32xf32> to vector<1x8x1x32xf32>
    tpu.vector_store %arg6[%c0_69, %c0_70, %c0_71, %c0_72], %94 {strides = array<i32>} : memref<1x8x16x32xf32, #tpu.memory_space<vmem>>, vector<1x8x1x32xf32>,
    %c0_73 = arith.constant 0 : index
    %c0_74 = arith.constant 0 : index
    %c1_75 = arith.constant 1 : index
    %c0_76 = arith.constant 0 : index
    %95 = vector.load %arg6[%c0_73, %c0_74, %c1_75, %c0_76] : memref<1x8x16x32xf32, #tpu.memory_space<vmem>>, vector<1x8x1x32xf32>
    %96 = vector.shape_cast %95 : vector<1x8x1x32xf32> to vector<8x32xf32>
    %97 = vector.shape_cast %91 : vector<8x32xf32> to vector<1x8x1x32xf32>
    tpu.vector_store %arg6[%c0_73, %c0_74, %c1_75, %c0_76], %97 {strides = array<i32>} : memref<1x8x16x32xf32, #tpu.memory_space<vmem>>, vector<1x8x1x32xf32>,
    %cst_77 = arith.constant 0.000000e+00 : f32
    %98 = vector.broadcast %cst_77 : f32 to vector<8x16xf32>
    %c1_i32_78 = arith.constant 1 : i32
    %99 = arith.addi %0, %c1_i32_78 : i32
    %c1_i32_79 = arith.constant 1 : i32
    %100 = arith.muli %99, %c1_i32_79 : i32
    %c0_i32_80 = arith.constant 0 : i32
    %101 = arith.addi %100, %c0_i32_80 : i32
    %c0_81 = arith.constant 0 : index
    %102 = arith.index_cast %101 : i32 to index
    %c0_82 = arith.constant 0 : index
    %c0_83 = arith.constant 0 : index
    %103 = vector.load %arg2[%c0_81, %102, %c0_82, %c0_83] : memref<1x18x4x18xf32, #tpu.memory_space<vmem>>, vector<1x1x4x16xf32>
    %104 = vector.shape_cast %103 : vector<1x1x4x16xf32> to vector<4x16xf32>
    %c0_84 = arith.constant 0 : index
    %c0_85 = arith.constant 0 : index
    %c0_86 = arith.constant 0 : index
    %105 = vector.load %arg3[%c0_84, %c0_85, %c0_86] : memref<9x8x4xf32, #tpu.memory_space<vmem>>, vector<1x8x4xf32>
    %106 = vector.shape_cast %105 : vector<1x8x4xf32> to vector<8x4xf32>
    %cst_87 = arith.constant dense<0.000000e+00> : vector<8x16xf32>
    %107 = tpu.matmul %106, %104, %cst_87 {dimension_numbers = #tpu.dot_dimension_numbers<[1], [0], [0], [1], [0, 0, 1, 1], [], []>} : vector<8x4xf32>, vector<4x16xf32>, vector<8x16xf32> -> vector<8x16xf32>
    %108 = arith.addf %98, %107 : vector<8x16xf32>
    %c0_88 = arith.constant 0 : index
    %109 = arith.index_cast %101 : i32 to index
    %c0_89 = arith.constant 0 : index
    %c1_90 = arith.constant 1 : index
    %110 = vector.load %arg2[%c0_88, %109, %c0_89, %c1_90] : memref<1x18x4x18xf32, #tpu.memory_space<vmem>>, vector<1x1x4x16xf32>
    %111 = vector.shape_cast %110 : vector<1x1x4x16xf32> to vector<4x16xf32>
    %c1_91 = arith.constant 1 : index
    %c0_92 = arith.constant 0 : index
    %c0_93 = arith.constant 0 : index
    %112 = vector.load %arg3[%c1_91, %c0_92, %c0_93] : memref<9x8x4xf32, #tpu.memory_space<vmem>>, vector<1x8x4xf32>
    %113 = vector.shape_cast %112 : vector<1x8x4xf32> to vector<8x4xf32>
    %cst_94 = arith.constant dense<0.000000e+00> : vector<8x16xf32>
    %114 = tpu.matmul %113, %111, %cst_94 {dimension_numbers = #tpu.dot_dimension_numbers<[1], [0], [0], [1], [0, 0, 1, 1], [], []>} : vector<8x4xf32>, vector<4x16xf32>, vector<8x16xf32> -> vector<8x16xf32>
    %115 = arith.addf %108, %114 : vector<8x16xf32>
    %c0_95 = arith.constant 0 : index
    %116 = arith.index_cast %101 : i32 to index
    %c0_96 = arith.constant 0 : index
    %c2_97 = arith.constant 2 : index
    %117 = vector.load %arg2[%c0_95, %116, %c0_96, %c2_97] : memref<1x18x4x18xf32, #tpu.memory_space<vmem>>, vector<1x1x4x16xf32>
    %118 = vector.shape_cast %117 : vector<1x1x4x16xf32> to vector<4x16xf32>
    %c2_98 = arith.constant 2 : index
    %c0_99 = arith.constant 0 : index
    %c0_100 = arith.constant 0 : index
    %119 = vector.load %arg3[%c2_98, %c0_99, %c0_100] : memref<9x8x4xf32, #tpu.memory_space<vmem>>, vector<1x8x4xf32>
    %120 = vector.shape_cast %119 : vector<1x8x4xf32> to vector<8x4xf32>
    %cst_101 = arith.constant dense<0.000000e+00> : vector<8x16xf32>
    %121 = tpu.matmul %120, %118, %cst_101 {dimension_numbers = #tpu.dot_dimension_numbers<[1], [0], [0], [1], [0, 0, 1, 1], [], []>} : vector<8x4xf32>, vector<4x16xf32>, vector<8x16xf32> -> vector<8x16xf32>
    %122 = arith.addf %115, %121 : vector<8x16xf32>
    %c1_i32_102 = arith.constant 1 : i32
    %123 = arith.addi %0, %c1_i32_102 : i32
    %c1_i32_103 = arith.constant 1 : i32
    %124 = arith.muli %123, %c1_i32_103 : i32
    %c1_i32_104 = arith.constant 1 : i32
    %125 = arith.addi %124, %c1_i32_104 : i32
    %c0_105 = arith.constant 0 : index
    %126 = arith.index_cast %125 : i32 to index
    %c0_106 = arith.constant 0 : index
    %c0_107 = arith.constant 0 : index
    %127 = vector.load %arg2[%c0_105, %126, %c0_106, %c0_107] : memref<1x18x4x18xf32, #tpu.memory_space<vmem>>, vector<1x1x4x16xf32>
    %128 = vector.shape_cast %127 : vector<1x1x4x16xf32> to vector<4x16xf32>
    %c3_108 = arith.constant 3 : index
    %c0_109 = arith.constant 0 : index
    %c0_110 = arith.constant 0 : index
    %129 = vector.load %arg3[%c3_108, %c0_109, %c0_110] : memref<9x8x4xf32, #tpu.memory_space<vmem>>, vector<1x8x4xf32>
    %130 = vector.shape_cast %129 : vector<1x8x4xf32> to vector<8x4xf32>
    %cst_111 = arith.constant dense<0.000000e+00> : vector<8x16xf32>
    %131 = tpu.matmul %130, %128, %cst_111 {dimension_numbers = #tpu.dot_dimension_numbers<[1], [0], [0], [1], [0, 0, 1, 1], [], []>} : vector<8x4xf32>, vector<4x16xf32>, vector<8x16xf32> -> vector<8x16xf32>
    %132 = arith.addf %122, %131 : vector<8x16xf32>
    %c0_112 = arith.constant 0 : index
    %133 = arith.index_cast %125 : i32 to index
    %c0_113 = arith.constant 0 : index
    %c1_114 = arith.constant 1 : index
    %134 = vector.load %arg2[%c0_112, %133, %c0_113, %c1_114] : memref<1x18x4x18xf32, #tpu.memory_space<vmem>>, vector<1x1x4x16xf32>
    %135 = vector.shape_cast %134 : vector<1x1x4x16xf32> to vector<4x16xf32>
    %c4_115 = arith.constant 4 : index
    %c0_116 = arith.constant 0 : index
    %c0_117 = arith.constant 0 : index
    %136 = vector.load %arg3[%c4_115, %c0_116, %c0_117] : memref<9x8x4xf32, #tpu.memory_space<vmem>>, vector<1x8x4xf32>
    %137 = vector.shape_cast %136 : vector<1x8x4xf32> to vector<8x4xf32>
    %cst_118 = arith.constant dense<0.000000e+00> : vector<8x16xf32>
    %138 = tpu.matmul %137, %135, %cst_118 {dimension_numbers = #tpu.dot_dimension_numbers<[1], [0], [0], [1], [0, 0, 1, 1], [], []>} : vector<8x4xf32>, vector<4x16xf32>, vector<8x16xf32> -> vector<8x16xf32>
    %139 = arith.addf %132, %138 : vector<8x16xf32>
    %c0_119 = arith.constant 0 : index
    %140 = arith.index_cast %125 : i32 to index
    %c0_120 = arith.constant 0 : index
    %c2_121 = arith.constant 2 : index
    %141 = vector.load %arg2[%c0_119, %140, %c0_120, %c2_121] : memref<1x18x4x18xf32, #tpu.memory_space<vmem>>, vector<1x1x4x16xf32>
    %142 = vector.shape_cast %141 : vector<1x1x4x16xf32> to vector<4x16xf32>
    %c5_122 = arith.constant 5 : index
    %c0_123 = arith.constant 0 : index
    %c0_124 = arith.constant 0 : index
    %143 = vector.load %arg3[%c5_122, %c0_123, %c0_124] : memref<9x8x4xf32, #tpu.memory_space<vmem>>, vector<1x8x4xf32>
    %144 = vector.shape_cast %143 : vector<1x8x4xf32> to vector<8x4xf32>
    %cst_125 = arith.constant dense<0.000000e+00> : vector<8x16xf32>
    %145 = tpu.matmul %144, %142, %cst_125 {dimension_numbers = #tpu.dot_dimension_numbers<[1], [0], [0], [1], [0, 0, 1, 1], [], []>} : vector<8x4xf32>, vector<4x16xf32>, vector<8x16xf32> -> vector<8x16xf32>
    %146 = arith.addf %139, %145 : vector<8x16xf32>
    %c1_i32_126 = arith.constant 1 : i32
    %147 = arith.addi %0, %c1_i32_126 : i32
    %c1_i32_127 = arith.constant 1 : i32
    %148 = arith.muli %147, %c1_i32_127 : i32
    %c2_i32_128 = arith.constant 2 : i32
    %149 = arith.addi %148, %c2_i32_128 : i32
    %c0_129 = arith.constant 0 : index
    %150 = arith.index_cast %149 : i32 to index
    %c0_130 = arith.constant 0 : index
    %c0_131 = arith.constant 0 : index
    %151 = vector.load %arg2[%c0_129, %150, %c0_130, %c0_131] : memref<1x18x4x18xf32, #tpu.memory_space<vmem>>, vector<1x1x4x16xf32>
    %152 = vector.shape_cast %151 : vector<1x1x4x16xf32> to vector<4x16xf32>
    %c6_132 = arith.constant 6 : index
    %c0_133 = arith.constant 0 : index
    %c0_134 = arith.constant 0 : index
    %153 = vector.load %arg3[%c6_132, %c0_133, %c0_134] : memref<9x8x4xf32, #tpu.memory_space<vmem>>, vector<1x8x4xf32>
    %154 = vector.shape_cast %153 : vector<1x8x4xf32> to vector<8x4xf32>
    %cst_135 = arith.constant dense<0.000000e+00> : vector<8x16xf32>
    %155 = tpu.matmul %154, %152, %cst_135 {dimension_numbers = #tpu.dot_dimension_numbers<[1], [0], [0], [1], [0, 0, 1, 1], [], []>} : vector<8x4xf32>, vector<4x16xf32>, vector<8x16xf32> -> vector<8x16xf32>
    %156 = arith.addf %146, %155 : vector<8x16xf32>
    %c0_136 = arith.constant 0 : index
    %157 = arith.index_cast %149 : i32 to index
    %c0_137 = arith.constant 0 : index
    %c1_138 = arith.constant 1 : index
    %158 = vector.load %arg2[%c0_136, %157, %c0_137, %c1_138] : memref<1x18x4x18xf32, #tpu.memory_space<vmem>>, vector<1x1x4x16xf32>
    %159 = vector.shape_cast %158 : vector<1x1x4x16xf32> to vector<4x16xf32>
    %c7_139 = arith.constant 7 : index
    %c0_140 = arith.constant 0 : index
    %c0_141 = arith.constant 0 : index
    %160 = vector.load %arg3[%c7_139, %c0_140, %c0_141] : memref<9x8x4xf32, #tpu.memory_space<vmem>>, vector<1x8x4xf32>
    %161 = vector.shape_cast %160 : vector<1x8x4xf32> to vector<8x4xf32>
    %cst_142 = arith.constant dense<0.000000e+00> : vector<8x16xf32>
    %162 = tpu.matmul %161, %159, %cst_142 {dimension_numbers = #tpu.dot_dimension_numbers<[1], [0], [0], [1], [0, 0, 1, 1], [], []>} : vector<8x4xf32>, vector<4x16xf32>, vector<8x16xf32> -> vector<8x16xf32>
    %163 = arith.addf %156, %162 : vector<8x16xf32>
    %c0_143 = arith.constant 0 : index
    %164 = arith.index_cast %149 : i32 to index
    %c0_144 = arith.constant 0 : index
    %c2_145 = arith.constant 2 : index
    %165 = vector.load %arg2[%c0_143, %164, %c0_144, %c2_145] : memref<1x18x4x18xf32, #tpu.memory_space<vmem>>, vector<1x1x4x16xf32>
    %166 = vector.shape_cast %165 : vector<1x1x4x16xf32> to vector<4x16xf32>
    %c8_146 = arith.constant 8 : index
    %c0_147 = arith.constant 0 : index
    %c0_148 = arith.constant 0 : index
    %167 = vector.load %arg3[%c8_146, %c0_147, %c0_148] : memref<9x8x4xf32, #tpu.memory_space<vmem>>, vector<1x8x4xf32>
    %168 = vector.shape_cast %167 : vector<1x8x4xf32> to vector<8x4xf32>
    %cst_149 = arith.constant dense<0.000000e+00> : vector<8x16xf32>
    %169 = tpu.matmul %168, %166, %cst_149 {dimension_numbers = #tpu.dot_dimension_numbers<[1], [0], [0], [1], [0, 0, 1, 1], [], []>} : vector<8x4xf32>, vector<4x16xf32>, vector<8x16xf32> -> vector<8x16xf32>
    %170 = arith.addf %163, %169 : vector<8x16xf32>
    %c0_150 = arith.constant 0 : index
    %c0_151 = arith.constant 0 : index
    %171 = vector.load %arg4[%c0_150, %c0_151] : memref<8x1xf32, #tpu.memory_space<vmem>>, vector<8x1xf32>
    %172 = vector.broadcast %171 : vector<8x1xf32> to vector<8x16xf32>
    %173 = arith.addf %170, %172 : vector<8x16xf32>
    %cst_152 = arith.constant 5.000000e-01 : f32
    %174 = vector.broadcast %cst_152 : f32 to vector<8x16xf32>
    %175 = arith.mulf %174, %173 : vector<8x16xf32>
    %cst_153 = arith.constant 4.471500e-02 : f32
    %176 = vector.broadcast %cst_153 : f32 to vector<8x16xf32>
    %177 = arith.mulf %176, %173 : vector<8x16xf32>
    %178 = arith.mulf %177, %173 : vector<8x16xf32>
    %179 = arith.mulf %178, %173 : vector<8x16xf32>
    %180 = arith.addf %173, %179 : vector<8x16xf32>
    %cst_154 = arith.constant 0.797884583 : f32
    %181 = vector.broadcast %cst_154 : f32 to vector<8x16xf32>
    %182 = arith.mulf %181, %180 : vector<8x16xf32>
    %183 = math.tanh %182 : vector<8x16xf32>
    %cst_155 = arith.constant 1.000000e+00 : f32
    %184 = vector.broadcast %cst_155 : f32 to vector<8x16xf32>
    %185 = arith.addf %184, %183 : vector<8x16xf32>
    %186 = arith.mulf %175, %185 : vector<8x16xf32>
    %c0_156 = arith.constant 0 : index
    %c0_157 = arith.constant 0 : index
    %187 = vector.load %arg5[%c0_156, %c0_157] : memref<16x32xf32, #tpu.memory_space<vmem>>, vector<16x32xf32>
    %cst_158 = arith.constant dense<0.000000e+00> : vector<8x32xf32>
    %188 = tpu.matmul %186, %187, %cst_158 {dimension_numbers = #tpu.dot_dimension_numbers<[1], [0], [0], [1], [0, 0, 1, 1], [], []>} : vector<8x16xf32>, vector<16x32xf32>, vector<8x32xf32> -> vector<8x32xf32>
    %c0_159 = arith.constant 0 : index
    %c0_160 = arith.constant 0 : index
    %c2_161 = arith.constant 2 : index
    %c0_162 = arith.constant 0 : index
    %189 = vector.load %arg6[%c0_159, %c0_160, %c2_161, %c0_162] : memref<1x8x16x32xf32, #tpu.memory_space<vmem>>, vector<1x8x1x32xf32>
    %190 = vector.shape_cast %189 : vector<1x8x1x32xf32> to vector<8x32xf32>
    %191 = vector.shape_cast %188 : vector<8x32xf32> to vector<1x8x1x32xf32>
    tpu.vector_store %arg6[%c0_159, %c0_160, %c2_161, %c0_162], %191 {strides = array<i32>} : memref<1x8x16x32xf32, #tpu.memory_space<vmem>>, vector<1x8x1x32xf32>,
    %c0_163 = arith.constant 0 : index
    %c0_164 = arith.constant 0 : index
    %c3_165 = arith.constant 3 : index
    %c0_166 = arith.constant 0 : index
    %192 = vector.load %arg6[%c0_163, %c0_164, %c3_165, %c0_166] : memref<1x8x16x32xf32, #tpu.memory_space<vmem>>, vector<1x8x1x32xf32>
    %193 = vector.shape_cast %192 : vector<1x8x1x32xf32> to vector<8x32xf32>
    %194 = vector.shape_cast %188 : vector<8x32xf32> to vector<1x8x1x32xf32>
    tpu.vector_store %arg6[%c0_163, %c0_164, %c3_165, %c0_166], %194 {strides = array<i32>} : memref<1x8x16x32xf32, #tpu.memory_space<vmem>>, vector<1x8x1x32xf32>,
    %cst_167 = arith.constant 0.000000e+00 : f32
    %195 = vector.broadcast %cst_167 : f32 to vector<8x16xf32>
    %c2_i32_168 = arith.constant 2 : i32
    %196 = arith.addi %0, %c2_i32_168 : i32
    %c1_i32_169 = arith.constant 1 : i32
    %197 = arith.muli %196, %c1_i32_169 : i32
    %c0_i32_170 = arith.constant 0 : i32
    %198 = arith.addi %197, %c0_i32_170 : i32
    %c0_171 = arith.constant 0 : index
    %199 = arith.index_cast %198 : i32 to index
    %c0_172 = arith.constant 0 : index
    %c0_173 = arith.constant 0 : index
    %200 = vector.load %arg2[%c0_171, %199, %c0_172, %c0_173] : memref<1x18x4x18xf32, #tpu.memory_space<vmem>>, vector<1x1x4x16xf32>
    %201 = vector.shape_cast %200 : vector<1x1x4x16xf32> to vector<4x16xf32>
    %c0_174 = arith.constant 0 : index
    %c0_175 = arith.constant 0 : index
    %c0_176 = arith.constant 0 : index
    %202 = vector.load %arg3[%c0_174, %c0_175, %c0_176] : memref<9x8x4xf32, #tpu.memory_space<vmem>>, vector<1x8x4xf32>
    %203 = vector.shape_cast %202 : vector<1x8x4xf32> to vector<8x4xf32>
    %cst_177 = arith.constant dense<0.000000e+00> : vector<8x16xf32>
    %204 = tpu.matmul %203, %201, %cst_177 {dimension_numbers = #tpu.dot_dimension_numbers<[1], [0], [0], [1], [0, 0, 1, 1], [], []>} : vector<8x4xf32>, vector<4x16xf32>, vector<8x16xf32> -> vector<8x16xf32>
    %205 = arith.addf %195, %204 : vector<8x16xf32>
    %c0_178 = arith.constant 0 : index
    %206 = arith.index_cast %198 : i32 to index
    %c0_179 = arith.constant 0 : index
    %c1_180 = arith.constant 1 : index
    %207 = vector.load %arg2[%c0_178, %206, %c0_179, %c1_180] : memref<1x18x4x18xf32, #tpu.memory_space<vmem>>, vector<1x1x4x16xf32>
    %208 = vector.shape_cast %207 : vector<1x1x4x16xf32> to vector<4x16xf32>
    %c1_181 = arith.constant 1 : index
    %c0_182 = arith.constant 0 : index
    %c0_183 = arith.constant 0 : index
    %209 = vector.load %arg3[%c1_181, %c0_182, %c0_183] : memref<9x8x4xf32, #tpu.memory_space<vmem>>, vector<1x8x4xf32>
    %210 = vector.shape_cast %209 : vector<1x8x4xf32> to vector<8x4xf32>
    %cst_184 = arith.constant dense<0.000000e+00> : vector<8x16xf32>
    %211 = tpu.matmul %210, %208, %cst_184 {dimension_numbers = #tpu.dot_dimension_numbers<[1], [0], [0], [1], [0, 0, 1, 1], [], []>} : vector<8x4xf32>, vector<4x16xf32>, vector<8x16xf32> -> vector<8x16xf32>
    %212 = arith.addf %205, %211 : vector<8x16xf32>
    %c0_185 = arith.constant 0 : index
    %213 = arith.index_cast %198 : i32 to index
    %c0_186 = arith.constant 0 : index
    %c2_187 = arith.constant 2 : index
    %214 = vector.load %arg2[%c0_185, %213, %c0_186, %c2_187] : memref<1x18x4x18xf32, #tpu.memory_space<vmem>>, vector<1x1x4x16xf32>
    %215 = vector.shape_cast %214 : vector<1x1x4x16xf32> to vector<4x16xf32>
    %c2_188 = arith.constant 2 : index
    %c0_189 = arith.constant 0 : index
    %c0_190 = arith.constant 0 : index
    %216 = vector.load %arg3[%c2_188, %c0_189, %c0_190] : memref<9x8x4xf32, #tpu.memory_space<vmem>>, vector<1x8x4xf32>
    %217 = vector.shape_cast %216 : vector<1x8x4xf32> to vector<8x4xf32>
    %cst_191 = arith.constant dense<0.000000e+00> : vector<8x16xf32>
    %218 = tpu.matmul %217, %215, %cst_191 {dimension_numbers = #tpu.dot_dimension_numbers<[1], [0], [0], [1], [0, 0, 1, 1], [], []>} : vector<8x4xf32>, vector<4x16xf32>, vector<8x16xf32> -> vector<8x16xf32>
    %219 = arith.addf %212, %218 : vector<8x16xf32>
    %c2_i32_192 = arith.constant 2 : i32
    %220 = arith.addi %0, %c2_i32_192 : i32
    %c1_i32_193 = arith.constant 1 : i32
    %221 = arith.muli %220, %c1_i32_193 : i32
    %c1_i32_194 = arith.constant 1 : i32
    %222 = arith.addi %221, %c1_i32_194 : i32
    %c0_195 = arith.constant 0 : index
    %223 = arith.index_cast %222 : i32 to index
    %c0_196 = arith.constant 0 : index
    %c0_197 = arith.constant 0 : index
    %224 = vector.load %arg2[%c0_195, %223, %c0_196, %c0_197] : memref<1x18x4x18xf32, #tpu.memory_space<vmem>>, vector<1x1x4x16xf32>
    %225 = vector.shape_cast %224 : vector<1x1x4x16xf32> to vector<4x16xf32>
    %c3_198 = arith.constant 3 : index
    %c0_199 = arith.constant 0 : index
    %c0_200 = arith.constant 0 : index
    %226 = vector.load %arg3[%c3_198, %c0_199, %c0_200] : memref<9x8x4xf32, #tpu.memory_space<vmem>>, vector<1x8x4xf32>
    %227 = vector.shape_cast %226 : vector<1x8x4xf32> to vector<8x4xf32>
    %cst_201 = arith.constant dense<0.000000e+00> : vector<8x16xf32>
    %228 = tpu.matmul %227, %225, %cst_201 {dimension_numbers = #tpu.dot_dimension_numbers<[1], [0], [0], [1], [0, 0, 1, 1], [], []>} : vector<8x4xf32>, vector<4x16xf32>, vector<8x16xf32> -> vector<8x16xf32>
    %229 = arith.addf %219, %228 : vector<8x16xf32>
    %c0_202 = arith.constant 0 : index
    %230 = arith.index_cast %222 : i32 to index
    %c0_203 = arith.constant 0 : index
    %c1_204 = arith.constant 1 : index
    %231 = vector.load %arg2[%c0_202, %230, %c0_203, %c1_204] : memref<1x18x4x18xf32, #tpu.memory_space<vmem>>, vector<1x1x4x16xf32>
    %232 = vector.shape_cast %231 : vector<1x1x4x16xf32> to vector<4x16xf32>
    %c4_205 = arith.constant 4 : index
    %c0_206 = arith.constant 0 : index
    %c0_207 = arith.constant 0 : index
    %233 = vector.load %arg3[%c4_205, %c0_206, %c0_207] : memref<9x8x4xf32, #tpu.memory_space<vmem>>, vector<1x8x4xf32>
    %234 = vector.shape_cast %233 : vector<1x8x4xf32> to vector<8x4xf32>
    %cst_208 = arith.constant dense<0.000000e+00> : vector<8x16xf32>
    %235 = tpu.matmul %234, %232, %cst_208 {dimension_numbers = #tpu.dot_dimension_numbers<[1], [0], [0], [1], [0, 0, 1, 1], [], []>} : vector<8x4xf32>, vector<4x16xf32>, vector<8x16xf32> -> vector<8x16xf32>
    %236 = arith.addf %229, %235 : vector<8x16xf32>
    %c0_209 = arith.constant 0 : index
    %237 = arith.index_cast %222 : i32 to index
    %c0_210 = arith.constant 0 : index
    %c2_211 = arith.constant 2 : index
    %238 = vector.load %arg2[%c0_209, %237, %c0_210, %c2_211] : memref<1x18x4x18xf32, #tpu.memory_space<vmem>>, vector<1x1x4x16xf32>
    %239 = vector.shape_cast %238 : vector<1x1x4x16xf32> to vector<4x16xf32>
    %c5_212 = arith.constant 5 : index
    %c0_213 = arith.constant 0 : index
    %c0_214 = arith.constant 0 : index
    %240 = vector.load %arg3[%c5_212, %c0_213, %c0_214] : memref<9x8x4xf32, #tpu.memory_space<vmem>>, vector<1x8x4xf32>
    %241 = vector.shape_cast %240 : vector<1x8x4xf32> to vector<8x4xf32>
    %cst_215 = arith.constant dense<0.000000e+00> : vector<8x16xf32>
    %242 = tpu.matmul %241, %239, %cst_215 {dimension_numbers = #tpu.dot_dimension_numbers<[1], [0], [0], [1], [0, 0, 1, 1], [], []>} : vector<8x4xf32>, vector<4x16xf32>, vector<8x16xf32> -> vector<8x16xf32>
    %243 = arith.addf %236, %242 : vector<8x16xf32>
    %c2_i32_216 = arith.constant 2 : i32
    %244 = arith.addi %0, %c2_i32_216 : i32
    %c1_i32_217 = arith.constant 1 : i32
    %245 = arith.muli %244, %c1_i32_217 : i32
    %c2_i32_218 = arith.constant 2 : i32
    %246 = arith.addi %245, %c2_i32_218 : i32
    %c0_219 = arith.constant 0 : index
    %247 = arith.index_cast %246 : i32 to index
    %c0_220 = arith.constant 0 : index
    %c0_221 = arith.constant 0 : index
    %248 = vector.load %arg2[%c0_219, %247, %c0_220, %c0_221] : memref<1x18x4x18xf32, #tpu.memory_space<vmem>>, vector<1x1x4x16xf32>
    %249 = vector.shape_cast %248 : vector<1x1x4x16xf32> to vector<4x16xf32>
    %c6_222 = arith.constant 6 : index
    %c0_223 = arith.constant 0 : index
    %c0_224 = arith.constant 0 : index
    %250 = vector.load %arg3[%c6_222, %c0_223, %c0_224] : memref<9x8x4xf32, #tpu.memory_space<vmem>>, vector<1x8x4xf32>
    %251 = vector.shape_cast %250 : vector<1x8x4xf32> to vector<8x4xf32>
    %cst_225 = arith.constant dense<0.000000e+00> : vector<8x16xf32>
    %252 = tpu.matmul %251, %249, %cst_225 {dimension_numbers = #tpu.dot_dimension_numbers<[1], [0], [0], [1], [0, 0, 1, 1], [], []>} : vector<8x4xf32>, vector<4x16xf32>, vector<8x16xf32> -> vector<8x16xf32>
    %253 = arith.addf %243, %252 : vector<8x16xf32>
    %c0_226 = arith.constant 0 : index
    %254 = arith.index_cast %246 : i32 to index
    %c0_227 = arith.constant 0 : index
    %c1_228 = arith.constant 1 : index
    %255 = vector.load %arg2[%c0_226, %254, %c0_227, %c1_228] : memref<1x18x4x18xf32, #tpu.memory_space<vmem>>, vector<1x1x4x16xf32>
    %256 = vector.shape_cast %255 : vector<1x1x4x16xf32> to vector<4x16xf32>
    %c7_229 = arith.constant 7 : index
    %c0_230 = arith.constant 0 : index
    %c0_231 = arith.constant 0 : index
    %257 = vector.load %arg3[%c7_229, %c0_230, %c0_231] : memref<9x8x4xf32, #tpu.memory_space<vmem>>, vector<1x8x4xf32>
    %258 = vector.shape_cast %257 : vector<1x8x4xf32> to vector<8x4xf32>
    %cst_232 = arith.constant dense<0.000000e+00> : vector<8x16xf32>
    %259 = tpu.matmul %258, %256, %cst_232 {dimension_numbers = #tpu.dot_dimension_numbers<[1], [0], [0], [1], [0, 0, 1, 1], [], []>} : vector<8x4xf32>, vector<4x16xf32>, vector<8x16xf32> -> vector<8x16xf32>
    %260 = arith.addf %253, %259 : vector<8x16xf32>
    %c0_233 = arith.constant 0 : index
    %261 = arith.index_cast %246 : i32 to index
    %c0_234 = arith.constant 0 : index
    %c2_235 = arith.constant 2 : index
    %262 = vector.load %arg2[%c0_233, %261, %c0_234, %c2_235] : memref<1x18x4x18xf32, #tpu.memory_space<vmem>>, vector<1x1x4x16xf32>
    %263 = vector.shape_cast %262 : vector<1x1x4x16xf32> to vector<4x16xf32>
    %c8_236 = arith.constant 8 : index
    %c0_237 = arith.constant 0 : index
    %c0_238 = arith.constant 0 : index
    %264 = vector.load %arg3[%c8_236, %c0_237, %c0_238] : memref<9x8x4xf32, #tpu.memory_space<vmem>>, vector<1x8x4xf32>
    %265 = vector.shape_cast %264 : vector<1x8x4xf32> to vector<8x4xf32>
    %cst_239 = arith.constant dense<0.000000e+00> : vector<8x16xf32>
    %266 = tpu.matmul %265, %263, %cst_239 {dimension_numbers = #tpu.dot_dimension_numbers<[1], [0], [0], [1], [0, 0, 1, 1], [], []>} : vector<8x4xf32>, vector<4x16xf32>, vector<8x16xf32> -> vector<8x16xf32>
    %267 = arith.addf %260, %266 : vector<8x16xf32>
    %c0_240 = arith.constant 0 : index
    %c0_241 = arith.constant 0 : index
    %268 = vector.load %arg4[%c0_240, %c0_241] : memref<8x1xf32, #tpu.memory_space<vmem>>, vector<8x1xf32>
    %269 = vector.broadcast %268 : vector<8x1xf32> to vector<8x16xf32>
    %270 = arith.addf %267, %269 : vector<8x16xf32>
    %cst_242 = arith.constant 5.000000e-01 : f32
    %271 = vector.broadcast %cst_242 : f32 to vector<8x16xf32>
    %272 = arith.mulf %271, %270 : vector<8x16xf32>
    %cst_243 = arith.constant 4.471500e-02 : f32
    %273 = vector.broadcast %cst_243 : f32 to vector<8x16xf32>
    %274 = arith.mulf %273, %270 : vector<8x16xf32>
    %275 = arith.mulf %274, %270 : vector<8x16xf32>
    %276 = arith.mulf %275, %270 : vector<8x16xf32>
    %277 = arith.addf %270, %276 : vector<8x16xf32>
    %cst_244 = arith.constant 0.797884583 : f32
    %278 = vector.broadcast %cst_244 : f32 to vector<8x16xf32>
    %279 = arith.mulf %278, %277 : vector<8x16xf32>
    %280 = math.tanh %279 : vector<8x16xf32>
    %cst_245 = arith.constant 1.000000e+00 : f32
    %281 = vector.broadcast %cst_245 : f32 to vector<8x16xf32>
    %282 = arith.addf %281, %280 : vector<8x16xf32>
    %283 = arith.mulf %272, %282 : vector<8x16xf32>
    %c0_246 = arith.constant 0 : index
    %c0_247 = arith.constant 0 : index
    %284 = vector.load %arg5[%c0_246, %c0_247] : memref<16x32xf32, #tpu.memory_space<vmem>>, vector<16x32xf32>
    %cst_248 = arith.constant dense<0.000000e+00> : vector<8x32xf32>
    %285 = tpu.matmul %283, %284, %cst_248 {dimension_numbers = #tpu.dot_dimension_numbers<[1], [0], [0], [1], [0, 0, 1, 1], [], []>} : vector<8x16xf32>, vector<16x32xf32>, vector<8x32xf32> -> vector<8x32xf32>
    %c0_249 = arith.constant 0 : index
    %c0_250 = arith.constant 0 : index
    %c4_251 = arith.constant 4 : index
    %c0_252 = arith.constant 0 : index
    %286 = vector.load %arg6[%c0_249, %c0_250, %c4_251, %c0_252] : memref<1x8x16x32xf32, #tpu.memory_space<vmem>>, vector<1x8x1x32xf32>
    %287 = vector.shape_cast %286 : vector<1x8x1x32xf32> to vector<8x32xf32>
    %288 = vector.shape_cast %285 : vector<8x32xf32> to vector<1x8x1x32xf32>
    tpu.vector_store %arg6[%c0_249, %c0_250, %c4_251, %c0_252], %288 {strides = array<i32>} : memref<1x8x16x32xf32, #tpu.memory_space<vmem>>, vector<1x8x1x32xf32>,
    %c0_253 = arith.constant 0 : index
    %c0_254 = arith.constant 0 : index
    %c5_255 = arith.constant 5 : index
    %c0_256 = arith.constant 0 : index
    %289 = vector.load %arg6[%c0_253, %c0_254, %c5_255, %c0_256] : memref<1x8x16x32xf32, #tpu.memory_space<vmem>>, vector<1x8x1x32xf32>
    %290 = vector.shape_cast %289 : vector<1x8x1x32xf32> to vector<8x32xf32>
    %291 = vector.shape_cast %285 : vector<8x32xf32> to vector<1x8x1x32xf32>
    tpu.vector_store %arg6[%c0_253, %c0_254, %c5_255, %c0_256], %291 {strides = array<i32>} : memref<1x8x16x32xf32, #tpu.memory_space<vmem>>, vector<1x8x1x32xf32>,
    %cst_257 = arith.constant 0.000000e+00 : f32
    %292 = vector.broadcast %cst_257 : f32 to vector<8x16xf32>
    %c3_i32 = arith.constant 3 : i32
    %293 = arith.addi %0, %c3_i32 : i32
    %c1_i32_258 = arith.constant 1 : i32
    %294 = arith.muli %293, %c1_i32_258 : i32
    %c0_i32_259 = arith.constant 0 : i32
    %295 = arith.addi %294, %c0_i32_259 : i32
    %c0_260 = arith.constant 0 : index
    %296 = arith.index_cast %295 : i32 to index
    %c0_261 = arith.constant 0 : index
    %c0_262 = arith.constant 0 : index
    %297 = vector.load %arg2[%c0_260, %296, %c0_261, %c0_262] : memref<1x18x4x18xf32, #tpu.memory_space<vmem>>, vector<1x1x4x16xf32>
    %298 = vector.shape_cast %297 : vector<1x1x4x16xf32> to vector<4x16xf32>
    %c0_263 = arith.constant 0 : index
    %c0_264 = arith.constant 0 : index
    %c0_265 = arith.constant 0 : index
    %299 = vector.load %arg3[%c0_263, %c0_264, %c0_265] : memref<9x8x4xf32, #tpu.memory_space<vmem>>, vector<1x8x4xf32>
    %300 = vector.shape_cast %299 : vector<1x8x4xf32> to vector<8x4xf32>
    %cst_266 = arith.constant dense<0.000000e+00> : vector<8x16xf32>
    %301 = tpu.matmul %300, %298, %cst_266 {dimension_numbers = #tpu.dot_dimension_numbers<[1], [0], [0], [1], [0, 0, 1, 1], [], []>} : vector<8x4xf32>, vector<4x16xf32>, vector<8x16xf32> -> vector<8x16xf32>
    %302 = arith.addf %292, %301 : vector<8x16xf32>
    %c0_267 = arith.constant 0 : index
    %303 = arith.index_cast %295 : i32 to index
    %c0_268 = arith.constant 0 : index
    %c1_269 = arith.constant 1 : index
    %304 = vector.load %arg2[%c0_267, %303, %c0_268, %c1_269] : memref<1x18x4x18xf32, #tpu.memory_space<vmem>>, vector<1x1x4x16xf32>
    %305 = vector.shape_cast %304 : vector<1x1x4x16xf32> to vector<4x16xf32>
    %c1_270 = arith.constant 1 : index
    %c0_271 = arith.constant 0 : index
    %c0_272 = arith.constant 0 : index
    %306 = vector.load %arg3[%c1_270, %c0_271, %c0_272] : memref<9x8x4xf32, #tpu.memory_space<vmem>>, vector<1x8x4xf32>
    %307 = vector.shape_cast %306 : vector<1x8x4xf32> to vector<8x4xf32>
    %cst_273 = arith.constant dense<0.000000e+00> : vector<8x16xf32>
    %308 = tpu.matmul %307, %305, %cst_273 {dimension_numbers = #tpu.dot_dimension_numbers<[1], [0], [0], [1], [0, 0, 1, 1], [], []>} : vector<8x4xf32>, vector<4x16xf32>, vector<8x16xf32> -> vector<8x16xf32>
    %309 = arith.addf %302, %308 : vector<8x16xf32>
    %c0_274 = arith.constant 0 : index
    %310 = arith.index_cast %295 : i32 to index
    %c0_275 = arith.constant 0 : index
    %c2_276 = arith.constant 2 : index
    %311 = vector.load %arg2[%c0_274, %310, %c0_275, %c2_276] : memref<1x18x4x18xf32, #tpu.memory_space<vmem>>, vector<1x1x4x16xf32>
    %312 = vector.shape_cast %311 : vector<1x1x4x16xf32> to vector<4x16xf32>
    %c2_277 = arith.constant 2 : index
    %c0_278 = arith.constant 0 : index
    %c0_279 = arith.constant 0 : index
    %313 = vector.load %arg3[%c2_277, %c0_278, %c0_279] : memref<9x8x4xf32, #tpu.memory_space<vmem>>, vector<1x8x4xf32>
    %314 = vector.shape_cast %313 : vector<1x8x4xf32> to vector<8x4xf32>
    %cst_280 = arith.constant dense<0.000000e+00> : vector<8x16xf32>
    %315 = tpu.matmul %314, %312, %cst_280 {dimension_numbers = #tpu.dot_dimension_numbers<[1], [0], [0], [1], [0, 0, 1, 1], [], []>} : vector<8x4xf32>, vector<4x16xf32>, vector<8x16xf32> -> vector<8x16xf32>
    %316 = arith.addf %309, %315 : vector<8x16xf32>
    %c3_i32_281 = arith.constant 3 : i32
    %317 = arith.addi %0, %c3_i32_281 : i32
    %c1_i32_282 = arith.constant 1 : i32
    %318 = arith.muli %317, %c1_i32_282 : i32
    %c1_i32_283 = arith.constant 1 : i32
    %319 = arith.addi %318, %c1_i32_283 : i32
    %c0_284 = arith.constant 0 : index
    %320 = arith.index_cast %319 : i32 to index
    %c0_285 = arith.constant 0 : index
    %c0_286 = arith.constant 0 : index
    %321 = vector.load %arg2[%c0_284, %320, %c0_285, %c0_286] : memref<1x18x4x18xf32, #tpu.memory_space<vmem>>, vector<1x1x4x16xf32>
    %322 = vector.shape_cast %321 : vector<1x1x4x16xf32> to vector<4x16xf32>
    %c3_287 = arith.constant 3 : index
    %c0_288 = arith.constant 0 : index
    %c0_289 = arith.constant 0 : index
    %323 = vector.load %arg3[%c3_287, %c0_288, %c0_289] : memref<9x8x4xf32, #tpu.memory_space<vmem>>, vector<1x8x4xf32>
    %324 = vector.shape_cast %323 : vector<1x8x4xf32> to vector<8x4xf32>
    %cst_290 = arith.constant dense<0.000000e+00> : vector<8x16xf32>
    %325 = tpu.matmul %324, %322, %cst_290 {dimension_numbers = #tpu.dot_dimension_numbers<[1], [0], [0], [1], [0, 0, 1, 1], [], []>} : vector<8x4xf32>, vector<4x16xf32>, vector<8x16xf32> -> vector<8x16xf32>
    %326 = arith.addf %316, %325 : vector<8x16xf32>
    %c0_291 = arith.constant 0 : index
    %327 = arith.index_cast %319 : i32 to index
    %c0_292 = arith.constant 0 : index
    %c1_293 = arith.constant 1 : index
    %328 = vector.load %arg2[%c0_291, %327, %c0_292, %c1_293] : memref<1x18x4x18xf32, #tpu.memory_space<vmem>>, vector<1x1x4x16xf32>
    %329 = vector.shape_cast %328 : vector<1x1x4x16xf32> to vector<4x16xf32>
    %c4_294 = arith.constant 4 : index
    %c0_295 = arith.constant 0 : index
    %c0_296 = arith.constant 0 : index
    %330 = vector.load %arg3[%c4_294, %c0_295, %c0_296] : memref<9x8x4xf32, #tpu.memory_space<vmem>>, vector<1x8x4xf32>
    %331 = vector.shape_cast %330 : vector<1x8x4xf32> to vector<8x4xf32>
    %cst_297 = arith.constant dense<0.000000e+00> : vector<8x16xf32>
    %332 = tpu.matmul %331, %329, %cst_297 {dimension_numbers = #tpu.dot_dimension_numbers<[1], [0], [0], [1], [0, 0, 1, 1], [], []>} : vector<8x4xf32>, vector<4x16xf32>, vector<8x16xf32> -> vector<8x16xf32>
    %333 = arith.addf %326, %332 : vector<8x16xf32>
    %c0_298 = arith.constant 0 : index
    %334 = arith.index_cast %319 : i32 to index
    %c0_299 = arith.constant 0 : index
    %c2_300 = arith.constant 2 : index
    %335 = vector.load %arg2[%c0_298, %334, %c0_299, %c2_300] : memref<1x18x4x18xf32, #tpu.memory_space<vmem>>, vector<1x1x4x16xf32>
    %336 = vector.shape_cast %335 : vector<1x1x4x16xf32> to vector<4x16xf32>
    %c5_301 = arith.constant 5 : index
    %c0_302 = arith.constant 0 : index
    %c0_303 = arith.constant 0 : index
    %337 = vector.load %arg3[%c5_301, %c0_302, %c0_303] : memref<9x8x4xf32, #tpu.memory_space<vmem>>, vector<1x8x4xf32>
    %338 = vector.shape_cast %337 : vector<1x8x4xf32> to vector<8x4xf32>
    %cst_304 = arith.constant dense<0.000000e+00> : vector<8x16xf32>
    %339 = tpu.matmul %338, %336, %cst_304 {dimension_numbers = #tpu.dot_dimension_numbers<[1], [0], [0], [1], [0, 0, 1, 1], [], []>} : vector<8x4xf32>, vector<4x16xf32>, vector<8x16xf32> -> vector<8x16xf32>
    %340 = arith.addf %333, %339 : vector<8x16xf32>
    %c3_i32_305 = arith.constant 3 : i32
    %341 = arith.addi %0, %c3_i32_305 : i32
    %c1_i32_306 = arith.constant 1 : i32
    %342 = arith.muli %341, %c1_i32_306 : i32
    %c2_i32_307 = arith.constant 2 : i32
    %343 = arith.addi %342, %c2_i32_307 : i32
    %c0_308 = arith.constant 0 : index
    %344 = arith.index_cast %343 : i32 to index
    %c0_309 = arith.constant 0 : index
    %c0_310 = arith.constant 0 : index
    %345 = vector.load %arg2[%c0_308, %344, %c0_309, %c0_310] : memref<1x18x4x18xf32, #tpu.memory_space<vmem>>, vector<1x1x4x16xf32>
    %346 = vector.shape_cast %345 : vector<1x1x4x16xf32> to vector<4x16xf32>
    %c6_311 = arith.constant 6 : index
    %c0_312 = arith.constant 0 : index
    %c0_313 = arith.constant 0 : index
    %347 = vector.load %arg3[%c6_311, %c0_312, %c0_313] : memref<9x8x4xf32, #tpu.memory_space<vmem>>, vector<1x8x4xf32>
    %348 = vector.shape_cast %347 : vector<1x8x4xf32> to vector<8x4xf32>
    %cst_314 = arith.constant dense<0.000000e+00> : vector<8x16xf32>
    %349 = tpu.matmul %348, %346, %cst_314 {dimension_numbers = #tpu.dot_dimension_numbers<[1], [0], [0], [1], [0, 0, 1, 1], [], []>} : vector<8x4xf32>, vector<4x16xf32>, vector<8x16xf32> -> vector<8x16xf32>
    %350 = arith.addf %340, %349 : vector<8x16xf32>
    %c0_315 = arith.constant 0 : index
    %351 = arith.index_cast %343 : i32 to index
    %c0_316 = arith.constant 0 : index
    %c1_317 = arith.constant 1 : index
    %352 = vector.load %arg2[%c0_315, %351, %c0_316, %c1_317] : memref<1x18x4x18xf32, #tpu.memory_space<vmem>>, vector<1x1x4x16xf32>
    %353 = vector.shape_cast %352 : vector<1x1x4x16xf32> to vector<4x16xf32>
    %c7_318 = arith.constant 7 : index
    %c0_319 = arith.constant 0 : index
    %c0_320 = arith.constant 0 : index
    %354 = vector.load %arg3[%c7_318, %c0_319, %c0_320] : memref<9x8x4xf32, #tpu.memory_space<vmem>>, vector<1x8x4xf32>
    %355 = vector.shape_cast %354 : vector<1x8x4xf32> to vector<8x4xf32>
    %cst_321 = arith.constant dense<0.000000e+00> : vector<8x16xf32>
    %356 = tpu.matmul %355, %353, %cst_321 {dimension_numbers = #tpu.dot_dimension_numbers<[1], [0], [0], [1], [0, 0, 1, 1], [], []>} : vector<8x4xf32>, vector<4x16xf32>, vector<8x16xf32> -> vector<8x16xf32>
    %357 = arith.addf %350, %356 : vector<8x16xf32>
    %c0_322 = arith.constant 0 : index
    %358 = arith.index_cast %343 : i32 to index
    %c0_323 = arith.constant 0 : index
    %c2_324 = arith.constant 2 : index
    %359 = vector.load %arg2[%c0_322, %358, %c0_323, %c2_324] : memref<1x18x4x18xf32, #tpu.memory_space<vmem>>, vector<1x1x4x16xf32>
    %360 = vector.shape_cast %359 : vector<1x1x4x16xf32> to vector<4x16xf32>
    %c8_325 = arith.constant 8 : index
    %c0_326 = arith.constant 0 : index
    %c0_327 = arith.constant 0 : index
    %361 = vector.load %arg3[%c8_325, %c0_326, %c0_327] : memref<9x8x4xf32, #tpu.memory_space<vmem>>, vector<1x8x4xf32>
    %362 = vector.shape_cast %361 : vector<1x8x4xf32> to vector<8x4xf32>
    %cst_328 = arith.constant dense<0.000000e+00> : vector<8x16xf32>
    %363 = tpu.matmul %362, %360, %cst_328 {dimension_numbers = #tpu.dot_dimension_numbers<[1], [0], [0], [1], [0, 0, 1, 1], [], []>} : vector<8x4xf32>, vector<4x16xf32>, vector<8x16xf32> -> vector<8x16xf32>
    %364 = arith.addf %357, %363 : vector<8x16xf32>
    %c0_329 = arith.constant 0 : index
    %c0_330 = arith.constant 0 : index
    %365 = vector.load %arg4[%c0_329, %c0_330] : memref<8x1xf32, #tpu.memory_space<vmem>>, vector<8x1xf32>
    %366 = vector.broadcast %365 : vector<8x1xf32> to vector<8x16xf32>
    %367 = arith.addf %364, %366 : vector<8x16xf32>
    %cst_331 = arith.constant 5.000000e-01 : f32
    %368 = vector.broadcast %cst_331 : f32 to vector<8x16xf32>
    %369 = arith.mulf %368, %367 : vector<8x16xf32>
    %cst_332 = arith.constant 4.471500e-02 : f32
    %370 = vector.broadcast %cst_332 : f32 to vector<8x16xf32>
    %371 = arith.mulf %370, %367 : vector<8x16xf32>
    %372 = arith.mulf %371, %367 : vector<8x16xf32>
    %373 = arith.mulf %372, %367 : vector<8x16xf32>
    %374 = arith.addf %367, %373 : vector<8x16xf32>
    %cst_333 = arith.constant 0.797884583 : f32
    %375 = vector.broadcast %cst_333 : f32 to vector<8x16xf32>
    %376 = arith.mulf %375, %374 : vector<8x16xf32>
    %377 = math.tanh %376 : vector<8x16xf32>
    %cst_334 = arith.constant 1.000000e+00 : f32
    %378 = vector.broadcast %cst_334 : f32 to vector<8x16xf32>
    %379 = arith.addf %378, %377 : vector<8x16xf32>
    %380 = arith.mulf %369, %379 : vector<8x16xf32>
    %c0_335 = arith.constant 0 : index
    %c0_336 = arith.constant 0 : index
    %381 = vector.load %arg5[%c0_335, %c0_336] : memref<16x32xf32, #tpu.memory_space<vmem>>, vector<16x32xf32>
    %cst_337 = arith.constant dense<0.000000e+00> : vector<8x32xf32>
    %382 = tpu.matmul %380, %381, %cst_337 {dimension_numbers = #tpu.dot_dimension_numbers<[1], [0], [0], [1], [0, 0, 1, 1], [], []>} : vector<8x16xf32>, vector<16x32xf32>, vector<8x32xf32> -> vector<8x32xf32>
    %c0_338 = arith.constant 0 : index
    %c0_339 = arith.constant 0 : index
    %c6_340 = arith.constant 6 : index
    %c0_341 = arith.constant 0 : index
    %383 = vector.load %arg6[%c0_338, %c0_339, %c6_340, %c0_341] : memref<1x8x16x32xf32, #tpu.memory_space<vmem>>, vector<1x8x1x32xf32>
    %384 = vector.shape_cast %383 : vector<1x8x1x32xf32> to vector<8x32xf32>
    %385 = vector.shape_cast %382 : vector<8x32xf32> to vector<1x8x1x32xf32>
    tpu.vector_store %arg6[%c0_338, %c0_339, %c6_340, %c0_341], %385 {strides = array<i32>} : memref<1x8x16x32xf32, #tpu.memory_space<vmem>>, vector<1x8x1x32xf32>,
    %c0_342 = arith.constant 0 : index
    %c0_343 = arith.constant 0 : index
    %c7_344 = arith.constant 7 : index
    %c0_345 = arith.constant 0 : index
    %386 = vector.load %arg6[%c0_342, %c0_343, %c7_344, %c0_345] : memref<1x8x16x32xf32, #tpu.memory_space<vmem>>, vector<1x8x1x32xf32>
    %387 = vector.shape_cast %386 : vector<1x8x1x32xf32> to vector<8x32xf32>
    %388 = vector.shape_cast %382 : vector<8x32xf32> to vector<1x8x1x32xf32>
    tpu.vector_store %arg6[%c0_342, %c0_343, %c7_344, %c0_345], %388 {strides = array<i32>} : memref<1x8x16x32xf32, #tpu.memory_space<vmem>>, vector<1x8x1x32xf32>,
    %cst_346 = arith.constant 0.000000e+00 : f32
    %389 = vector.broadcast %cst_346 : f32 to vector<8x16xf32>
    %c4_i32 = arith.constant 4 : i32
    %390 = arith.addi %0, %c4_i32 : i32
    %c1_i32_347 = arith.constant 1 : i32
    %391 = arith.muli %390, %c1_i32_347 : i32
    %c0_i32_348 = arith.constant 0 : i32
    %392 = arith.addi %391, %c0_i32_348 : i32
    %c0_349 = arith.constant 0 : index
    %393 = arith.index_cast %392 : i32 to index
    %c0_350 = arith.constant 0 : index
    %c0_351 = arith.constant 0 : index
    %394 = vector.load %arg2[%c0_349, %393, %c0_350, %c0_351] : memref<1x18x4x18xf32, #tpu.memory_space<vmem>>, vector<1x1x4x16xf32>
    %395 = vector.shape_cast %394 : vector<1x1x4x16xf32> to vector<4x16xf32>
    %c0_352 = arith.constant 0 : index
    %c0_353 = arith.constant 0 : index
    %c0_354 = arith.constant 0 : index
    %396 = vector.load %arg3[%c0_352, %c0_353, %c0_354] : memref<9x8x4xf32, #tpu.memory_space<vmem>>, vector<1x8x4xf32>
    %397 = vector.shape_cast %396 : vector<1x8x4xf32> to vector<8x4xf32>
    %cst_355 = arith.constant dense<0.000000e+00> : vector<8x16xf32>
    %398 = tpu.matmul %397, %395, %cst_355 {dimension_numbers = #tpu.dot_dimension_numbers<[1], [0], [0], [1], [0, 0, 1, 1], [], []>} : vector<8x4xf32>, vector<4x16xf32>, vector<8x16xf32> -> vector<8x16xf32>
    %399 = arith.addf %389, %398 : vector<8x16xf32>
    %c0_356 = arith.constant 0 : index
    %400 = arith.index_cast %392 : i32 to index
    %c0_357 = arith.constant 0 : index
    %c1_358 = arith.constant 1 : index
    %401 = vector.load %arg2[%c0_356, %400, %c0_357, %c1_358] : memref<1x18x4x18xf32, #tpu.memory_space<vmem>>, vector<1x1x4x16xf32>
    %402 = vector.shape_cast %401 : vector<1x1x4x16xf32> to vector<4x16xf32>
    %c1_359 = arith.constant 1 : index
    %c0_360 = arith.constant 0 : index
    %c0_361 = arith.constant 0 : index
    %403 = vector.load %arg3[%c1_359, %c0_360, %c0_361] : memref<9x8x4xf32, #tpu.memory_space<vmem>>, vector<1x8x4xf32>
    %404 = vector.shape_cast %403 : vector<1x8x4xf32> to vector<8x4xf32>
    %cst_362 = arith.constant dense<0.000000e+00> : vector<8x16xf32>
    %405 = tpu.matmul %404, %402, %cst_362 {dimension_numbers = #tpu.dot_dimension_numbers<[1], [0], [0], [1], [0, 0, 1, 1], [], []>} : vector<8x4xf32>, vector<4x16xf32>, vector<8x16xf32> -> vector<8x16xf32>
    %406 = arith.addf %399, %405 : vector<8x16xf32>
    %c0_363 = arith.constant 0 : index
    %407 = arith.index_cast %392 : i32 to index
    %c0_364 = arith.constant 0 : index
    %c2_365 = arith.constant 2 : index
    %408 = vector.load %arg2[%c0_363, %407, %c0_364, %c2_365] : memref<1x18x4x18xf32, #tpu.memory_space<vmem>>, vector<1x1x4x16xf32>
    %409 = vector.shape_cast %408 : vector<1x1x4x16xf32> to vector<4x16xf32>
    %c2_366 = arith.constant 2 : index
    %c0_367 = arith.constant 0 : index
    %c0_368 = arith.constant 0 : index
    %410 = vector.load %arg3[%c2_366, %c0_367, %c0_368] : memref<9x8x4xf32, #tpu.memory_space<vmem>>, vector<1x8x4xf32>
    %411 = vector.shape_cast %410 : vector<1x8x4xf32> to vector<8x4xf32>
    %cst_369 = arith.constant dense<0.000000e+00> : vector<8x16xf32>
    %412 = tpu.matmul %411, %409, %cst_369 {dimension_numbers = #tpu.dot_dimension_numbers<[1], [0], [0], [1], [0, 0, 1, 1], [], []>} : vector<8x4xf32>, vector<4x16xf32>, vector<8x16xf32> -> vector<8x16xf32>
    %413 = arith.addf %406, %412 : vector<8x16xf32>
    %c4_i32_370 = arith.constant 4 : i32
    %414 = arith.addi %0, %c4_i32_370 : i32
    %c1_i32_371 = arith.constant 1 : i32
    %415 = arith.muli %414, %c1_i32_371 : i32
    %c1_i32_372 = arith.constant 1 : i32
    %416 = arith.addi %415, %c1_i32_372 : i32
    %c0_373 = arith.constant 0 : index
    %417 = arith.index_cast %416 : i32 to index
    %c0_374 = arith.constant 0 : index
    %c0_375 = arith.constant 0 : index
    %418 = vector.load %arg2[%c0_373, %417, %c0_374, %c0_375] : memref<1x18x4x18xf32, #tpu.memory_space<vmem>>, vector<1x1x4x16xf32>
    %419 = vector.shape_cast %418 : vector<1x1x4x16xf32> to vector<4x16xf32>
    %c3_376 = arith.constant 3 : index
    %c0_377 = arith.constant 0 : index
    %c0_378 = arith.constant 0 : index
    %420 = vector.load %arg3[%c3_376, %c0_377, %c0_378] : memref<9x8x4xf32, #tpu.memory_space<vmem>>, vector<1x8x4xf32>
    %421 = vector.shape_cast %420 : vector<1x8x4xf32> to vector<8x4xf32>
    %cst_379 = arith.constant dense<0.000000e+00> : vector<8x16xf32>
    %422 = tpu.matmul %421, %419, %cst_379 {dimension_numbers = #tpu.dot_dimension_numbers<[1], [0], [0], [1], [0, 0, 1, 1], [], []>} : vector<8x4xf32>, vector<4x16xf32>, vector<8x16xf32> -> vector<8x16xf32>
    %423 = arith.addf %413, %422 : vector<8x16xf32>
    %c0_380 = arith.constant 0 : index
    %424 = arith.index_cast %416 : i32 to index
    %c0_381 = arith.constant 0 : index
    %c1_382 = arith.constant 1 : index
    %425 = vector.load %arg2[%c0_380, %424, %c0_381, %c1_382] : memref<1x18x4x18xf32, #tpu.memory_space<vmem>>, vector<1x1x4x16xf32>
    %426 = vector.shape_cast %425 : vector<1x1x4x16xf32> to vector<4x16xf32>
    %c4_383 = arith.constant 4 : index
    %c0_384 = arith.constant 0 : index
    %c0_385 = arith.constant 0 : index
    %427 = vector.load %arg3[%c4_383, %c0_384, %c0_385] : memref<9x8x4xf32, #tpu.memory_space<vmem>>, vector<1x8x4xf32>
    %428 = vector.shape_cast %427 : vector<1x8x4xf32> to vector<8x4xf32>
    %cst_386 = arith.constant dense<0.000000e+00> : vector<8x16xf32>
    %429 = tpu.matmul %428, %426, %cst_386 {dimension_numbers = #tpu.dot_dimension_numbers<[1], [0], [0], [1], [0, 0, 1, 1], [], []>} : vector<8x4xf32>, vector<4x16xf32>, vector<8x16xf32> -> vector<8x16xf32>
    %430 = arith.addf %423, %429 : vector<8x16xf32>
    %c0_387 = arith.constant 0 : index
    %431 = arith.index_cast %416 : i32 to index
    %c0_388 = arith.constant 0 : index
    %c2_389 = arith.constant 2 : index
    %432 = vector.load %arg2[%c0_387, %431, %c0_388, %c2_389] : memref<1x18x4x18xf32, #tpu.memory_space<vmem>>, vector<1x1x4x16xf32>
    %433 = vector.shape_cast %432 : vector<1x1x4x16xf32> to vector<4x16xf32>
    %c5_390 = arith.constant 5 : index
    %c0_391 = arith.constant 0 : index
    %c0_392 = arith.constant 0 : index
    %434 = vector.load %arg3[%c5_390, %c0_391, %c0_392] : memref<9x8x4xf32, #tpu.memory_space<vmem>>, vector<1x8x4xf32>
    %435 = vector.shape_cast %434 : vector<1x8x4xf32> to vector<8x4xf32>
    %cst_393 = arith.constant dense<0.000000e+00> : vector<8x16xf32>
    %436 = tpu.matmul %435, %433, %cst_393 {dimension_numbers = #tpu.dot_dimension_numbers<[1], [0], [0], [1], [0, 0, 1, 1], [], []>} : vector<8x4xf32>, vector<4x16xf32>, vector<8x16xf32> -> vector<8x16xf32>
    %437 = arith.addf %430, %436 : vector<8x16xf32>
    %c4_i32_394 = arith.constant 4 : i32
    %438 = arith.addi %0, %c4_i32_394 : i32
    %c1_i32_395 = arith.constant 1 : i32
    %439 = arith.muli %438, %c1_i32_395 : i32
    %c2_i32_396 = arith.constant 2 : i32
    %440 = arith.addi %439, %c2_i32_396 : i32
    %c0_397 = arith.constant 0 : index
    %441 = arith.index_cast %440 : i32 to index
    %c0_398 = arith.constant 0 : index
    %c0_399 = arith.constant 0 : index
    %442 = vector.load %arg2[%c0_397, %441, %c0_398, %c0_399] : memref<1x18x4x18xf32, #tpu.memory_space<vmem>>, vector<1x1x4x16xf32>
    %443 = vector.shape_cast %442 : vector<1x1x4x16xf32> to vector<4x16xf32>
    %c6_400 = arith.constant 6 : index
    %c0_401 = arith.constant 0 : index
    %c0_402 = arith.constant 0 : index
    %444 = vector.load %arg3[%c6_400, %c0_401, %c0_402] : memref<9x8x4xf32, #tpu.memory_space<vmem>>, vector<1x8x4xf32>
    %445 = vector.shape_cast %444 : vector<1x8x4xf32> to vector<8x4xf32>
    %cst_403 = arith.constant dense<0.000000e+00> : vector<8x16xf32>
    %446 = tpu.matmul %445, %443, %cst_403 {dimension_numbers = #tpu.dot_dimension_numbers<[1], [0], [0], [1], [0, 0, 1, 1], [], []>} : vector<8x4xf32>, vector<4x16xf32>, vector<8x16xf32> -> vector<8x16xf32>
    %447 = arith.addf %437, %446 : vector<8x16xf32>
    %c0_404 = arith.constant 0 : index
    %448 = arith.index_cast %440 : i32 to index
    %c0_405 = arith.constant 0 : index
    %c1_406 = arith.constant 1 : index
    %449 = vector.load %arg2[%c0_404, %448, %c0_405, %c1_406] : memref<1x18x4x18xf32, #tpu.memory_space<vmem>>, vector<1x1x4x16xf32>
    %450 = vector.shape_cast %449 : vector<1x1x4x16xf32> to vector<4x16xf32>
    %c7_407 = arith.constant 7 : index
    %c0_408 = arith.constant 0 : index
    %c0_409 = arith.constant 0 : index
    %451 = vector.load %arg3[%c7_407, %c0_408, %c0_409] : memref<9x8x4xf32, #tpu.memory_space<vmem>>, vector<1x8x4xf32>
    %452 = vector.shape_cast %451 : vector<1x8x4xf32> to vector<8x4xf32>
    %cst_410 = arith.constant dense<0.000000e+00> : vector<8x16xf32>
    %453 = tpu.matmul %452, %450, %cst_410 {dimension_numbers = #tpu.dot_dimension_numbers<[1], [0], [0], [1], [0, 0, 1, 1], [], []>} : vector<8x4xf32>, vector<4x16xf32>, vector<8x16xf32> -> vector<8x16xf32>
    %454 = arith.addf %447, %453 : vector<8x16xf32>
    %c0_411 = arith.constant 0 : index
    %455 = arith.index_cast %440 : i32 to index
    %c0_412 = arith.constant 0 : index
    %c2_413 = arith.constant 2 : index
    %456 = vector.load %arg2[%c0_411, %455, %c0_412, %c2_413] : memref<1x18x4x18xf32, #tpu.memory_space<vmem>>, vector<1x1x4x16xf32>
    %457 = vector.shape_cast %456 : vector<1x1x4x16xf32> to vector<4x16xf32>
    %c8_414 = arith.constant 8 : index
    %c0_415 = arith.constant 0 : index
    %c0_416 = arith.constant 0 : index
    %458 = vector.load %arg3[%c8_414, %c0_415, %c0_416] : memref<9x8x4xf32, #tpu.memory_space<vmem>>, vector<1x8x4xf32>
    %459 = vector.shape_cast %458 : vector<1x8x4xf32> to vector<8x4xf32>
    %cst_417 = arith.constant dense<0.000000e+00> : vector<8x16xf32>
    %460 = tpu.matmul %459, %457, %cst_417 {dimension_numbers = #tpu.dot_dimension_numbers<[1], [0], [0], [1], [0, 0, 1, 1], [], []>} : vector<8x4xf32>, vector<4x16xf32>, vector<8x16xf32> -> vector<8x16xf32>
    %461 = arith.addf %454, %460 : vector<8x16xf32>
    %c0_418 = arith.constant 0 : index
    %c0_419 = arith.constant 0 : index
    %462 = vector.load %arg4[%c0_418, %c0_419] : memref<8x1xf32, #tpu.memory_space<vmem>>, vector<8x1xf32>
    %463 = vector.broadcast %462 : vector<8x1xf32> to vector<8x16xf32>
    %464 = arith.addf %461, %463 : vector<8x16xf32>
    %cst_420 = arith.constant 5.000000e-01 : f32
    %465 = vector.broadcast %cst_420 : f32 to vector<8x16xf32>
    %466 = arith.mulf %465, %464 : vector<8x16xf32>
    %cst_421 = arith.constant 4.471500e-02 : f32
    %467 = vector.broadcast %cst_421 : f32 to vector<8x16xf32>
    %468 = arith.mulf %467, %464 : vector<8x16xf32>
    %469 = arith.mulf %468, %464 : vector<8x16xf32>
    %470 = arith.mulf %469, %464 : vector<8x16xf32>
    %471 = arith.addf %464, %470 : vector<8x16xf32>
    %cst_422 = arith.constant 0.797884583 : f32
    %472 = vector.broadcast %cst_422 : f32 to vector<8x16xf32>
    %473 = arith.mulf %472, %471 : vector<8x16xf32>
    %474 = math.tanh %473 : vector<8x16xf32>
    %cst_423 = arith.constant 1.000000e+00 : f32
    %475 = vector.broadcast %cst_423 : f32 to vector<8x16xf32>
    %476 = arith.addf %475, %474 : vector<8x16xf32>
    %477 = arith.mulf %466, %476 : vector<8x16xf32>
    %c0_424 = arith.constant 0 : index
    %c0_425 = arith.constant 0 : index
    %478 = vector.load %arg5[%c0_424, %c0_425] : memref<16x32xf32, #tpu.memory_space<vmem>>, vector<16x32xf32>
    %cst_426 = arith.constant dense<0.000000e+00> : vector<8x32xf32>
    %479 = tpu.matmul %477, %478, %cst_426 {dimension_numbers = #tpu.dot_dimension_numbers<[1], [0], [0], [1], [0, 0, 1, 1], [], []>} : vector<8x16xf32>, vector<16x32xf32>, vector<8x32xf32> -> vector<8x32xf32>
    %c0_427 = arith.constant 0 : index
    %c0_428 = arith.constant 0 : index
    %c8_429 = arith.constant 8 : index
    %c0_430 = arith.constant 0 : index
    %480 = vector.load %arg6[%c0_427, %c0_428, %c8_429, %c0_430] : memref<1x8x16x32xf32, #tpu.memory_space<vmem>>, vector<1x8x1x32xf32>
    %481 = vector.shape_cast %480 : vector<1x8x1x32xf32> to vector<8x32xf32>
    %482 = vector.shape_cast %479 : vector<8x32xf32> to vector<1x8x1x32xf32>
    tpu.vector_store %arg6[%c0_427, %c0_428, %c8_429, %c0_430], %482 {strides = array<i32>} : memref<1x8x16x32xf32, #tpu.memory_space<vmem>>, vector<1x8x1x32xf32>,
    %c0_431 = arith.constant 0 : index
    %c0_432 = arith.constant 0 : index
    %c9 = arith.constant 9 : index
    %c0_433 = arith.constant 0 : index
    %483 = vector.load %arg6[%c0_431, %c0_432, %c9, %c0_433] : memref<1x8x16x32xf32, #tpu.memory_space<vmem>>, vector<1x8x1x32xf32>
    %484 = vector.shape_cast %483 : vector<1x8x1x32xf32> to vector<8x32xf32>
    %485 = vector.shape_cast %479 : vector<8x32xf32> to vector<1x8x1x32xf32>
    tpu.vector_store %arg6[%c0_431, %c0_432, %c9, %c0_433], %485 {strides = array<i32>} : memref<1x8x16x32xf32, #tpu.memory_space<vmem>>, vector<1x8x1x32xf32>,
    %cst_434 = arith.constant 0.000000e+00 : f32
    %486 = vector.broadcast %cst_434 : f32 to vector<8x16xf32>
    %c5_i32 = arith.constant 5 : i32
    %487 = arith.addi %0, %c5_i32 : i32
    %c1_i32_435 = arith.constant 1 : i32
    %488 = arith.muli %487, %c1_i32_435 : i32
    %c0_i32_436 = arith.constant 0 : i32
    %489 = arith.addi %488, %c0_i32_436 : i32
    %c0_437 = arith.constant 0 : index
    %490 = arith.index_cast %489 : i32 to index
    %c0_438 = arith.constant 0 : index
    %c0_439 = arith.constant 0 : index
    %491 = vector.load %arg2[%c0_437, %490, %c0_438, %c0_439] : memref<1x18x4x18xf32, #tpu.memory_space<vmem>>, vector<1x1x4x16xf32>
    %492 = vector.shape_cast %491 : vector<1x1x4x16xf32> to vector<4x16xf32>
    %c0_440 = arith.constant 0 : index
    %c0_441 = arith.constant 0 : index
    %c0_442 = arith.constant 0 : index
    %493 = vector.load %arg3[%c0_440, %c0_441, %c0_442] : memref<9x8x4xf32, #tpu.memory_space<vmem>>, vector<1x8x4xf32>
    %494 = vector.shape_cast %493 : vector<1x8x4xf32> to vector<8x4xf32>
    %cst_443 = arith.constant dense<0.000000e+00> : vector<8x16xf32>
    %495 = tpu.matmul %494, %492, %cst_443 {dimension_numbers = #tpu.dot_dimension_numbers<[1], [0], [0], [1], [0, 0, 1, 1], [], []>} : vector<8x4xf32>, vector<4x16xf32>, vector<8x16xf32> -> vector<8x16xf32>
    %496 = arith.addf %486, %495 : vector<8x16xf32>
    %c0_444 = arith.constant 0 : index
    %497 = arith.index_cast %489 : i32 to index
    %c0_445 = arith.constant 0 : index
    %c1_446 = arith.constant 1 : index
    %498 = vector.load %arg2[%c0_444, %497, %c0_445, %c1_446] : memref<1x18x4x18xf32, #tpu.memory_space<vmem>>, vector<1x1x4x16xf32>
    %499 = vector.shape_cast %498 : vector<1x1x4x16xf32> to vector<4x16xf32>
    %c1_447 = arith.constant 1 : index
    %c0_448 = arith.constant 0 : index
    %c0_449 = arith.constant 0 : index
    %500 = vector.load %arg3[%c1_447, %c0_448, %c0_449] : memref<9x8x4xf32, #tpu.memory_space<vmem>>, vector<1x8x4xf32>
    %501 = vector.shape_cast %500 : vector<1x8x4xf32> to vector<8x4xf32>
    %cst_450 = arith.constant dense<0.000000e+00> : vector<8x16xf32>
    %502 = tpu.matmul %501, %499, %cst_450 {dimension_numbers = #tpu.dot_dimension_numbers<[1], [0], [0], [1], [0, 0, 1, 1], [], []>} : vector<8x4xf32>, vector<4x16xf32>, vector<8x16xf32> -> vector<8x16xf32>
    %503 = arith.addf %496, %502 : vector<8x16xf32>
    %c0_451 = arith.constant 0 : index
    %504 = arith.index_cast %489 : i32 to index
    %c0_452 = arith.constant 0 : index
    %c2_453 = arith.constant 2 : index
    %505 = vector.load %arg2[%c0_451, %504, %c0_452, %c2_453] : memref<1x18x4x18xf32, #tpu.memory_space<vmem>>, vector<1x1x4x16xf32>
    %506 = vector.shape_cast %505 : vector<1x1x4x16xf32> to vector<4x16xf32>
    %c2_454 = arith.constant 2 : index
    %c0_455 = arith.constant 0 : index
    %c0_456 = arith.constant 0 : index
    %507 = vector.load %arg3[%c2_454, %c0_455, %c0_456] : memref<9x8x4xf32, #tpu.memory_space<vmem>>, vector<1x8x4xf32>
    %508 = vector.shape_cast %507 : vector<1x8x4xf32> to vector<8x4xf32>
    %cst_457 = arith.constant dense<0.000000e+00> : vector<8x16xf32>
    %509 = tpu.matmul %508, %506, %cst_457 {dimension_numbers = #tpu.dot_dimension_numbers<[1], [0], [0], [1], [0, 0, 1, 1], [], []>} : vector<8x4xf32>, vector<4x16xf32>, vector<8x16xf32> -> vector<8x16xf32>
    %510 = arith.addf %503, %509 : vector<8x16xf32>
    %c5_i32_458 = arith.constant 5 : i32
    %511 = arith.addi %0, %c5_i32_458 : i32
    %c1_i32_459 = arith.constant 1 : i32
    %512 = arith.muli %511, %c1_i32_459 : i32
    %c1_i32_460 = arith.constant 1 : i32
    %513 = arith.addi %512, %c1_i32_460 : i32
    %c0_461 = arith.constant 0 : index
    %514 = arith.index_cast %513 : i32 to index
    %c0_462 = arith.constant 0 : index
    %c0_463 = arith.constant 0 : index
    %515 = vector.load %arg2[%c0_461, %514, %c0_462, %c0_463] : memref<1x18x4x18xf32, #tpu.memory_space<vmem>>, vector<1x1x4x16xf32>
    %516 = vector.shape_cast %515 : vector<1x1x4x16xf32> to vector<4x16xf32>
    %c3_464 = arith.constant 3 : index
    %c0_465 = arith.constant 0 : index
    %c0_466 = arith.constant 0 : index
    %517 = vector.load %arg3[%c3_464, %c0_465, %c0_466] : memref<9x8x4xf32, #tpu.memory_space<vmem>>, vector<1x8x4xf32>
    %518 = vector.shape_cast %517 : vector<1x8x4xf32> to vector<8x4xf32>
    %cst_467 = arith.constant dense<0.000000e+00> : vector<8x16xf32>
    %519 = tpu.matmul %518, %516, %cst_467 {dimension_numbers = #tpu.dot_dimension_numbers<[1], [0], [0], [1], [0, 0, 1, 1], [], []>} : vector<8x4xf32>, vector<4x16xf32>, vector<8x16xf32> -> vector<8x16xf32>
    %520 = arith.addf %510, %519 : vector<8x16xf32>
    %c0_468 = arith.constant 0 : index
    %521 = arith.index_cast %513 : i32 to index
    %c0_469 = arith.constant 0 : index
    %c1_470 = arith.constant 1 : index
    %522 = vector.load %arg2[%c0_468, %521, %c0_469, %c1_470] : memref<1x18x4x18xf32, #tpu.memory_space<vmem>>, vector<1x1x4x16xf32>
    %523 = vector.shape_cast %522 : vector<1x1x4x16xf32> to vector<4x16xf32>
    %c4_471 = arith.constant 4 : index
    %c0_472 = arith.constant 0 : index
    %c0_473 = arith.constant 0 : index
    %524 = vector.load %arg3[%c4_471, %c0_472, %c0_473] : memref<9x8x4xf32, #tpu.memory_space<vmem>>, vector<1x8x4xf32>
    %525 = vector.shape_cast %524 : vector<1x8x4xf32> to vector<8x4xf32>
    %cst_474 = arith.constant dense<0.000000e+00> : vector<8x16xf32>
    %526 = tpu.matmul %525, %523, %cst_474 {dimension_numbers = #tpu.dot_dimension_numbers<[1], [0], [0], [1], [0, 0, 1, 1], [], []>} : vector<8x4xf32>, vector<4x16xf32>, vector<8x16xf32> -> vector<8x16xf32>
    %527 = arith.addf %520, %526 : vector<8x16xf32>
    %c0_475 = arith.constant 0 : index
    %528 = arith.index_cast %513 : i32 to index
    %c0_476 = arith.constant 0 : index
    %c2_477 = arith.constant 2 : index
    %529 = vector.load %arg2[%c0_475, %528, %c0_476, %c2_477] : memref<1x18x4x18xf32, #tpu.memory_space<vmem>>, vector<1x1x4x16xf32>
    %530 = vector.shape_cast %529 : vector<1x1x4x16xf32> to vector<4x16xf32>
    %c5_478 = arith.constant 5 : index
    %c0_479 = arith.constant 0 : index
    %c0_480 = arith.constant 0 : index
    %531 = vector.load %arg3[%c5_478, %c0_479, %c0_480] : memref<9x8x4xf32, #tpu.memory_space<vmem>>, vector<1x8x4xf32>
    %532 = vector.shape_cast %531 : vector<1x8x4xf32> to vector<8x4xf32>
    %cst_481 = arith.constant dense<0.000000e+00> : vector<8x16xf32>
    %533 = tpu.matmul %532, %530, %cst_481 {dimension_numbers = #tpu.dot_dimension_numbers<[1], [0], [0], [1], [0, 0, 1, 1], [], []>} : vector<8x4xf32>, vector<4x16xf32>, vector<8x16xf32> -> vector<8x16xf32>
    %534 = arith.addf %527, %533 : vector<8x16xf32>
    %c5_i32_482 = arith.constant 5 : i32
    %535 = arith.addi %0, %c5_i32_482 : i32
    %c1_i32_483 = arith.constant 1 : i32
    %536 = arith.muli %535, %c1_i32_483 : i32
    %c2_i32_484 = arith.constant 2 : i32
    %537 = arith.addi %536, %c2_i32_484 : i32
    %c0_485 = arith.constant 0 : index
    %538 = arith.index_cast %537 : i32 to index
    %c0_486 = arith.constant 0 : index
    %c0_487 = arith.constant 0 : index
    %539 = vector.load %arg2[%c0_485, %538, %c0_486, %c0_487] : memref<1x18x4x18xf32, #tpu.memory_space<vmem>>, vector<1x1x4x16xf32>
    %540 = vector.shape_cast %539 : vector<1x1x4x16xf32> to vector<4x16xf32>
    %c6_488 = arith.constant 6 : index
    %c0_489 = arith.constant 0 : index
    %c0_490 = arith.constant 0 : index
    %541 = vector.load %arg3[%c6_488, %c0_489, %c0_490] : memref<9x8x4xf32, #tpu.memory_space<vmem>>, vector<1x8x4xf32>
    %542 = vector.shape_cast %541 : vector<1x8x4xf32> to vector<8x4xf32>
    %cst_491 = arith.constant dense<0.000000e+00> : vector<8x16xf32>
    %543 = tpu.matmul %542, %540, %cst_491 {dimension_numbers = #tpu.dot_dimension_numbers<[1], [0], [0], [1], [0, 0, 1, 1], [], []>} : vector<8x4xf32>, vector<4x16xf32>, vector<8x16xf32> -> vector<8x16xf32>
    %544 = arith.addf %534, %543 : vector<8x16xf32>
    %c0_492 = arith.constant 0 : index
    %545 = arith.index_cast %537 : i32 to index
    %c0_493 = arith.constant 0 : index
    %c1_494 = arith.constant 1 : index
    %546 = vector.load %arg2[%c0_492, %545, %c0_493, %c1_494] : memref<1x18x4x18xf32, #tpu.memory_space<vmem>>, vector<1x1x4x16xf32>
    %547 = vector.shape_cast %546 : vector<1x1x4x16xf32> to vector<4x16xf32>
    %c7_495 = arith.constant 7 : index
    %c0_496 = arith.constant 0 : index
    %c0_497 = arith.constant 0 : index
    %548 = vector.load %arg3[%c7_495, %c0_496, %c0_497] : memref<9x8x4xf32, #tpu.memory_space<vmem>>, vector<1x8x4xf32>
    %549 = vector.shape_cast %548 : vector<1x8x4xf32> to vector<8x4xf32>
    %cst_498 = arith.constant dense<0.000000e+00> : vector<8x16xf32>
    %550 = tpu.matmul %549, %547, %cst_498 {dimension_numbers = #tpu.dot_dimension_numbers<[1], [0], [0], [1], [0, 0, 1, 1], [], []>} : vector<8x4xf32>, vector<4x16xf32>, vector<8x16xf32> -> vector<8x16xf32>
    %551 = arith.addf %544, %550 : vector<8x16xf32>
    %c0_499 = arith.constant 0 : index
    %552 = arith.index_cast %537 : i32 to index
    %c0_500 = arith.constant 0 : index
    %c2_501 = arith.constant 2 : index
    %553 = vector.load %arg2[%c0_499, %552, %c0_500, %c2_501] : memref<1x18x4x18xf32, #tpu.memory_space<vmem>>, vector<1x1x4x16xf32>
    %554 = vector.shape_cast %553 : vector<1x1x4x16xf32> to vector<4x16xf32>
    %c8_502 = arith.constant 8 : index
    %c0_503 = arith.constant 0 : index
    %c0_504 = arith.constant 0 : index
    %555 = vector.load %arg3[%c8_502, %c0_503, %c0_504] : memref<9x8x4xf32, #tpu.memory_space<vmem>>, vector<1x8x4xf32>
    %556 = vector.shape_cast %555 : vector<1x8x4xf32> to vector<8x4xf32>
    %cst_505 = arith.constant dense<0.000000e+00> : vector<8x16xf32>
    %557 = tpu.matmul %556, %554, %cst_505 {dimension_numbers = #tpu.dot_dimension_numbers<[1], [0], [0], [1], [0, 0, 1, 1], [], []>} : vector<8x4xf32>, vector<4x16xf32>, vector<8x16xf32> -> vector<8x16xf32>
    %558 = arith.addf %551, %557 : vector<8x16xf32>
    %c0_506 = arith.constant 0 : index
    %c0_507 = arith.constant 0 : index
    %559 = vector.load %arg4[%c0_506, %c0_507] : memref<8x1xf32, #tpu.memory_space<vmem>>, vector<8x1xf32>
    %560 = vector.broadcast %559 : vector<8x1xf32> to vector<8x16xf32>
    %561 = arith.addf %558, %560 : vector<8x16xf32>
    %cst_508 = arith.constant 5.000000e-01 : f32
    %562 = vector.broadcast %cst_508 : f32 to vector<8x16xf32>
    %563 = arith.mulf %562, %561 : vector<8x16xf32>
    %cst_509 = arith.constant 4.471500e-02 : f32
    %564 = vector.broadcast %cst_509 : f32 to vector<8x16xf32>
    %565 = arith.mulf %564, %561 : vector<8x16xf32>
    %566 = arith.mulf %565, %561 : vector<8x16xf32>
    %567 = arith.mulf %566, %561 : vector<8x16xf32>
    %568 = arith.addf %561, %567 : vector<8x16xf32>
    %cst_510 = arith.constant 0.797884583 : f32
    %569 = vector.broadcast %cst_510 : f32 to vector<8x16xf32>
    %570 = arith.mulf %569, %568 : vector<8x16xf32>
    %571 = math.tanh %570 : vector<8x16xf32>
    %cst_511 = arith.constant 1.000000e+00 : f32
    %572 = vector.broadcast %cst_511 : f32 to vector<8x16xf32>
    %573 = arith.addf %572, %571 : vector<8x16xf32>
    %574 = arith.mulf %563, %573 : vector<8x16xf32>
    %c0_512 = arith.constant 0 : index
    %c0_513 = arith.constant 0 : index
    %575 = vector.load %arg5[%c0_512, %c0_513] : memref<16x32xf32, #tpu.memory_space<vmem>>, vector<16x32xf32>
    %cst_514 = arith.constant dense<0.000000e+00> : vector<8x32xf32>
    %576 = tpu.matmul %574, %575, %cst_514 {dimension_numbers = #tpu.dot_dimension_numbers<[1], [0], [0], [1], [0, 0, 1, 1], [], []>} : vector<8x16xf32>, vector<16x32xf32>, vector<8x32xf32> -> vector<8x32xf32>
    %c0_515 = arith.constant 0 : index
    %c0_516 = arith.constant 0 : index
    %c10 = arith.constant 10 : index
    %c0_517 = arith.constant 0 : index
    %577 = vector.load %arg6[%c0_515, %c0_516, %c10, %c0_517] : memref<1x8x16x32xf32, #tpu.memory_space<vmem>>, vector<1x8x1x32xf32>
    %578 = vector.shape_cast %577 : vector<1x8x1x32xf32> to vector<8x32xf32>
    %579 = vector.shape_cast %576 : vector<8x32xf32> to vector<1x8x1x32xf32>
    tpu.vector_store %arg6[%c0_515, %c0_516, %c10, %c0_517], %579 {strides = array<i32>} : memref<1x8x16x32xf32, #tpu.memory_space<vmem>>, vector<1x8x1x32xf32>,
    %c0_518 = arith.constant 0 : index
    %c0_519 = arith.constant 0 : index
    %c11 = arith.constant 11 : index
    %c0_520 = arith.constant 0 : index
    %580 = vector.load %arg6[%c0_518, %c0_519, %c11, %c0_520] : memref<1x8x16x32xf32, #tpu.memory_space<vmem>>, vector<1x8x1x32xf32>
    %581 = vector.shape_cast %580 : vector<1x8x1x32xf32> to vector<8x32xf32>
    %582 = vector.shape_cast %576 : vector<8x32xf32> to vector<1x8x1x32xf32>
    tpu.vector_store %arg6[%c0_518, %c0_519, %c11, %c0_520], %582 {strides = array<i32>} : memref<1x8x16x32xf32, #tpu.memory_space<vmem>>, vector<1x8x1x32xf32>,
    %cst_521 = arith.constant 0.000000e+00 : f32
    %583 = vector.broadcast %cst_521 : f32 to vector<8x16xf32>
    %c6_i32 = arith.constant 6 : i32
    %584 = arith.addi %0, %c6_i32 : i32
    %c1_i32_522 = arith.constant 1 : i32
    %585 = arith.muli %584, %c1_i32_522 : i32
    %c0_i32_523 = arith.constant 0 : i32
    %586 = arith.addi %585, %c0_i32_523 : i32
    %c0_524 = arith.constant 0 : index
    %587 = arith.index_cast %586 : i32 to index
    %c0_525 = arith.constant 0 : index
    %c0_526 = arith.constant 0 : index
    %588 = vector.load %arg2[%c0_524, %587, %c0_525, %c0_526] : memref<1x18x4x18xf32, #tpu.memory_space<vmem>>, vector<1x1x4x16xf32>
    %589 = vector.shape_cast %588 : vector<1x1x4x16xf32> to vector<4x16xf32>
    %c0_527 = arith.constant 0 : index
    %c0_528 = arith.constant 0 : index
    %c0_529 = arith.constant 0 : index
    %590 = vector.load %arg3[%c0_527, %c0_528, %c0_529] : memref<9x8x4xf32, #tpu.memory_space<vmem>>, vector<1x8x4xf32>
    %591 = vector.shape_cast %590 : vector<1x8x4xf32> to vector<8x4xf32>
    %cst_530 = arith.constant dense<0.000000e+00> : vector<8x16xf32>
    %592 = tpu.matmul %591, %589, %cst_530 {dimension_numbers = #tpu.dot_dimension_numbers<[1], [0], [0], [1], [0, 0, 1, 1], [], []>} : vector<8x4xf32>, vector<4x16xf32>, vector<8x16xf32> -> vector<8x16xf32>
    %593 = arith.addf %583, %592 : vector<8x16xf32>
    %c0_531 = arith.constant 0 : index
    %594 = arith.index_cast %586 : i32 to index
    %c0_532 = arith.constant 0 : index
    %c1_533 = arith.constant 1 : index
    %595 = vector.load %arg2[%c0_531, %594, %c0_532, %c1_533] : memref<1x18x4x18xf32, #tpu.memory_space<vmem>>, vector<1x1x4x16xf32>
    %596 = vector.shape_cast %595 : vector<1x1x4x16xf32> to vector<4x16xf32>
    %c1_534 = arith.constant 1 : index
    %c0_535 = arith.constant 0 : index
    %c0_536 = arith.constant 0 : index
    %597 = vector.load %arg3[%c1_534, %c0_535, %c0_536] : memref<9x8x4xf32, #tpu.memory_space<vmem>>, vector<1x8x4xf32>
    %598 = vector.shape_cast %597 : vector<1x8x4xf32> to vector<8x4xf32>
    %cst_537 = arith.constant dense<0.000000e+00> : vector<8x16xf32>
    %599 = tpu.matmul %598, %596, %cst_537 {dimension_numbers = #tpu.dot_dimension_numbers<[1], [0], [0], [1], [0, 0, 1, 1], [], []>} : vector<8x4xf32>, vector<4x16xf32>, vector<8x16xf32> -> vector<8x16xf32>
    %600 = arith.addf %593, %599 : vector<8x16xf32>
    %c0_538 = arith.constant 0 : index
    %601 = arith.index_cast %586 : i32 to index
    %c0_539 = arith.constant 0 : index
    %c2_540 = arith.constant 2 : index
    %602 = vector.load %arg2[%c0_538, %601, %c0_539, %c2_540] : memref<1x18x4x18xf32, #tpu.memory_space<vmem>>, vector<1x1x4x16xf32>
    %603 = vector.shape_cast %602 : vector<1x1x4x16xf32> to vector<4x16xf32>
    %c2_541 = arith.constant 2 : index
    %c0_542 = arith.constant 0 : index
    %c0_543 = arith.constant 0 : index
    %604 = vector.load %arg3[%c2_541, %c0_542, %c0_543] : memref<9x8x4xf32, #tpu.memory_space<vmem>>, vector<1x8x4xf32>
    %605 = vector.shape_cast %604 : vector<1x8x4xf32> to vector<8x4xf32>
    %cst_544 = arith.constant dense<0.000000e+00> : vector<8x16xf32>
    %606 = tpu.matmul %605, %603, %cst_544 {dimension_numbers = #tpu.dot_dimension_numbers<[1], [0], [0], [1], [0, 0, 1, 1], [], []>} : vector<8x4xf32>, vector<4x16xf32>, vector<8x16xf32> -> vector<8x16xf32>
    %607 = arith.addf %600, %606 : vector<8x16xf32>
    %c6_i32_545 = arith.constant 6 : i32
    %608 = arith.addi %0, %c6_i32_545 : i32
    %c1_i32_546 = arith.constant 1 : i32
    %609 = arith.muli %608, %c1_i32_546 : i32
    %c1_i32_547 = arith.constant 1 : i32
    %610 = arith.addi %609, %c1_i32_547 : i32
    %c0_548 = arith.constant 0 : index
    %611 = arith.index_cast %610 : i32 to index
    %c0_549 = arith.constant 0 : index
    %c0_550 = arith.constant 0 : index
    %612 = vector.load %arg2[%c0_548, %611, %c0_549, %c0_550] : memref<1x18x4x18xf32, #tpu.memory_space<vmem>>, vector<1x1x4x16xf32>
    %613 = vector.shape_cast %612 : vector<1x1x4x16xf32> to vector<4x16xf32>
    %c3_551 = arith.constant 3 : index
    %c0_552 = arith.constant 0 : index
    %c0_553 = arith.constant 0 : index
    %614 = vector.load %arg3[%c3_551, %c0_552, %c0_553] : memref<9x8x4xf32, #tpu.memory_space<vmem>>, vector<1x8x4xf32>
    %615 = vector.shape_cast %614 : vector<1x8x4xf32> to vector<8x4xf32>
    %cst_554 = arith.constant dense<0.000000e+00> : vector<8x16xf32>
    %616 = tpu.matmul %615, %613, %cst_554 {dimension_numbers = #tpu.dot_dimension_numbers<[1], [0], [0], [1], [0, 0, 1, 1], [], []>} : vector<8x4xf32>, vector<4x16xf32>, vector<8x16xf32> -> vector<8x16xf32>
    %617 = arith.addf %607, %616 : vector<8x16xf32>
    %c0_555 = arith.constant 0 : index
    %618 = arith.index_cast %610 : i32 to index
    %c0_556 = arith.constant 0 : index
    %c1_557 = arith.constant 1 : index
    %619 = vector.load %arg2[%c0_555, %618, %c0_556, %c1_557] : memref<1x18x4x18xf32, #tpu.memory_space<vmem>>, vector<1x1x4x16xf32>
    %620 = vector.shape_cast %619 : vector<1x1x4x16xf32> to vector<4x16xf32>
    %c4_558 = arith.constant 4 : index
    %c0_559 = arith.constant 0 : index
    %c0_560 = arith.constant 0 : index
    %621 = vector.load %arg3[%c4_558, %c0_559, %c0_560] : memref<9x8x4xf32, #tpu.memory_space<vmem>>, vector<1x8x4xf32>
    %622 = vector.shape_cast %621 : vector<1x8x4xf32> to vector<8x4xf32>
    %cst_561 = arith.constant dense<0.000000e+00> : vector<8x16xf32>
    %623 = tpu.matmul %622, %620, %cst_561 {dimension_numbers = #tpu.dot_dimension_numbers<[1], [0], [0], [1], [0, 0, 1, 1], [], []>} : vector<8x4xf32>, vector<4x16xf32>, vector<8x16xf32> -> vector<8x16xf32>
    %624 = arith.addf %617, %623 : vector<8x16xf32>
    %c0_562 = arith.constant 0 : index
    %625 = arith.index_cast %610 : i32 to index
    %c0_563 = arith.constant 0 : index
    %c2_564 = arith.constant 2 : index
    %626 = vector.load %arg2[%c0_562, %625, %c0_563, %c2_564] : memref<1x18x4x18xf32, #tpu.memory_space<vmem>>, vector<1x1x4x16xf32>
    %627 = vector.shape_cast %626 : vector<1x1x4x16xf32> to vector<4x16xf32>
    %c5_565 = arith.constant 5 : index
    %c0_566 = arith.constant 0 : index
    %c0_567 = arith.constant 0 : index
    %628 = vector.load %arg3[%c5_565, %c0_566, %c0_567] : memref<9x8x4xf32, #tpu.memory_space<vmem>>, vector<1x8x4xf32>
    %629 = vector.shape_cast %628 : vector<1x8x4xf32> to vector<8x4xf32>
    %cst_568 = arith.constant dense<0.000000e+00> : vector<8x16xf32>
    %630 = tpu.matmul %629, %627, %cst_568 {dimension_numbers = #tpu.dot_dimension_numbers<[1], [0], [0], [1], [0, 0, 1, 1], [], []>} : vector<8x4xf32>, vector<4x16xf32>, vector<8x16xf32> -> vector<8x16xf32>
    %631 = arith.addf %624, %630 : vector<8x16xf32>
    %c6_i32_569 = arith.constant 6 : i32
    %632 = arith.addi %0, %c6_i32_569 : i32
    %c1_i32_570 = arith.constant 1 : i32
    %633 = arith.muli %632, %c1_i32_570 : i32
    %c2_i32_571 = arith.constant 2 : i32
    %634 = arith.addi %633, %c2_i32_571 : i32
    %c0_572 = arith.constant 0 : index
    %635 = arith.index_cast %634 : i32 to index
    %c0_573 = arith.constant 0 : index
    %c0_574 = arith.constant 0 : index
    %636 = vector.load %arg2[%c0_572, %635, %c0_573, %c0_574] : memref<1x18x4x18xf32, #tpu.memory_space<vmem>>, vector<1x1x4x16xf32>
    %637 = vector.shape_cast %636 : vector<1x1x4x16xf32> to vector<4x16xf32>
    %c6_575 = arith.constant 6 : index
    %c0_576 = arith.constant 0 : index
    %c0_577 = arith.constant 0 : index
    %638 = vector.load %arg3[%c6_575, %c0_576, %c0_577] : memref<9x8x4xf32, #tpu.memory_space<vmem>>, vector<1x8x4xf32>
    %639 = vector.shape_cast %638 : vector<1x8x4xf32> to vector<8x4xf32>
    %cst_578 = arith.constant dense<0.000000e+00> : vector<8x16xf32>
    %640 = tpu.matmul %639, %637, %cst_578 {dimension_numbers = #tpu.dot_dimension_numbers<[1], [0], [0], [1], [0, 0, 1, 1], [], []>} : vector<8x4xf32>, vector<4x16xf32>, vector<8x16xf32> -> vector<8x16xf32>
    %641 = arith.addf %631, %640 : vector<8x16xf32>
    %c0_579 = arith.constant 0 : index
    %642 = arith.index_cast %634 : i32 to index
    %c0_580 = arith.constant 0 : index
    %c1_581 = arith.constant 1 : index
    %643 = vector.load %arg2[%c0_579, %642, %c0_580, %c1_581] : memref<1x18x4x18xf32, #tpu.memory_space<vmem>>, vector<1x1x4x16xf32>
    %644 = vector.shape_cast %643 : vector<1x1x4x16xf32> to vector<4x16xf32>
    %c7_582 = arith.constant 7 : index
    %c0_583 = arith.constant 0 : index
    %c0_584 = arith.constant 0 : index
    %645 = vector.load %arg3[%c7_582, %c0_583, %c0_584] : memref<9x8x4xf32, #tpu.memory_space<vmem>>, vector<1x8x4xf32>
    %646 = vector.shape_cast %645 : vector<1x8x4xf32> to vector<8x4xf32>
    %cst_585 = arith.constant dense<0.000000e+00> : vector<8x16xf32>
    %647 = tpu.matmul %646, %644, %cst_585 {dimension_numbers = #tpu.dot_dimension_numbers<[1], [0], [0], [1], [0, 0, 1, 1], [], []>} : vector<8x4xf32>, vector<4x16xf32>, vector<8x16xf32> -> vector<8x16xf32>
    %648 = arith.addf %641, %647 : vector<8x16xf32>
    %c0_586 = arith.constant 0 : index
    %649 = arith.index_cast %634 : i32 to index
    %c0_587 = arith.constant 0 : index
    %c2_588 = arith.constant 2 : index
    %650 = vector.load %arg2[%c0_586, %649, %c0_587, %c2_588] : memref<1x18x4x18xf32, #tpu.memory_space<vmem>>, vector<1x1x4x16xf32>
    %651 = vector.shape_cast %650 : vector<1x1x4x16xf32> to vector<4x16xf32>
    %c8_589 = arith.constant 8 : index
    %c0_590 = arith.constant 0 : index
    %c0_591 = arith.constant 0 : index
    %652 = vector.load %arg3[%c8_589, %c0_590, %c0_591] : memref<9x8x4xf32, #tpu.memory_space<vmem>>, vector<1x8x4xf32>
    %653 = vector.shape_cast %652 : vector<1x8x4xf32> to vector<8x4xf32>
    %cst_592 = arith.constant dense<0.000000e+00> : vector<8x16xf32>
    %654 = tpu.matmul %653, %651, %cst_592 {dimension_numbers = #tpu.dot_dimension_numbers<[1], [0], [0], [1], [0, 0, 1, 1], [], []>} : vector<8x4xf32>, vector<4x16xf32>, vector<8x16xf32> -> vector<8x16xf32>
    %655 = arith.addf %648, %654 : vector<8x16xf32>
    %c0_593 = arith.constant 0 : index
    %c0_594 = arith.constant 0 : index
    %656 = vector.load %arg4[%c0_593, %c0_594] : memref<8x1xf32, #tpu.memory_space<vmem>>, vector<8x1xf32>
    %657 = vector.broadcast %656 : vector<8x1xf32> to vector<8x16xf32>
    %658 = arith.addf %655, %657 : vector<8x16xf32>
    %cst_595 = arith.constant 5.000000e-01 : f32
    %659 = vector.broadcast %cst_595 : f32 to vector<8x16xf32>
    %660 = arith.mulf %659, %658 : vector<8x16xf32>
    %cst_596 = arith.constant 4.471500e-02 : f32
    %661 = vector.broadcast %cst_596 : f32 to vector<8x16xf32>
    %662 = arith.mulf %661, %658 : vector<8x16xf32>
    %663 = arith.mulf %662, %658 : vector<8x16xf32>
    %664 = arith.mulf %663, %658 : vector<8x16xf32>
    %665 = arith.addf %658, %664 : vector<8x16xf32>
    %cst_597 = arith.constant 0.797884583 : f32
    %666 = vector.broadcast %cst_597 : f32 to vector<8x16xf32>
    %667 = arith.mulf %666, %665 : vector<8x16xf32>
    %668 = math.tanh %667 : vector<8x16xf32>
    %cst_598 = arith.constant 1.000000e+00 : f32
    %669 = vector.broadcast %cst_598 : f32 to vector<8x16xf32>
    %670 = arith.addf %669, %668 : vector<8x16xf32>
    %671 = arith.mulf %660, %670 : vector<8x16xf32>
    %c0_599 = arith.constant 0 : index
    %c0_600 = arith.constant 0 : index
    %672 = vector.load %arg5[%c0_599, %c0_600] : memref<16x32xf32, #tpu.memory_space<vmem>>, vector<16x32xf32>
    %cst_601 = arith.constant dense<0.000000e+00> : vector<8x32xf32>
    %673 = tpu.matmul %671, %672, %cst_601 {dimension_numbers = #tpu.dot_dimension_numbers<[1], [0], [0], [1], [0, 0, 1, 1], [], []>} : vector<8x16xf32>, vector<16x32xf32>, vector<8x32xf32> -> vector<8x32xf32>
    %c0_602 = arith.constant 0 : index
    %c0_603 = arith.constant 0 : index
    %c12 = arith.constant 12 : index
    %c0_604 = arith.constant 0 : index
    %674 = vector.load %arg6[%c0_602, %c0_603, %c12, %c0_604] : memref<1x8x16x32xf32, #tpu.memory_space<vmem>>, vector<1x8x1x32xf32>
    %675 = vector.shape_cast %674 : vector<1x8x1x32xf32> to vector<8x32xf32>
    %676 = vector.shape_cast %673 : vector<8x32xf32> to vector<1x8x1x32xf32>
    tpu.vector_store %arg6[%c0_602, %c0_603, %c12, %c0_604], %676 {strides = array<i32>} : memref<1x8x16x32xf32, #tpu.memory_space<vmem>>, vector<1x8x1x32xf32>,
    %c0_605 = arith.constant 0 : index
    %c0_606 = arith.constant 0 : index
    %c13 = arith.constant 13 : index
    %c0_607 = arith.constant 0 : index
    %677 = vector.load %arg6[%c0_605, %c0_606, %c13, %c0_607] : memref<1x8x16x32xf32, #tpu.memory_space<vmem>>, vector<1x8x1x32xf32>
    %678 = vector.shape_cast %677 : vector<1x8x1x32xf32> to vector<8x32xf32>
    %679 = vector.shape_cast %673 : vector<8x32xf32> to vector<1x8x1x32xf32>
    tpu.vector_store %arg6[%c0_605, %c0_606, %c13, %c0_607], %679 {strides = array<i32>} : memref<1x8x16x32xf32, #tpu.memory_space<vmem>>, vector<1x8x1x32xf32>,
    %cst_608 = arith.constant 0.000000e+00 : f32
    %680 = vector.broadcast %cst_608 : f32 to vector<8x16xf32>
    %c7_i32 = arith.constant 7 : i32
    %681 = arith.addi %0, %c7_i32 : i32
    %c1_i32_609 = arith.constant 1 : i32
    %682 = arith.muli %681, %c1_i32_609 : i32
    %c0_i32_610 = arith.constant 0 : i32
    %683 = arith.addi %682, %c0_i32_610 : i32
    %c0_611 = arith.constant 0 : index
    %684 = arith.index_cast %683 : i32 to index
    %c0_612 = arith.constant 0 : index
    %c0_613 = arith.constant 0 : index
    %685 = vector.load %arg2[%c0_611, %684, %c0_612, %c0_613] : memref<1x18x4x18xf32, #tpu.memory_space<vmem>>, vector<1x1x4x16xf32>
    %686 = vector.shape_cast %685 : vector<1x1x4x16xf32> to vector<4x16xf32>
    %c0_614 = arith.constant 0 : index
    %c0_615 = arith.constant 0 : index
    %c0_616 = arith.constant 0 : index
    %687 = vector.load %arg3[%c0_614, %c0_615, %c0_616] : memref<9x8x4xf32, #tpu.memory_space<vmem>>, vector<1x8x4xf32>
    %688 = vector.shape_cast %687 : vector<1x8x4xf32> to vector<8x4xf32>
    %cst_617 = arith.constant dense<0.000000e+00> : vector<8x16xf32>
    %689 = tpu.matmul %688, %686, %cst_617 {dimension_numbers = #tpu.dot_dimension_numbers<[1], [0], [0], [1], [0, 0, 1, 1], [], []>} : vector<8x4xf32>, vector<4x16xf32>, vector<8x16xf32> -> vector<8x16xf32>
    %690 = arith.addf %680, %689 : vector<8x16xf32>
    %c0_618 = arith.constant 0 : index
    %691 = arith.index_cast %683 : i32 to index
    %c0_619 = arith.constant 0 : index
    %c1_620 = arith.constant 1 : index
    %692 = vector.load %arg2[%c0_618, %691, %c0_619, %c1_620] : memref<1x18x4x18xf32, #tpu.memory_space<vmem>>, vector<1x1x4x16xf32>
    %693 = vector.shape_cast %692 : vector<1x1x4x16xf32> to vector<4x16xf32>
    %c1_621 = arith.constant 1 : index
    %c0_622 = arith.constant 0 : index
    %c0_623 = arith.constant 0 : index
    %694 = vector.load %arg3[%c1_621, %c0_622, %c0_623] : memref<9x8x4xf32, #tpu.memory_space<vmem>>, vector<1x8x4xf32>
    %695 = vector.shape_cast %694 : vector<1x8x4xf32> to vector<8x4xf32>
    %cst_624 = arith.constant dense<0.000000e+00> : vector<8x16xf32>
    %696 = tpu.matmul %695, %693, %cst_624 {dimension_numbers = #tpu.dot_dimension_numbers<[1], [0], [0], [1], [0, 0, 1, 1], [], []>} : vector<8x4xf32>, vector<4x16xf32>, vector<8x16xf32> -> vector<8x16xf32>
    %697 = arith.addf %690, %696 : vector<8x16xf32>
    %c0_625 = arith.constant 0 : index
    %698 = arith.index_cast %683 : i32 to index
    %c0_626 = arith.constant 0 : index
    %c2_627 = arith.constant 2 : index
    %699 = vector.load %arg2[%c0_625, %698, %c0_626, %c2_627] : memref<1x18x4x18xf32, #tpu.memory_space<vmem>>, vector<1x1x4x16xf32>
    %700 = vector.shape_cast %699 : vector<1x1x4x16xf32> to vector<4x16xf32>
    %c2_628 = arith.constant 2 : index
    %c0_629 = arith.constant 0 : index
    %c0_630 = arith.constant 0 : index
    %701 = vector.load %arg3[%c2_628, %c0_629, %c0_630] : memref<9x8x4xf32, #tpu.memory_space<vmem>>, vector<1x8x4xf32>
    %702 = vector.shape_cast %701 : vector<1x8x4xf32> to vector<8x4xf32>
    %cst_631 = arith.constant dense<0.000000e+00> : vector<8x16xf32>
    %703 = tpu.matmul %702, %700, %cst_631 {dimension_numbers = #tpu.dot_dimension_numbers<[1], [0], [0], [1], [0, 0, 1, 1], [], []>} : vector<8x4xf32>, vector<4x16xf32>, vector<8x16xf32> -> vector<8x16xf32>
    %704 = arith.addf %697, %703 : vector<8x16xf32>
    %c7_i32_632 = arith.constant 7 : i32
    %705 = arith.addi %0, %c7_i32_632 : i32
    %c1_i32_633 = arith.constant 1 : i32
    %706 = arith.muli %705, %c1_i32_633 : i32
    %c1_i32_634 = arith.constant 1 : i32
    %707 = arith.addi %706, %c1_i32_634 : i32
    %c0_635 = arith.constant 0 : index
    %708 = arith.index_cast %707 : i32 to index
    %c0_636 = arith.constant 0 : index
    %c0_637 = arith.constant 0 : index
    %709 = vector.load %arg2[%c0_635, %708, %c0_636, %c0_637] : memref<1x18x4x18xf32, #tpu.memory_space<vmem>>, vector<1x1x4x16xf32>
    %710 = vector.shape_cast %709 : vector<1x1x4x16xf32> to vector<4x16xf32>
    %c3_638 = arith.constant 3 : index
    %c0_639 = arith.constant 0 : index
    %c0_640 = arith.constant 0 : index
    %711 = vector.load %arg3[%c3_638, %c0_639, %c0_640] : memref<9x8x4xf32, #tpu.memory_space<vmem>>, vector<1x8x4xf32>
    %712 = vector.shape_cast %711 : vector<1x8x4xf32> to vector<8x4xf32>
    %cst_641 = arith.constant dense<0.000000e+00> : vector<8x16xf32>
    %713 = tpu.matmul %712, %710, %cst_641 {dimension_numbers = #tpu.dot_dimension_numbers<[1], [0], [0], [1], [0, 0, 1, 1], [], []>} : vector<8x4xf32>, vector<4x16xf32>, vector<8x16xf32> -> vector<8x16xf32>
    %714 = arith.addf %704, %713 : vector<8x16xf32>
    %c0_642 = arith.constant 0 : index
    %715 = arith.index_cast %707 : i32 to index
    %c0_643 = arith.constant 0 : index
    %c1_644 = arith.constant 1 : index
    %716 = vector.load %arg2[%c0_642, %715, %c0_643, %c1_644] : memref<1x18x4x18xf32, #tpu.memory_space<vmem>>, vector<1x1x4x16xf32>
    %717 = vector.shape_cast %716 : vector<1x1x4x16xf32> to vector<4x16xf32>
    %c4_645 = arith.constant 4 : index
    %c0_646 = arith.constant 0 : index
    %c0_647 = arith.constant 0 : index
    %718 = vector.load %arg3[%c4_645, %c0_646, %c0_647] : memref<9x8x4xf32, #tpu.memory_space<vmem>>, vector<1x8x4xf32>
    %719 = vector.shape_cast %718 : vector<1x8x4xf32> to vector<8x4xf32>
    %cst_648 = arith.constant dense<0.000000e+00> : vector<8x16xf32>
    %720 = tpu.matmul %719, %717, %cst_648 {dimension_numbers = #tpu.dot_dimension_numbers<[1], [0], [0], [1], [0, 0, 1, 1], [], []>} : vector<8x4xf32>, vector<4x16xf32>, vector<8x16xf32> -> vector<8x16xf32>
    %721 = arith.addf %714, %720 : vector<8x16xf32>
    %c0_649 = arith.constant 0 : index
    %722 = arith.index_cast %707 : i32 to index
    %c0_650 = arith.constant 0 : index
    %c2_651 = arith.constant 2 : index
    %723 = vector.load %arg2[%c0_649, %722, %c0_650, %c2_651] : memref<1x18x4x18xf32, #tpu.memory_space<vmem>>, vector<1x1x4x16xf32>
    %724 = vector.shape_cast %723 : vector<1x1x4x16xf32> to vector<4x16xf32>
    %c5_652 = arith.constant 5 : index
    %c0_653 = arith.constant 0 : index
    %c0_654 = arith.constant 0 : index
    %725 = vector.load %arg3[%c5_652, %c0_653, %c0_654] : memref<9x8x4xf32, #tpu.memory_space<vmem>>, vector<1x8x4xf32>
    %726 = vector.shape_cast %725 : vector<1x8x4xf32> to vector<8x4xf32>
    %cst_655 = arith.constant dense<0.000000e+00> : vector<8x16xf32>
    %727 = tpu.matmul %726, %724, %cst_655 {dimension_numbers = #tpu.dot_dimension_numbers<[1], [0], [0], [1], [0, 0, 1, 1], [], []>} : vector<8x4xf32>, vector<4x16xf32>, vector<8x16xf32> -> vector<8x16xf32>
    %728 = arith.addf %721, %727 : vector<8x16xf32>
    %c7_i32_656 = arith.constant 7 : i32
    %729 = arith.addi %0, %c7_i32_656 : i32
    %c1_i32_657 = arith.constant 1 : i32
    %730 = arith.muli %729, %c1_i32_657 : i32
    %c2_i32_658 = arith.constant 2 : i32
    %731 = arith.addi %730, %c2_i32_658 : i32
    %c0_659 = arith.constant 0 : index
    %732 = arith.index_cast %731 : i32 to index
    %c0_660 = arith.constant 0 : index
    %c0_661 = arith.constant 0 : index
    %733 = vector.load %arg2[%c0_659, %732, %c0_660, %c0_661] : memref<1x18x4x18xf32, #tpu.memory_space<vmem>>, vector<1x1x4x16xf32>
    %734 = vector.shape_cast %733 : vector<1x1x4x16xf32> to vector<4x16xf32>
    %c6_662 = arith.constant 6 : index
    %c0_663 = arith.constant 0 : index
    %c0_664 = arith.constant 0 : index
    %735 = vector.load %arg3[%c6_662, %c0_663, %c0_664] : memref<9x8x4xf32, #tpu.memory_space<vmem>>, vector<1x8x4xf32>
    %736 = vector.shape_cast %735 : vector<1x8x4xf32> to vector<8x4xf32>
    %cst_665 = arith.constant dense<0.000000e+00> : vector<8x16xf32>
    %737 = tpu.matmul %736, %734, %cst_665 {dimension_numbers = #tpu.dot_dimension_numbers<[1], [0], [0], [1], [0, 0, 1, 1], [], []>} : vector<8x4xf32>, vector<4x16xf32>, vector<8x16xf32> -> vector<8x16xf32>
    %738 = arith.addf %728, %737 : vector<8x16xf32>
    %c0_666 = arith.constant 0 : index
    %739 = arith.index_cast %731 : i32 to index
    %c0_667 = arith.constant 0 : index
    %c1_668 = arith.constant 1 : index
    %740 = vector.load %arg2[%c0_666, %739, %c0_667, %c1_668] : memref<1x18x4x18xf32, #tpu.memory_space<vmem>>, vector<1x1x4x16xf32>
    %741 = vector.shape_cast %740 : vector<1x1x4x16xf32> to vector<4x16xf32>
    %c7_669 = arith.constant 7 : index
    %c0_670 = arith.constant 0 : index
    %c0_671 = arith.constant 0 : index
    %742 = vector.load %arg3[%c7_669, %c0_670, %c0_671] : memref<9x8x4xf32, #tpu.memory_space<vmem>>, vector<1x8x4xf32>
    %743 = vector.shape_cast %742 : vector<1x8x4xf32> to vector<8x4xf32>
    %cst_672 = arith.constant dense<0.000000e+00> : vector<8x16xf32>
    %744 = tpu.matmul %743, %741, %cst_672 {dimension_numbers = #tpu.dot_dimension_numbers<[1], [0], [0], [1], [0, 0, 1, 1], [], []>} : vector<8x4xf32>, vector<4x16xf32>, vector<8x16xf32> -> vector<8x16xf32>
    %745 = arith.addf %738, %744 : vector<8x16xf32>
    %c0_673 = arith.constant 0 : index
    %746 = arith.index_cast %731 : i32 to index
    %c0_674 = arith.constant 0 : index
    %c2_675 = arith.constant 2 : index
    %747 = vector.load %arg2[%c0_673, %746, %c0_674, %c2_675] : memref<1x18x4x18xf32, #tpu.memory_space<vmem>>, vector<1x1x4x16xf32>
    %748 = vector.shape_cast %747 : vector<1x1x4x16xf32> to vector<4x16xf32>
    %c8_676 = arith.constant 8 : index
    %c0_677 = arith.constant 0 : index
    %c0_678 = arith.constant 0 : index
    %749 = vector.load %arg3[%c8_676, %c0_677, %c0_678] : memref<9x8x4xf32, #tpu.memory_space<vmem>>, vector<1x8x4xf32>
    %750 = vector.shape_cast %749 : vector<1x8x4xf32> to vector<8x4xf32>
    %cst_679 = arith.constant dense<0.000000e+00> : vector<8x16xf32>
    %751 = tpu.matmul %750, %748, %cst_679 {dimension_numbers = #tpu.dot_dimension_numbers<[1], [0], [0], [1], [0, 0, 1, 1], [], []>} : vector<8x4xf32>, vector<4x16xf32>, vector<8x16xf32> -> vector<8x16xf32>
    %752 = arith.addf %745, %751 : vector<8x16xf32>
    %c0_680 = arith.constant 0 : index
    %c0_681 = arith.constant 0 : index
    %753 = vector.load %arg4[%c0_680, %c0_681] : memref<8x1xf32, #tpu.memory_space<vmem>>, vector<8x1xf32>
    %754 = vector.broadcast %753 : vector<8x1xf32> to vector<8x16xf32>
    %755 = arith.addf %752, %754 : vector<8x16xf32>
    %cst_682 = arith.constant 5.000000e-01 : f32
    %756 = vector.broadcast %cst_682 : f32 to vector<8x16xf32>
    %757 = arith.mulf %756, %755 : vector<8x16xf32>
    %cst_683 = arith.constant 4.471500e-02 : f32
    %758 = vector.broadcast %cst_683 : f32 to vector<8x16xf32>
    %759 = arith.mulf %758, %755 : vector<8x16xf32>
    %760 = arith.mulf %759, %755 : vector<8x16xf32>
    %761 = arith.mulf %760, %755 : vector<8x16xf32>
    %762 = arith.addf %755, %761 : vector<8x16xf32>
    %cst_684 = arith.constant 0.797884583 : f32
    %763 = vector.broadcast %cst_684 : f32 to vector<8x16xf32>
    %764 = arith.mulf %763, %762 : vector<8x16xf32>
    %765 = math.tanh %764 : vector<8x16xf32>
    %cst_685 = arith.constant 1.000000e+00 : f32
    %766 = vector.broadcast %cst_685 : f32 to vector<8x16xf32>
    %767 = arith.addf %766, %765 : vector<8x16xf32>
    %768 = arith.mulf %757, %767 : vector<8x16xf32>
    %c0_686 = arith.constant 0 : index
    %c0_687 = arith.constant 0 : index
    %769 = vector.load %arg5[%c0_686, %c0_687] : memref<16x32xf32, #tpu.memory_space<vmem>>, vector<16x32xf32>
    %cst_688 = arith.constant dense<0.000000e+00> : vector<8x32xf32>
    %770 = tpu.matmul %768, %769, %cst_688 {dimension_numbers = #tpu.dot_dimension_numbers<[1], [0], [0], [1], [0, 0, 1, 1], [], []>} : vector<8x16xf32>, vector<16x32xf32>, vector<8x32xf32> -> vector<8x32xf32>
    %c0_689 = arith.constant 0 : index
    %c0_690 = arith.constant 0 : index
    %c14 = arith.constant 14 : index
    %c0_691 = arith.constant 0 : index
    %771 = vector.load %arg6[%c0_689, %c0_690, %c14, %c0_691] : memref<1x8x16x32xf32, #tpu.memory_space<vmem>>, vector<1x8x1x32xf32>
    %772 = vector.shape_cast %771 : vector<1x8x1x32xf32> to vector<8x32xf32>
    %773 = vector.shape_cast %770 : vector<8x32xf32> to vector<1x8x1x32xf32>
    tpu.vector_store %arg6[%c0_689, %c0_690, %c14, %c0_691], %773 {strides = array<i32>} : memref<1x8x16x32xf32, #tpu.memory_space<vmem>>, vector<1x8x1x32xf32>,
    %c0_692 = arith.constant 0 : index
    %c0_693 = arith.constant 0 : index
    %c15 = arith.constant 15 : index
    %c0_694 = arith.constant 0 : index
    %774 = vector.load %arg6[%c0_692, %c0_693, %c15, %c0_694] : memref<1x8x16x32xf32, #tpu.memory_space<vmem>>, vector<1x8x1x32xf32>
    %775 = vector.shape_cast %774 : vector<1x8x1x32xf32> to vector<8x32xf32>
    %776 = vector.shape_cast %770 : vector<8x32xf32> to vector<1x8x1x32xf32>
    tpu.vector_store %arg6[%c0_692, %c0_693, %c15, %c0_694], %776 {strides = array<i32>} : memref<1x8x16x32xf32, #tpu.memory_space<vmem>>, vector<1x8x1x32xf32>,
    return
  }
  func.func @transform_0(%arg0: i32, %arg1: i32) -> (i32, i32, i32, i32) {
    %c0_i32 = arith.constant 0 : i32
    %c0_i32_0 = arith.constant 0 : i32
    %c0_i32_1 = arith.constant 0 : i32
    %c0_i32_2 = arith.constant 0 : i32
    return %arg0, %c0_i32, %c0_i32_0, %c0_i32_1 : i32, i32, i32, i32
  }
  func.func @transform_1(%arg0: i32, %arg1: i32) -> (i32, i32, i32) {
    %c0_i32 = arith.constant 0 : i32
    %c0_i32_0 = arith.constant 0 : i32
    %c0_i32_1 = arith.constant 0 : i32
    %c0_i32_2 = arith.constant 0 : i32
    return %c0_i32, %c0_i32_0, %c0_i32_1 : i32, i32, i32
  }
  func.func @transform_2(%arg0: i32, %arg1: i32) -> (i32, i32) {
    %c0_i32 = arith.constant 0 : i32
    %c0_i32_0 = arith.constant 0 : i32
    %c0_i32_1 = arith.constant 0 : i32
    return %c0_i32, %c0_i32_0 : i32, i32
  }
  func.func @transform_3(%arg0: i32, %arg1: i32) -> (i32, i32) {
    %c0_i32 = arith.constant 0 : i32
    %c0_i32_0 = arith.constant 0 : i32
    %c0_i32_1 = arith.constant 0 : i32
    return %c0_i32, %c0_i32_0 : i32, i32
  }
  func.func @transform_4(%arg0: i32, %arg1: i32) -> (i32, i32, i32, i32) {
    %c0_i32 = arith.constant 0 : i32
    %c0_i32_0 = arith.constant 0 : i32
    %c0_i32_1 = arith.constant 0 : i32
    return %arg0, %c0_i32, %arg1, %c0_i32_0 : i32, i32, i32, i32
  }
}

</mosaic_0001>

<bundles_post_ra>
// kernel: tpu_custom_call.1
= control target key start
LH: loop header
LB: loop body
LE: loop exit
PB: predicated region body
PF: predicated region fallthrough
CT: control target
= control target key end

     0   :  { %9 = vsyncpa [#allocation3], 0  ;;  %s4629_s0 = inlined_call_operand.hbm [shape: f32[2,18,4,18], index: 0, kind: input, shape index: {}]   ;;  %s4630_s1 = inlined_call_operand.vmem [shape: f32[9,8,4], index: 1, kind: input, shape index: {}]   ;;  %s4631_s2 = inlined_call_operand.vmem [shape: f32[8,1], index: 2, kind: input, shape index: {}]   ;;  %s4632_s3 = inlined_call_operand.vmem [shape: f32[16,32], index: 3, kind: input, shape index: {}]   ;;  %s4633_s4 = inlined_call_operand.hbm [shape: f32[2,8,32,32], index: 4, kind: output, shape index: {}]  }
   0x1   :  { %11 = vsyncpa [#allocation3 + $0x1], 0 }
   0x2   :  { %12 = vsyncpa [#allocation4], 0 }
   0x3   :  { %14 = vsyncpa [#allocation4 + $0x1], 0  ;;  %s3676_s15 = smov 0   ;;  %s3678_s16 = smov 0  }
   0x4   :  { %s3680_s17 = smov 0   ;;  %s3682_s18 = smov 0  }
   0x5   :  { %s3684_s19 = smov 0   ;;  %s3686_s20 = smov 0  }
   0x6   :  { %s3688_s21 = smov 0   ;;  %s3690_s22 = smov 0  }
   0x7   :  { %s3692_s23 = smov 0   ;;  %s3694_s24 = smov 0  }
   0x8   :  { %s3696_s25 = smov 0  }
   0x9 LB: > { %4639 = sst [smem:[#allocation10_spill]] %s3617_s20  ;;  %s3089_s26 = sadd.s32 4294967295, %s3637_s25   ;;  %s3637_s25 = sphi %s3696_s25, %s20_s25   ;;  %s3633_s24 = sphi %s3694_s24, %s4654_s24   ;;  %s3629_s23 = sphi %s3692_s23, %s4653_s23   ;;  %s3625_s22 = sphi %s3690_s22, %s4652_s22   ;;  %s3621_s21 = sphi %s3688_s21, %s4651_s21   ;;  %s3617_s20 = sphi %s3686_s20, %s4650_s20   ;;  %s3613_s19 = sphi %s3684_s19, %s4659_s19   ;;  %s3609_s18 = sphi %s3682_s18, %s4658_s18   ;;  %s3605_s17 = sphi %s3680_s17, %s4657_s17   ;;  %s3601_s16 = sphi %s3678_s16, %s4656_s16   ;;  %s3597_s15 = sphi %s3676_s15, %s4655_s15  }
   0xa   : > { %4640 = sst [smem:[#allocation11_spill]] %s3629_s23  ;;  %s3090_s27 = sadd.s32 4294967294, %s3637_s25  }
   0xb   : > { %4641 = sst [smem:[#allocation12_spill]] %s3633_s24  ;;  %s29_s28 = sadd.s32 1, %s3629_s23 }
   0xc   : > { %s32_s29 = sadd.s32 1, %s3633_s24  ;;  %p30_p0 = scmp.ge.s32.totalorder %s29_s28, 2 }
   0xd   : > { %s39_s30 = sadd.s32 1, %s3617_s20  ;;  %p46_p1 = scmp.ne.s32.totalorder %s3617_s20, %s3613_s19 }
   0xe   : > { %p47_p2 = scmp.eq.s32.totalorder %s3637_s25, 0  ;;  %s4661_s28 = smov (%p30_p0, %s29_s28), 0 }
   0xf   : > { %4642 = sst [smem:[#allocation13_spill]] %s4661_s28  ;;  %s4663_s29 = smov (!%p30_p0, %s32_s29), %s3633_s24 }
  0x10   : > { %p3740_p3 = por %p47_p2, %p46_p1  ;;  %p52_p4 = scmp.ne.s32.totalorder %s3613_s19, %s3609_s18 }
  0x11   : > { %p34_p5 = scmp.ge.s32.totalorder %s4663_s29, 2  ;;  %p53_p6 = scmp.eq.s32.totalorder %s3089_s26, 0 }
  0x12   : > { %s126_s6 = ssub.s32 %s3629_s23, %s4661_s28  ;;  %s130_s7 = sadd.s32 1, %s3605_s17 }
  0x13   : > { %s4665_s29 = smov (%p34_p5, %s4663_s29), 0  ;;  %p3750_p7 = por %p53_p6, %p52_p4 }
  0x14   : > { %4644 = sst [smem:[#allocation14_spill]] %s4665_s29  ;;  %p140_p8 = scmp.ne.s32.totalorder %s3605_s17, %s3601_s16 }
  0x15   : > { %s36_s9 = ssub.s32 %s3633_s24, %s4665_s29  ;;  %p141_p9 = scmp.eq.s32.totalorder %s3089_s26, 3 }
  0x16   : > { %p37_p10 = scmp.eq.s32.totalorder %s36_s9, 0  ;;  %s127_s10 = sor.u32 %s126_s6, %s36_s9 }
  0x17   : > { %p128_p11 = scmp.eq.s32.totalorder %s127_s10, 0  ;;  %p3758_p12 = por %p141_p9, %p140_p8 }
  0x18   : > { %s3763_s12 = scalar_select %p37_p10, %s3617_s20, %s39_s30  }
  0x19   : > { %s3766_s13 = scalar_select %p128_p11, %s3605_s17, %s130_s7  }
  0x1a   : > { %4647 = sst [smem:[#allocation15_spill]] %s3763_s12  ;;  %p146_p13 = scmp.ne.s32.totalorder %s3601_s16, %s3597_s15 }
  0x1b   : > { %p147_p0 = scmp.eq.s32.totalorder %s3090_s27, 3  ;;  %p3392_p1 = scmp.lt.s32.totalorder %s3637_s25, 4 }
  0x1c   : > { %s176_s18 = sand.u32 1, %s3617_s20   ;;  %s3372_s6 = smul.u32 72, %s3633_s24 }
  0x1d   : > { %p3771_p2 = por %p147_p0, %p146_p13  ;;  %s3371_s26 = smul.u32 72, %s176_s18 }
  0x1e   : > { %p3385_p4 = pnand %p3392_p1, %p3740_p3  ;;  %s185_s30 = scalar_lea.hbm %s4629_s0, %s3372_s6 }
  0x1f   : > { %s180_s29 = scalar_lea.vmem [#allocation2], %s3371_s26  ;;  %s186_s28 = sshll.u32 %s185_s30, 4  ;;  %s187_s28 = int_to_ptr.hbm [resolvable:$true] %s186_s28 }
  0x20   : > { %s188_s7 = sshll.u32 %s180_s29, 4  ;;  %p3094_p5 = scmp.ge.s32.totalorder %s3637_s25, 1  ;;  %s189_s7 = int_to_ptr.vmem [resolvable:$true] %s188_s7 }
  0x21   : > { %s177_s27 = scalar_lea.sflag [#allocation3], %s176_s18  ;;  %s3639_s23 = smov 64  }
  0x22   : > { %s3640_s12 = smov 4   ;;  %p196_p6 = scmp.lt.s32.totalorder %s3637_s25, 5 }
  0x23   : > { %3387 = dma.hbm_to_vmem [thread:$0]  (!%p3385_p4), %s187_s28, 1152, %s189_s7, %s177_s27, %s3639_s23, %s3639_s23, %s3640_s12  }
  0x24   : > { %p197_p8 = pnand %p3094_p5, %p196_p6 }
  0x25   : > { %s202_s5 = sand.u32 (!%p197_p8), 1, %s3613_s19  }
  0x26   : > { %200 = sbr.rel (%p197_p8) target bundleno = 1698 (0x6a2), region = 36  ;;  %s203_s20 = scalar_lea.sflag (!%p197_p8), [#allocation3], %s202_s5 }
  0x27   : > { %s3373_s24 = smul.u32 (!%p197_p8), 72, %s202_s5 }
  0x29   : > { %s206_s9 = scalar_lea.vmem (!%p197_p8), [#allocation2], %s3373_s24 }
  0x2b   : > { %3588 = dma.done.wait (%p3750_p7), %s203_s20, 1152  }
  0x2c   : > { %3590 = vsyncadd (%p3750_p7), %s203_s20, 4294966144  ;;  %s3361_s29 = sshll.u32 %s3621_s21, 5  ;;  %v3641_v0 = vmov 0   ;;  %s3642_s24 = smov 126   ;;  %v3804_v4 = vld [vmem:[%s4631_s2] sm:$0xff]  ;;  %vm247_vm0 = vcmask 1043456  }
  0x2d   : > { %3494 = vset.pattern.permute.xlu0 %v3641_v0  ;;  %3495 = vset.pattern.permute.xlu2 %v3641_v0  ;;  %s3790_s23 = scalar_lea.vmem %s206_s9, %s3361_s29 [#allocation2]  ;;  %s3643_s20 = smov 127   ;;  %vm243_vm1 = vcmask 31744   ;;  %v3841_v11 = vld [vmem:[%s4630_s1 + $0x18] sm:$0xff]  ;;  %v3850_v13 = vld [vmem:[%s4630_s1] sm:$0xff]  ;;  %v3863_v15 = vld [vmem:[%s4630_s1 + $0x28] sm:$0xff]  ;;  %vm529_vm2 = vcmask 130048  }
  0x2e   : > { %3496 = vset.pattern.permute.xlu1 %v3641_v0  ;;  %v236_v1 = vld [vmem:[%s3790_s23] sm:$0xf]  ;;  %v3108_v2 = vld [vmem:[%s3790_s23 + $0x4] sm:$0xf]  ;;  %v3120_v3 = vld [vmem:[%s3790_s23 + $0x8] sm:$0xf] }
  0x2f   : > { %297 = vrot.lane.b32.xlu0 %v236_v1, %s3642_s24  ;;  %360 = vrot.lane.b32.xlu1 %v3108_v2, %s3643_s20  ;;  %v3808_v5 = vld [vmem:[%s3790_s23 + $0xc] sm:$0xf]  ;;  %v3813_v6 = vld [vmem:[%s3790_s23 + $0x8] sm:$0xf]  ;;  %s229_s9 = sand.u32 1, %s3601_s16   ;;  %vm568_vm3 = vcmask 253952  }
  0x30   : > { %390 = vrot.lane.b32.xlu2 %v3108_v2, %s3642_s24  ;;  %v3818_v7 = vld [vmem:[%s3790_s23 + $0x10] sm:$0xf]  ;;  %v3824_v8 = vld [vmem:[%s3790_s23 + $0xc] sm:$0xf]  ;;  %v3829_v9 = vld [vmem:[%s3790_s23 + $0x14] sm:$0xf]  ;;  %3110 = vmatpush.msk.msra.mxu3 %vm247_vm0, %v3108_v2 }
  0x31   : > { %3101 = vmatpush.msk.msra.mxu1 %vm247_vm0, %v236_v1  ;;  %v3836_v10 = vld [vmem:[%s3790_s23 + $0x10] sm:$0xf]  ;;  %3111 = vmatmul.msk.f32.vlgmr.msra.gmra.mxu3 %vm243_vm1, %v3841_v11  ;;  %v3856_v14 = vld [vmem:[%s3790_s23 + $0x14] sm:$0xf]  ;;  %v3873_v17 = vld [vmem:[%s3790_s23 + $0x18] sm:$0xf] }
  0x32   : > { %3102 = vmatmul.msk.f32.vlgmr.msra.gmra.mxu1 %vm243_vm1, %v3850_v13  ;;  %v3866_v16 = vld [vmem:[%s3790_s23 + $0x14] sm:$0xf]  ;;  %v3131_v18 = vld [vmem:[%s3790_s23 + $0x4] sm:$0xf]  ;;  %v3877_v19 = vld [vmem:[%s3790_s23 + $0x8] sm:$0xf] }
  0x33   : > { %v3887_v20 = vld [vmem:[%s4630_s1 + $0x10] sm:$0xff]  ;;  %v3900_v23 = vld [vmem:[%s4630_s1 + $0x8] sm:$0xff]  ;;  %v3910_v27 = vld [vmem:[%s4630_s1 + $0x38] sm:$0xff]  ;;  %s3095_s29 = sshll.u32 %s229_s9, 7  ;;  %s2924_s27 = scalar_lea.sflag [#allocation4], %s229_s9 }
  0x34   : > { %v3905_v24 = vld [vmem:[%s4630_s1 + $0x30] sm:$0xff]  ;;  %v3929_v29 = vld [vmem:[%s4630_s1 + $0x20] sm:$0xff]  ;;  %v3172_v31 = vld [vmem:[%s3790_s23 + $0xc] sm:$0xf]  ;;  %s4070_s28 = scalar_lea.vmem [#allocation5], %s3095_s29 }
  0x35   : > { %v3940_v30 = vld [vmem:[%s4630_s1 + $0x40] sm:$0xff]  ;;  %v3952_v32 = vld [vmem:[%s3790_s23 + $0x10] sm:$0xf]  ;;  %v3968_v37 = vld [vmem:[%s4632_s3 + $0x8] sm:$0xff] }
  0x36   : > { %v3973_v38 = vld [vmem:[%s4632_s3] sm:$0xff]  ;;  %v3979_v40 = vld [vmem:[%s3790_s23 + $0x18] sm:$0xf]  ;;  %v4017_v60 = vld [vmem:[%s3790_s23 + $0x1c] sm:$0xf] }
  0x37   : > { %241 = vrot.lane.b32.xlu0 %v236_v1, %s3643_s20  ;;  %453 = vrot.lane.b32.xlu1 %v3120_v3, %s3643_s20  ;;  %v4026_v1 = vld [vmem:[%s3790_s23 + $0x18] sm:$0xf]  ;;  %v4029_v2 = vld [vmem:[%s3790_s23 + $0x1c] sm:$0xf] }
  0x38   : > { %483 = vrot.lane.b32.xlu2 %v3120_v3, %s3642_s24 }
  0x3f   : > { %514 = vperm.xlu0 %3494, %v3804_v4   ;;  %589 = vrot.lane.b32.xlu1 %v3131_v18, %s3643_s20 }
  0x40   : > { %700 = vrot.lane.b32.xlu2 %v3877_v19, %s3643_s20 }
  0x47   : > { %819 = vrot.lane.b32.xlu0 %v3808_v5, %s3642_s24  ;;  %642 = vrot.lane.b32.xlu1 %v3131_v18, %s3642_s24 }
  0x48   : > { %729 = vrot.lane.b32.xlu2 %v3877_v19, %s3642_s24 }
  0x4f   : > { %976 = vrot.lane.b32.xlu0 %v3813_v6, %s3642_s24  ;;  %790 = vrot.lane.b32.xlu1 %v3808_v5, %s3643_s20 }
  0x50   : > { %850 = vperm.xlu2 %3495, %v3804_v4  }
  0x57   : > { %1124 = vrot.lane.b32.xlu0 %v3818_v7, %s3643_s20  ;;  %923 = vrot.lane.b32.xlu1 %v3813_v6, %s3643_s20 }
  0x58   : > { %1034 = vrot.lane.b32.xlu2 %v3172_v31, %s3643_s20 }
  0x5f   : > { %1184 = vperm.xlu0 %3494, %v3804_v4   ;;  %1063 = vrot.lane.b32.xlu1 %v3172_v31, %s3642_s24 }
  0x60   : > { %1153 = vrot.lane.b32.xlu2 %v3818_v7, %s3642_s24 }
  0x67   : > { %1310 = vrot.lane.b32.xlu0 %v3824_v8, %s3642_s24  ;;  %1257 = vrot.lane.b32.xlu1 %v3824_v8, %s3643_s20 }
  0x68   : > { %1368 = vrot.lane.b32.xlu2 %v3952_v32, %s3643_s20 }
  0x6f   : > { %1458 = vrot.lane.b32.xlu0 %v3829_v9, %s3643_s20  ;;  %1397 = vrot.lane.b32.xlu1 %v3952_v32, %s3642_s24 }
  0x70   : > { %1487 = vrot.lane.b32.xlu2 %v3829_v9, %s3642_s24 }
  0x77   : > { %1591 = vrot.lane.b32.xlu0 %v3836_v10, %s3643_s20  ;;  %1518 = vperm.xlu1 %3496, %v3804_v4  }
  0x78   : > { %1644 = vrot.lane.b32.xlu2 %v3836_v10, %s3642_s24 }
  0x7f   : > { %1731 = vrot.lane.b32.xlu0 %v3856_v14, %s3642_s24  ;;  %1702 = vrot.lane.b32.xlu1 %v3856_v14, %s3643_s20 }
  0x80   : > { %1792 = vrot.lane.b32.xlu2 %v3979_v40, %s3643_s20 }
  0x87   : > { %1925 = vrot.lane.b32.xlu0 %v3866_v16, %s3643_s20  ;;  %1821 = vrot.lane.b32.xlu1 %v3979_v40, %s3642_s24 }
  0x88   : > { %1852 = vperm.xlu2 %3495, %v3804_v4  }
  0x8a   : > { %v391_v12 = vpop.permute.xlu2 %390 }
  0x8b   : > { %3116 = vmatpush.msk.msrb.mxu1 %vm247_vm0, %v391_v12 }
  0x8c   : > { %3117 = vmatmul.msk.f32.vlgmr.msrb.gmra.mxu1 %vm243_vm1, %v3863_v15 }
  0x8d   : > { %547 = vmatpush.msra.mxu1 %v3968_v37 }
  0x8f   : > { %2065 = vrot.lane.b32.xlu0 %v3873_v17, %s3642_s24  ;;  %548 = vmatpush.msra.mxu1 %v3973_v38 }
  0x90   : > { %2036 = vrot.lane.b32.xlu1 %v3873_v17, %s3643_s20  ;;  %1978 = vrot.lane.b32.xlu2 %v3866_v16, %s3642_s24 }
  0x91   : > { %3142 = vmatpush.msk.msrb.mxu1 %vm247_vm0, %v3877_v19 }
  0x92   : > { %v484_v28 = vpop.permute.xlu2 %483 }
  0x97   : > { %2186 = vperm.xlu0 %3494, %v3804_v4  }
  0x98   : > { %2155 = vrot.lane.b32.xlu1 %v4017_v60, %s3642_s24  ;;  %2126 = vrot.lane.b32.xlu2 %v4017_v60, %s3643_s20 }
  0x9a   : > { %v701_v36 = vpop.permute.xlu2 %700 }
  0x9f   : > { %2370 = vrot.lane.b32.xlu0 %v4029_v2, %s3643_s20 }
  0xa0   : > { %2312 = vrot.lane.b32.xlu1 %v4026_v1, %s3642_s24  ;;  %2259 = vrot.lane.b32.xlu2 %v4026_v1, %s3643_s20 }
  0xa1   : > { %v298_v21 = vpop.permute.xlu0 %297  ;;  %v361_v22 = vpop.permute.xlu1 %360 }
  0xa2   : > { %3104 = vmatpush.msk.msra.mxu2 %vm247_vm0, %v298_v21  ;;  %v730_v46 = vpop.permute.xlu2 %729 }
  0xa3   : > { %3105 = vmatmul.msk.f32.vlgmr.msra.gmra.mxu2 %vm243_vm1, %v3887_v20 }
  0xa4   : > { %3122 = vmatpush.msk.msrb.mxu2 %vm247_vm0, %v3120_v3 }
  0xa8   : > { %2399 = vrot.lane.b32.xlu2 %v4029_v2, %s3642_s24 }
  0xa9   : > { %v242_v25 = vpop.permute.xlu0 %241  ;;  %v454_v26 = vpop.permute.xlu1 %453 }
  0xaa   : > { %3099 = vmatpush.msk.msra.mxu0 %vm247_vm0, %v242_v25  ;;  %3125 = vmatpush.msk.msrb.mxu3 %vm247_vm0, %v454_v26  ;;  %v4054_v25 = vld [vmem:[%s3790_s23 + $0x20] sm:$0xf]  ;;  %v851_v26 = vpop.permute.xlu2 %850 }
  0xab   : > { %3100 = vmatmul.msk.f32.vlgmr.msra.gmra.mxu0 %vm243_vm1, %v3900_v23  ;;  %3123 = vmatmul.msk.f32.vlgmr.msrb.gmra.mxu2 %vm243_vm1, %v3905_v24 }
  0xac   : > { %3113 = vmatpush.msk.msrb.mxu0 %vm247_vm0, %v361_v22  ;;  %3126 = vmatmul.msk.f32.vlgmr.msrb.gmra.mxu3 %vm243_vm1, %v3910_v27  ;;  %v4044_v22 = vld [vmem:[%s3790_s23 + $0x1c] sm:$0xf] }
  0xad   : > { %3135 = vmatpush.msk.msra.mxu3 %vm247_vm0, %v3131_v18 }
  0xae   : > { %3128 = vmatpush.msk.msra.mxu0 %vm247_vm0, %v484_v28 }
  0xaf   : > { %v292_v39 = vpop.f32.mrf.mxu1  ;;  %3148 = vmatpush.msk.msrb.mxu3 %vm247_vm0, %v730_v46 }
  0xb0   : > { %2593 = vrot.lane.b32.xlu2 %v4044_v22, %s3643_s20 }
  0xb1   : > { %v515_v33 = vpop.permute.xlu0 %514  ;;  %v590_v35 = vpop.permute.xlu1 %589 }
  0xb2   : > { %3133 = vmatpush.msk.msra.mxu2 %vm247_vm0, %v590_v35 }
  0xb3   : > { %3114 = vmatmul.msk.f32.vlgmr.msrb.gmra.mxu0 %vm243_vm1, %v3929_v29  ;;  %3134 = vmatmul.msk.f32.vlgmr.msra.gmra.mxu2 %vm243_vm1, %v3900_v23 }
  0xb4   : > { %3136 = vmatmul.msk.f32.vlgmr.msra.gmra.mxu3 %vm243_vm1, %v3850_v13  ;;  %3145 = vmatpush.msk.msrb.mxu2 %vm247_vm0, %v701_v36  ;;  %v354_v45 = vpop.f32.mrf.mxu3 }
  0xb5   : > { %882 = vmatpush.msra.mxu3 %v3968_v37 }
  0xb7   : > { %883 = vmatpush.msra.mxu3 %v3973_v38 }
  0xb8   : > { %2733 = vrot.lane.b32.xlu2 %v4054_v25, %s3642_s24 }
  0xb9   : > { %v820_v34 = vpop.permute.xlu0 %819  ;;  %v643_v47 = vpop.permute.xlu1 %642 }
  0xba   : > { %3160 = vmatpush.msk.msra.mxu2 %vm247_vm0, %v820_v34  ;;  %3138 = vmatpush.msk.msrb.mxu0 %vm247_vm0, %v643_v47 }
  0xbb   : > { %3129 = vmatmul.msk.f32.vlgmr.msra.gmra.mxu0 %vm243_vm1, %v3940_v30  ;;  %3146 = vmatmul.msk.f32.vlgmr.msrb.gmra.mxu2 %vm243_vm1, %v3929_v29 }
  0xbc   : > { %3149 = vmatmul.msk.f32.vlgmr.msrb.gmra.mxu3 %vm243_vm1, %v3863_v15  ;;  %3154 = vmatpush.msk.msra.mxu0 %vm247_vm0, %v3808_v5 }
  0xbd   : > { %3174 = vmatpush.msk.msrb.mxu3 %vm247_vm0, %v3172_v31  ;;  %v1035_v31 = vpop.permute.xlu2 %1034 }
  0xc0   : > { %2854 = vperm.xlu2 %3495, %v3804_v4  }
  0xc1   : > { %v977_v48 = vpop.permute.xlu0 %976  ;;  %v791_v21 = vpop.permute.xlu1 %790 }
  0xc2   : > { %3170 = vmatpush.msk.msrb.mxu2 %vm247_vm0, %v977_v48 }
  0xc3   : > { %3139 = vmatmul.msk.f32.vlgmr.msrb.gmra.mxu0 %vm243_vm1, %v3887_v20  ;;  %3161 = vmatmul.msk.f32.vlgmr.msra.gmra.mxu2 %vm243_vm1, %v3940_v30 }
  0xc4   : > { %3186 = vmatpush.msk.msra.mxu2 %vm247_vm0, %v3818_v7 }
  0xc9   : > { %v4063_v28 = vpop.permute.xlu0 %1124  ;;  %v924_v34 = vpop.permute.xlu1 %923 }
  0xca   : > { %3165 = vmatpush.msk.msrb.mxu0 %vm247_vm0, %v924_v34 }
  0xcb   : > { %3155 = vmatmul.msk.f32.vlgmr.msra.gmra.mxu0 %vm243_vm1, %v3905_v24  ;;  %3171 = vmatmul.msk.f32.vlgmr.msrb.gmra.mxu2 %vm243_vm1, %v3887_v20 }
  0xcc   : > { %3177 = vmatpush.msk.msra.mxu0 %vm247_vm0, %v1035_v31 }
  0xd3   : > { %3187 = vmatmul.msk.f32.vlgmr.msra.gmra.mxu2 %vm243_vm1, %v3905_v24  ;;  %3166 = vmatmul.msk.f32.vlgmr.msrb.gmra.mxu0 %vm243_vm1, %v3900_v23 }
  0xdb   : > { %3178 = vmatmul.msk.f32.vlgmr.msra.gmra.mxu0 %vm243_vm1, %v3929_v29 }
 0x109   : > { %v414_v51 = vpop.f32.mrf.mxu1 }
 0x126   : > { %v321_v42 = vpop.f32.mrf.mxu2 }
 0x128   : > { %v267_v41 = vpop.f32.mrf.mxu0 }
 0x129   : > { %v293_v43 = vadd.f32 %v292_v39, %v267_v41 }
 0x12b   : > { %v324_v44 = vadd.f32 %v321_v42, %v293_v43  ;;  %v1154_v43 = vpop.permute.xlu2 %1153 }
 0x12c   : > { %3192 = vmatpush.msk.msrb.mxu0 %vm247_vm0, %v1154_v43 }
 0x12d   : > { %v357_v49 = vadd.f32 %v354_v45, %v324_v44  ;;  %3193 = vmatmul.msk.f32.vlgmr.msrb.gmra.mxu0 %vm243_vm1, %v3940_v30 }
 0x12e   : > { %v447_v53 = vpop.f32.mrf.mxu2 }
 0x12f   : > { %v477_v55 = vpop.f32.mrf.mxu3 }
 0x130   : > { %v384_v50 = vpop.f32.mrf.mxu0 }
 0x131   : > { %v387_v52 = vadd.f32 %v384_v50, %v357_v49 }
 0x133   : > { %v417_v54 = vadd.f32 %v414_v51, %v387_v52 }
 0x135   : > { %v450_v56 = vadd.f32 %v447_v53, %v417_v54 }
 0x137   : > { %v480_v57 = vadd.f32 %v477_v55, %v450_v56  ;;  %v638_v36 = vpop.f32.mrf.mxu3 }
 0x138   : > { %v507_v58 = vpop.f32.mrf.mxu0 }
 0x139   : > { %v510_v59 = vadd.f32 %v507_v58, %v480_v57 }
 0x13b   : > { %v517_v61 = vadd.f32 %v515_v33, %v510_v59  ;;  %v4065_v33 = vpop.permute.xlu0 %1184 }
 0x13d   : > { %v519_v62 = vmul.f32 0.044715, %v517_v61  ;;  %v518_v12 = vmul.f32 0.5, %v517_v61 }
 0x13f   : > { %v520_v63 = vmul.f32 %v519_v62, %v517_v61  ;;  %v753_v55 = vpop.f32.mrf.mxu3 }
 0x140   : > { %v666_v48 = vpop.f32.mrf.mxu0 }
 0x141   : > { %v521_v0 = vmul.f32 %v520_v63, %v517_v61 }
 0x143   : > { %v522_v3 = vadd.f32 %v521_v0, %v517_v61  ;;  %v1311_v49 = vpop.permute.xlu0 %1310 }
 0x144   : > { %3202 = vmatpush.msk.msra.mxu0 %vm247_vm0, %v1311_v49 }
 0x145   : > { %v523_v5 = vmul.f32 0.7978846, %v522_v3  ;;  %3203 = vmatmul.msk.f32.vlgmr.msra.gmra.mxu0 %vm243_vm1, %v3887_v20 }
 0x146   : > { %3218 = vmatpush.msk.msrb.mxu0 %vm247_vm0, %v3829_v9 }
 0x147   : > { %3497 = vtanh.f32 %v523_v5  ;;  %v1064_v5 = vpop.permute.xlu1 %1063 }
 0x148   : > { %v785_v57 = vpop.f32.mrf.mxu0 }
 0x14b   : > { %v4107_v59 = vpop.permute.xlu0 %1458 }
 0x14d   : > { %v3498_v7 = vpop.eup %3497  ;;  %3219 = vmatmul.msk.f32.vlgmr.msrb.gmra.mxu0 %vm243_vm1, %v3905_v24 }
 0x14e   : > { %v525_v18 = vadd.f32 1.0, %v3498_v7 }
 0x150   : > { %v526_v19 = vmul.f32 %v525_v18, %v518_v12 }
 0x152   : > { %3130 = vmatmul.msk.f32.vlgmr.msra.gmra.mxu1 %vm529_vm2, %v526_v19 }
 0x153   : > { %3157 = vmatpush.msk.msra.mxu1 %vm247_vm0, %v791_v21  ;;  %v1592_v18 = vpop.permute.xlu0 %1591 }
 0x154   : > { %3229 = vmatpush.msk.msra.mxu0 %vm247_vm0, %v1592_v18 }
 0x155   : > { %3230 = vmatmul.msk.f32.vlgmr.msra.gmra.mxu0 %vm243_vm1, %v3900_v23 }
 0x15a   : > { %3143 = vmatmul.msk.f32.vlgmr.msrb.gmra.mxu1 %vm243_vm1, %v3841_v11 }
 0x15b   : > { %3167 = vmatpush.msk.msrb.mxu1 %vm247_vm0, %v3813_v6  ;;  %v613_v6 = vpop.f32.mrf.mxu2 }
 0x15c   : > { %v639_v46 = vadd.f32 %v638_v36, %v613_v6  ;;  %v947_v36 = vpop.f32.mrf.mxu0 }
 0x15e   : > { %v669_v52 = vadd.f32 %v666_v48, %v639_v46 }
 0x162   : > { %3158 = vmatmul.msk.f32.vlgmr.msra.gmra.mxu1 %vm243_vm1, %v3910_v27 }
 0x163   : > { %v724_v51 = vpop.f32.mrf.mxu2  ;;  %3180 = vmatpush.msk.msra.mxu1 %vm247_vm0, %v1064_v5 }
 0x16a   : > { %3168 = vmatmul.msk.f32.vlgmr.msrb.gmra.mxu1 %vm243_vm1, %v3850_v13 }
 0x16b   : > { %v843_v63 = vpop.f32.mrf.mxu2  ;;  %1216 = vmatpush.msrb.mxu1 %v3968_v37 }
 0x16d   : > { %1217 = vmatpush.msrb.mxu1 %v3973_v38 }
 0x172   : > { %3181 = vmatmul.msk.f32.vlgmr.msra.gmra.mxu1 %vm243_vm1, %v3863_v15 }
 0x173   : > { %3206 = vmatpush.msk.msra.mxu1 %vm247_vm0, %v3952_v32  ;;  %v1369_v32 = vpop.permute.xlu2 %1368  ;;  %v1000_v49 = vpop.f32.mrf.mxu2 }
 0x1cf   : > { %v550_v35 = vpop.f32.mrf.mxu1 }
 0x1d0   : > { %v554_v39 = vrot.slane %v550_v35, 1  ;;  %v555_v41 = vrot.slane %v550_v35, 2  ;;  %v556_v42 = vrot.slane %v550_v35, 3  ;;  %569 = vst.msk [vmem:[%s4070_s28] sm:$0x1] %vm568_vm3, %v550_v35  ;;  %v557_v44 = vrot.slane %v550_v35, 4 }
 0x1d1   : > { %577 = vst.msk [vmem:[%s4070_s28 + $0x1] sm:$0x1] %vm568_vm3, %v550_v35  ;;  %v558_v45 = vrot.slane %v550_v35, 5  ;;  %v559_v47 = vrot.slane %v550_v35, 6  ;;  %v560_v50 = vrot.slane %v550_v35, 7 }
 0x1d2   : > { %570 = vst.msk [vmem:[%s4070_s28 + $0x10] sm:$0x1] %vm568_vm3, %v554_v39 }
 0x1d3   : > { %571 = vst.msk [vmem:[%s4070_s28 + $0x20] sm:$0x1] %vm568_vm3, %v555_v41 }
 0x1d4   : > { %572 = vst.msk [vmem:[%s4070_s28 + $0x30] sm:$0x1] %vm568_vm3, %v556_v42 }
 0x1d5   : > { %573 = vst.msk [vmem:[%s4070_s28 + $0x40] sm:$0x1] %vm568_vm3, %v557_v44 }
 0x1d6   : > { %574 = vst.msk [vmem:[%s4070_s28 + $0x50] sm:$0x1] %vm568_vm3, %v558_v45 }
 0x1d7   : > { %575 = vst.msk [vmem:[%s4070_s28 + $0x60] sm:$0x1] %vm568_vm3, %v559_v47  ;;  %v695_v53 = vpop.f32.mrf.mxu1 }
 0x1d8   : > { %576 = vst.msk [vmem:[%s4070_s28 + $0x70] sm:$0x1] %vm568_vm3, %v560_v50  ;;  %v698_v54 = vadd.f32 %v695_v53, %v669_v52 }
 0x1d9   : > { %578 = vst.msk [vmem:[%s4070_s28 + $0x11] sm:$0x1] %vm568_vm3, %v554_v39  ;;  %v1488_v39 = vpop.permute.xlu2 %1487 }
 0x1da   : > { %579 = vst.msk [vmem:[%s4070_s28 + $0x21] sm:$0x1] %vm568_vm3, %v555_v41  ;;  %v727_v56 = vadd.f32 %v724_v51, %v698_v54  ;;  %v1258_v41 = vpop.permute.xlu1 %1257  ;;  %v1058_v51 = vpop.f32.mrf.mxu0 }
 0x1db   : > { %580 = vst.msk [vmem:[%s4070_s28 + $0x31] sm:$0x1] %vm568_vm3, %v556_v42  ;;  %3197 = vmatpush.msk.msrb.mxu2 %vm247_vm0, %v1258_v41 }
 0x1dc   : > { %581 = vst.msk [vmem:[%s4070_s28 + $0x41] sm:$0x1] %vm568_vm3, %v557_v44  ;;  %v756_v58 = vadd.f32 %v753_v55, %v727_v56  ;;  %3198 = vmatmul.msk.f32.vlgmr.msrb.gmra.mxu2 %vm243_vm1, %v3900_v23 }
 0x1dd   : > { %582 = vst.msk [vmem:[%s4070_s28 + $0x51] sm:$0x1] %vm568_vm3, %v558_v45  ;;  %3209 = vmatpush.msk.msra.mxu2 %vm247_vm0, %v1369_v32 }
 0x1de   : > { %583 = vst.msk [vmem:[%s4070_s28 + $0x61] sm:$0x1] %vm568_vm3, %v559_v47  ;;  %v788_v61 = vadd.f32 %v785_v57, %v756_v58 }
 0x1df   : > { %584 = vst.msk [vmem:[%s4070_s28 + $0x71] sm:$0x1] %vm568_vm3, %v560_v50  ;;  %v814_v62 = vpop.f32.mrf.mxu1  ;;  %3224 = vmatpush.msk.msrb.mxu2 %vm247_vm0, %v1488_v39 }
 0x1e0   : > { %v817_v0 = vadd.f32 %v814_v62, %v788_v61  ;;  %v1119_v61 = vpop.f32.mrf.mxu2 }
 0x1e1   : > { %v1645_v55 = vpop.permute.xlu2 %1644 }
 0x1e2   : > { %v846_v3 = vadd.f32 %v843_v63, %v817_v0  ;;  %v1398_v53 = vpop.permute.xlu1 %1397  ;;  %v1732_v63 = vpop.permute.xlu0 %1731 }
 0x1e3   : > { %v1177_v5 = vpop.f32.mrf.mxu0 }
 0x1e4   : > { %v853_v7 = vadd.f32 %v851_v26, %v846_v3  ;;  %3210 = vmatmul.msk.f32.vlgmr.msra.gmra.mxu2 %vm243_vm1, %v3929_v29 }
 0x1e5   : > { %3234 = vmatpush.msk.msra.mxu2 %vm247_vm0, %v1645_v55 }
 0x1e6   : > { %v855_v12 = vmul.f32 0.044715, %v853_v7  ;;  %v854_v6 = vmul.f32 0.5, %v853_v7 }
 0x1e8   : > { %v856_v19 = vmul.f32 %v855_v12, %v853_v7 }
 0x1ea   : > { %v857_v9 = vmul.f32 %v856_v19, %v853_v7  ;;  %v1926_v19 = vpop.permute.xlu0 %1925 }
 0x1ec   : > { %v858_v21 = vadd.f32 %v857_v9, %v853_v7  ;;  %3225 = vmatmul.msk.f32.vlgmr.msrb.gmra.mxu2 %vm243_vm1, %v3940_v30 }
 0x1ed   : > { %3250 = vmatpush.msk.msrb.mxu2 %vm247_vm0, %v3979_v40 }
 0x1ee   : > { %v859_v26 = vmul.f32 0.7978846, %v858_v21  ;;  %v4196_v21 = vpop.permute.xlu2 %1792 }
 0x1f0   : > { %3499 = vtanh.f32 %v859_v26 }
 0x1f4   : > { %3235 = vmatmul.msk.f32.vlgmr.msra.gmra.mxu2 %vm243_vm1, %v3887_v20 }
 0x1f5   : > { %3261 = vmatpush.msk.msra.mxu2 %vm247_vm0, %v1926_v19 }
 0x1f6   : > { %v3500_v31 = vpop.eup %3499 }
 0x1f7   : > { %v861_v34 = vadd.f32 1.0, %v3500_v31  ;;  %v3312_v31 = vld [vmem:[%s3790_s23 + $0x20] sm:$0xf] }
 0x1f8   : > { %2460 = vrot.lane.b32.xlu1 %v3312_v31, %s3643_s20  ;;  %2489 = vrot.lane.b32.xlu0 %v3312_v31, %s3642_s24 }
 0x1f9   : > { %v862_v35 = vmul.f32 %v861_v34, %v854_v6  ;;  %v4200_v6 = vpop.permute.xlu1 %1518 }
 0x1fb   : > { %3162 = vmatmul.msk.f32.vlgmr.msra.gmra.mxu3 %vm529_vm2, %v862_v35 }
 0x1fc   : > { %3189 = vmatpush.msk.msra.mxu3 %vm247_vm0, %v4063_v28  ;;  %v972_v28 = vpop.f32.mrf.mxu1  ;;  %3251 = vmatmul.msk.f32.vlgmr.msrb.gmra.mxu2 %vm243_vm1, %v3905_v24 }
 0x1fd   : > { %v973_v47 = vadd.f32 %v972_v28, %v947_v36 }
 0x1ff   : > { %v1003_v52 = vadd.f32 %v1000_v49, %v973_v47 }
 0x200   : > { %2520 = vperm.xlu1 %3496, %v3804_v4   ;;  %2704 = vrot.lane.b32.xlu0 %v4054_v25, %s3643_s20 }
 0x201   : > { %v1703_v20 = vpop.permute.xlu1 %1702 }
 0x202   : > { %3241 = vmatpush.msk.msrb.mxu0 %vm247_vm0, %v1703_v20 }
 0x203   : > { %3175 = vmatmul.msk.f32.vlgmr.msrb.gmra.mxu3 %vm243_vm1, %v3841_v11  ;;  %3242 = vmatmul.msk.f32.vlgmr.msrb.gmra.mxu0 %vm243_vm1, %v3929_v29 }
 0x204   : > { %3199 = vmatpush.msk.msrb.mxu3 %vm247_vm0, %v3824_v8  ;;  %v1087_v57 = vpop.f32.mrf.mxu1  ;;  %3262 = vmatmul.msk.f32.vlgmr.msra.gmra.mxu2 %vm243_vm1, %v3900_v23 }
 0x208   : > { %2646 = vrot.lane.b32.xlu1 %v4044_v22, %s3642_s24 }
 0x209   : > { %v1822_v41 = vpop.permute.xlu1 %1821 }
 0x20a   : > { %3256 = vmatpush.msk.msra.mxu0 %vm247_vm0, %v1822_v41 }
 0x20b   : > { %3190 = vmatmul.msk.f32.vlgmr.msra.gmra.mxu3 %vm243_vm1, %v3910_v27  ;;  %3257 = vmatmul.msk.f32.vlgmr.msra.gmra.mxu0 %vm243_vm1, %v3940_v30 }
 0x20c   : > { %3212 = vmatpush.msk.msra.mxu3 %vm247_vm0, %v1398_v53 }
 0x211   : > { %v2037_v23 = vpop.permute.xlu1 %2036 }
 0x212   : > { %3273 = vmatpush.msk.msrb.mxu2 %vm247_vm0, %v2037_v23 }
 0x213   : > { %3200 = vmatmul.msk.f32.vlgmr.msrb.gmra.mxu3 %vm243_vm1, %v3850_v13  ;;  %3274 = vmatmul.msk.f32.vlgmr.msrb.gmra.mxu2 %vm243_vm1, %v3929_v29 }
 0x214   : > { %1550 = vmatpush.msrb.mxu3 %v3968_v37 }
 0x216   : > { %1551 = vmatpush.msrb.mxu3 %v3973_v38 }
 0x21b   : > { %3213 = vmatmul.msk.f32.vlgmr.msra.gmra.mxu3 %vm243_vm1, %v3863_v15 }
 0x21c   : > { %3238 = vmatpush.msk.msra.mxu3 %vm247_vm0, %v3856_v14 }
 0x25f   : > { %v1281_v29 = vpop.f32.mrf.mxu2 }
 0x27e   : > { %v885_v42 = vpop.f32.mrf.mxu3 }
 0x27f   : > { %v889_v43 = vrot.slane %v885_v42, 1  ;;  %v890_v8 = vrot.slane %v885_v42, 2  ;;  %v891_v44 = vrot.slane %v885_v42, 3  ;;  %903 = vst.msk [vmem:[%s4070_s28 + $0x2] sm:$0x1] %vm568_vm3, %v885_v42  ;;  %v892_v45 = vrot.slane %v885_v42, 4 }
 0x280   : > { %911 = vst.msk [vmem:[%s4070_s28 + $0x3] sm:$0x1] %vm568_vm3, %v885_v42  ;;  %v893_v46 = vrot.slane %v885_v42, 5  ;;  %v894_v48 = vrot.slane %v885_v42, 6  ;;  %v895_v50 = vrot.slane %v885_v42, 7 }
 0x281   : > { %904 = vst.msk [vmem:[%s4070_s28 + $0x12] sm:$0x1] %vm568_vm3, %v889_v43 }
 0x282   : > { %905 = vst.msk [vmem:[%s4070_s28 + $0x22] sm:$0x1] %vm568_vm3, %v890_v8 }
 0x283   : > { %906 = vst.msk [vmem:[%s4070_s28 + $0x32] sm:$0x1] %vm568_vm3, %v891_v44 }
 0x284   : > { %907 = vst.msk [vmem:[%s4070_s28 + $0x42] sm:$0x1] %vm568_vm3, %v892_v45 }
 0x285   : > { %908 = vst.msk [vmem:[%s4070_s28 + $0x52] sm:$0x1] %vm568_vm3, %v893_v46 }
 0x286   : > { %909 = vst.msk [vmem:[%s4070_s28 + $0x62] sm:$0x1] %vm568_vm3, %v894_v48  ;;  %v1029_v54 = vpop.f32.mrf.mxu3 }
 0x287   : > { %910 = vst.msk [vmem:[%s4070_s28 + $0x72] sm:$0x1] %vm568_vm3, %v895_v50  ;;  %v1032_v56 = vadd.f32 %v1029_v54, %v1003_v52 }
 0x288   : > { %912 = vst.msk [vmem:[%s4070_s28 + $0x13] sm:$0x1] %vm568_vm3, %v889_v43 }
 0x289   : > { %913 = vst.msk [vmem:[%s4070_s28 + $0x23] sm:$0x1] %vm568_vm3, %v890_v8  ;;  %v1061_v58 = vadd.f32 %v1058_v51, %v1032_v56 }
 0x28a   : > { %914 = vst.msk [vmem:[%s4070_s28 + $0x33] sm:$0x1] %vm568_vm3, %v891_v44 }
 0x28b   : > { %915 = vst.msk [vmem:[%s4070_s28 + $0x43] sm:$0x1] %vm568_vm3, %v892_v45  ;;  %v1090_v62 = vadd.f32 %v1087_v57, %v1061_v58 }
 0x28c   : > { %916 = vst.msk [vmem:[%s4070_s28 + $0x53] sm:$0x1] %vm568_vm3, %v893_v46  ;;  %v1334_v46 = vpop.f32.mrf.mxu0 }
 0x28d   : > { %917 = vst.msk [vmem:[%s4070_s28 + $0x63] sm:$0x1] %vm568_vm3, %v894_v48  ;;  %v1122_v0 = vadd.f32 %v1119_v61, %v1090_v62  ;;  %v1392_v48 = vpop.f32.mrf.mxu2 }
 0x28e   : > { %918 = vst.msk [vmem:[%s4070_s28 + $0x73] sm:$0x1] %vm568_vm3, %v895_v50  ;;  %v1148_v3 = vpop.f32.mrf.mxu3 }
 0x28f   : > { %v1151_v7 = vadd.f32 %v1148_v3, %v1122_v0 }
 0x291   : > { %v1180_v12 = vadd.f32 %v1177_v5, %v1151_v7 }
 0x293   : > { %v1187_v14 = vadd.f32 %v4065_v33, %v1180_v12  ;;  %v4206_v33 = vpop.permute.xlu2 %1852 }
 0x294   : > { %v1453_v54 = vpop.f32.mrf.mxu0 }
 0x295   : > { %v1189_v18 = vmul.f32 0.044715, %v1187_v14  ;;  %v1188_v32 = vmul.f32 0.5, %v1187_v14  ;;  %v1511_v58 = vpop.f32.mrf.mxu2 }
 0x297   : > { %v1190_v9 = vmul.f32 %v1189_v18, %v1187_v14 }
 0x299   : > { %v1191_v26 = vmul.f32 %v1190_v9, %v1187_v14 }
 0x29b   : > { %v1192_v34 = vadd.f32 %v1191_v26, %v1187_v14  ;;  %v1979_v4 = vpop.permute.xlu2 %1978  ;;  %v2066_v26 = vpop.permute.xlu0 %2065 }
 0x29c   : > { %3266 = vmatpush.msk.msrb.mxu0 %vm247_vm0, %v1979_v4 }
 0x29d   : > { %v1193_v40 = vmul.f32 0.7978846, %v1192_v34 }
 0x29e   : > { %3282 = vmatpush.msk.msra.mxu0 %vm247_vm0, %v4017_v60  ;;  %v1306_v60 = vpop.f32.mrf.mxu3 }
 0x29f   : > { %3501 = vtanh.f32 %v1193_v40  ;;  %v1307_v44 = vadd.f32 %v1306_v60, %v1281_v29  ;;  %v4330_v29 = vld [vmem:[%s4630_s1 + $0x10] sm:$0xff] }
 0x2a0   : > { %3267 = vmatmul.msk.f32.vlgmr.msrb.gmra.mxu0 %vm243_vm1, %v4330_v29 }
 0x2a1   : > { %v1337_v49 = vadd.f32 %v1334_v46, %v1307_v44 }
 0x2a5   : > { %v3502_v35 = vpop.eup %3501 }
 0x2a6   : > { %v1195_v36 = vadd.f32 1.0, %v3502_v35  ;;  %v1421_v52 = vpop.f32.mrf.mxu3  ;;  %v1668_v35 = vpop.f32.mrf.mxu2 }
 0x2a8   : > { %v1196_v39 = vmul.f32 %v1195_v36, %v1188_v32  ;;  %3283 = vmatmul.msk.f32.vlgmr.msra.gmra.mxu0 %vm243_vm1, %v3905_v24  ;;  %v4355_v24 = vld [vmem:[%s4630_s1 + $0x18] sm:$0xff] }
 0x2aa   : > { %3194 = vmatmul.msk.f32.vlgmr.msrb.gmra.mxu1 %vm529_vm2, %v1196_v39 }
 0x2ab   : > { %3221 = vmatpush.msk.msrb.mxu1 %vm247_vm0, %v4107_v59  ;;  %v2156_v59 = vpop.permute.xlu1 %2155 }
 0x2ac   : > { %3288 = vmatpush.msk.msra.mxu2 %vm247_vm0, %v2156_v59 }
 0x2ad   : > { %3289 = vmatmul.msk.f32.vlgmr.msra.gmra.mxu2 %vm243_vm1, %v3940_v30 }
 0x2b2   : > { %3207 = vmatmul.msk.f32.vlgmr.msra.gmra.mxu1 %vm243_vm1, %v3841_v11 }
 0x2b3   : > { %3231 = vmatpush.msk.msra.mxu1 %vm247_vm0, %v3836_v10  ;;  %v2313_v10 = vpop.permute.xlu1 %2312 }
 0x2b4   : > { %3298 = vmatpush.msk.msrb.mxu2 %vm247_vm0, %v2313_v10  ;;  %v1787_v10 = vpop.f32.mrf.mxu2 }
 0x2b5   : > { %3299 = vmatmul.msk.f32.vlgmr.msrb.gmra.mxu2 %vm243_vm1, %v4330_v29 }
 0x2b6   : > { %3314 = vmatpush.msk.msra.mxu2 %vm247_vm0, %v3312_v31 }
 0x2ba   : > { %3222 = vmatmul.msk.f32.vlgmr.msrb.gmra.mxu1 %vm243_vm1, %v3910_v27 }
 0x2bb   : > { %3244 = vmatpush.msk.msrb.mxu1 %vm247_vm0, %v1732_v63 }
 0x2c2   : > { %3232 = vmatmul.msk.f32.vlgmr.msra.gmra.mxu1 %vm243_vm1, %v3850_v13 }
 0x2c3   : > { %1884 = vmatpush.msra.mxu1 %v3968_v37 }
 0x2c5   : > { %1885 = vmatpush.msra.mxu1 %v3973_v38 }
 0x2ca   : > { %3245 = vmatmul.msk.f32.vlgmr.msrb.gmra.mxu1 %vm243_vm1, %v3863_v15 }
 0x2cb   : > { %3270 = vmatpush.msk.msrb.mxu1 %vm247_vm0, %v3873_v17 }
 0x327   : > { %v1219_v30 = vpop.f32.mrf.mxu1 }
 0x328   : > { %v1223_v42 = vrot.slane %v1219_v30, 1  ;;  %v1224_v28 = vrot.slane %v1219_v30, 2  ;;  %v1225_v43 = vrot.slane %v1219_v30, 3  ;;  %1237 = vst.msk [vmem:[%s4070_s28 + $0x4] sm:$0x1] %vm568_vm3, %v1219_v30  ;;  %v1226_v8 = vrot.slane %v1219_v30, 4 }
 0x329   : > { %1245 = vst.msk [vmem:[%s4070_s28 + $0x5] sm:$0x1] %vm568_vm3, %v1219_v30  ;;  %v1227_v17 = vrot.slane %v1219_v30, 5  ;;  %v1228_v45 = vrot.slane %v1219_v30, 6  ;;  %v1229_v47 = vrot.slane %v1219_v30, 7 }
 0x32a   : > { %1238 = vst.msk [vmem:[%s4070_s28 + $0x14] sm:$0x1] %vm568_vm3, %v1223_v42 }
 0x32b   : > { %1239 = vst.msk [vmem:[%s4070_s28 + $0x24] sm:$0x1] %vm568_vm3, %v1224_v28 }
 0x32c   : > { %1240 = vst.msk [vmem:[%s4070_s28 + $0x34] sm:$0x1] %vm568_vm3, %v1225_v43 }
 0x32d   : > { %1241 = vst.msk [vmem:[%s4070_s28 + $0x44] sm:$0x1] %vm568_vm3, %v1226_v8 }
 0x32e   : > { %1242 = vst.msk [vmem:[%s4070_s28 + $0x54] sm:$0x1] %vm568_vm3, %v1227_v17 }
 0x32f   : > { %1243 = vst.msk [vmem:[%s4070_s28 + $0x64] sm:$0x1] %vm568_vm3, %v1228_v45  ;;  %v1363_v50 = vpop.f32.mrf.mxu1 }
 0x330   : > { %1244 = vst.msk [vmem:[%s4070_s28 + $0x74] sm:$0x1] %vm568_vm3, %v1229_v47  ;;  %v1366_v51 = vadd.f32 %v1363_v50, %v1337_v49 }
 0x331   : > { %1246 = vst.msk [vmem:[%s4070_s28 + $0x15] sm:$0x1] %vm568_vm3, %v1223_v42 }
 0x332   : > { %1247 = vst.msk [vmem:[%s4070_s28 + $0x25] sm:$0x1] %vm568_vm3, %v1224_v28  ;;  %v1395_v53 = vadd.f32 %v1392_v48, %v1366_v51 }
 0x333   : > { %1248 = vst.msk [vmem:[%s4070_s28 + $0x35] sm:$0x1] %vm568_vm3, %v1225_v43 }
 0x334   : > { %1249 = vst.msk [vmem:[%s4070_s28 + $0x45] sm:$0x1] %vm568_vm3, %v1226_v8  ;;  %v1424_v55 = vadd.f32 %v1421_v52, %v1395_v53 }
 0x335   : > { %1250 = vst.msk [vmem:[%s4070_s28 + $0x55] sm:$0x1] %vm568_vm3, %v1227_v17 }
 0x336   : > { %1251 = vst.msk [vmem:[%s4070_s28 + $0x65] sm:$0x1] %vm568_vm3, %v1228_v45  ;;  %v1456_v56 = vadd.f32 %v1453_v54, %v1424_v55 }
 0x337   : > { %1252 = vst.msk [vmem:[%s4070_s28 + $0x75] sm:$0x1] %vm568_vm3, %v1229_v47  ;;  %v1482_v57 = vpop.f32.mrf.mxu1 }
 0x338   : > { %v1485_v61 = vadd.f32 %v1482_v57, %v1456_v56 }
 0x33a   : > { %v1514_v62 = vadd.f32 %v1511_v58, %v1485_v61 }
 0x33c   : > { %v1521_v63 = vadd.f32 %v4200_v6, %v1514_v62  ;;  %v2187_v62 = vpop.permute.xlu0 %2186 }
 0x33e   : > { %v1523_v0 = vmul.f32 0.044715, %v1521_v63  ;;  %v1522_v18 = vmul.f32 0.5, %v1521_v63 }
 0x33f   : > { %v1640_v6 = vpop.f32.mrf.mxu1 }
 0x340   : > { %v1524_v3 = vmul.f32 %v1523_v0, %v1521_v63 }
 0x342   : > { %v1525_v5 = vmul.f32 %v1524_v3, %v1521_v63 }
 0x344   : > { %v1526_v7 = vadd.f32 %v1525_v5, %v1521_v63 }
 0x346   : > { %v1527_v12 = vmul.f32 0.7978846, %v1526_v7 }
 0x347   : > { %v1755_v23 = vpop.f32.mrf.mxu1 }
 0x348   : > { %3503 = vtanh.f32 %v1527_v12 }
 0x34e   : > { %v3504_v14 = vpop.eup %3503 }
 0x34f   : > { %v1529_v19 = vadd.f32 1.0, %v3504_v14 }
 0x351   : > { %v1530_v9 = vmul.f32 %v1529_v19, %v1522_v18 }
 0x353   : > { %3226 = vmatmul.msk.f32.vlgmr.msrb.gmra.mxu3 %vm529_vm2, %v1530_v9 }
 0x354   : > { %3253 = vmatpush.msk.msrb.mxu3 %vm247_vm0, %v4196_v21  ;;  %v1615_v21 = vpop.f32.mrf.mxu0 }
 0x355   : > { %v1641_v40 = vadd.f32 %v1640_v6, %v1615_v21 }
 0x357   : > { %v1671_v39 = vadd.f32 %v1668_v35, %v1641_v40 }
 0x35b   : > { %3239 = vmatmul.msk.f32.vlgmr.msra.gmra.mxu3 %vm243_vm1, %v3841_v11  ;;  %v4301_v11 = vpop.permute.xlu2 %2126 }
 0x35c   : > { %3263 = vmatpush.msk.msra.mxu3 %vm247_vm0, %v3866_v16  ;;  %v1726_v36 = vpop.f32.mrf.mxu0 }
 0x363   : > { %3254 = vmatmul.msk.f32.vlgmr.msrb.gmra.mxu3 %vm243_vm1, %v3910_v27  ;;  %v2260_v16 = vpop.permute.xlu2 %2259 }
 0x364   : > { %3276 = vmatpush.msk.msrb.mxu3 %vm247_vm0, %v2066_v26  ;;  %3293 = vmatpush.msk.msrb.mxu0 %vm247_vm0, %v2260_v16  ;;  %v1845_v43 = vpop.f32.mrf.mxu0  ;;  %v2371_v26 = vpop.permute.xlu0 %2370  ;;  %v2256_v16 = vld [vmem:[%s4630_s1] sm:$0xff] }
 0x366   : > { %3305 = vmatpush.msk.msra.mxu0 %vm247_vm0, %v2371_v26 }
 0x36b   : > { %3264 = vmatmul.msk.f32.vlgmr.msra.gmra.mxu3 %vm243_vm1, %v3850_v13 }
 0x36c   : > { %2218 = vmatpush.msra.mxu3 %v3968_v37  ;;  %v2002_v0 = vpop.f32.mrf.mxu0 }
 0x36e   : > { %2219 = vmatpush.msra.mxu3 %v3973_v38 }
 0x373   : > { %3277 = vmatmul.msk.f32.vlgmr.msrb.gmra.mxu3 %vm243_vm1, %v3863_v15 }
 0x374   : > { %3302 = vmatpush.msk.msrb.mxu3 %vm247_vm0, %v4029_v2  ;;  %v2400_v2 = vpop.permute.xlu2 %2399  ;;  %v2121_v9 = vpop.f32.mrf.mxu0 }
 0x37c   : > { %v2594_v30 = vpop.permute.xlu2 %2593 }
 0x37d   : > { %3325 = vmatpush.msk.msrb.mxu2 %vm247_vm0, %v2594_v30 }
 0x3d6   : > { %v1553_v31 = vpop.f32.mrf.mxu3 }
 0x3d7   : > { %v1557_v13 = vrot.slane %v1553_v31, 1  ;;  %v1558_v37 = vrot.slane %v1553_v31, 2  ;;  %v1559_v38 = vrot.slane %v1553_v31, 3  ;;  %1571 = vst.msk [vmem:[%s4070_s28 + $0x6] sm:$0x1] %vm568_vm3, %v1553_v31  ;;  %v1560_v15 = vrot.slane %v1553_v31, 4 }
 0x3d8   : > { %1579 = vst.msk [vmem:[%s4070_s28 + $0x7] sm:$0x1] %vm568_vm3, %v1553_v31  ;;  %v1561_v34 = vrot.slane %v1553_v31, 5  ;;  %v1562_v20 = vrot.slane %v1553_v31, 6  ;;  %v1563_v32 = vrot.slane %v1553_v31, 7 }
 0x3d9   : > { %1572 = vst.msk [vmem:[%s4070_s28 + $0x16] sm:$0x1] %vm568_vm3, %v1557_v13 }
 0x3da   : > { %1573 = vst.msk [vmem:[%s4070_s28 + $0x26] sm:$0x1] %vm568_vm3, %v1558_v37 }
 0x3db   : > { %1574 = vst.msk [vmem:[%s4070_s28 + $0x36] sm:$0x1] %vm568_vm3, %v1559_v38 }
 0x3dc   : > { %1575 = vst.msk [vmem:[%s4070_s28 + $0x46] sm:$0x1] %vm568_vm3, %v1560_v15 }
 0x3dd   : > { %1576 = vst.msk [vmem:[%s4070_s28 + $0x56] sm:$0x1] %vm568_vm3, %v1561_v34 }
 0x3de   : > { %1577 = vst.msk [vmem:[%s4070_s28 + $0x66] sm:$0x1] %vm568_vm3, %v1562_v20  ;;  %v1697_v41 = vpop.f32.mrf.mxu3 }
 0x3df   : > { %1578 = vst.msk [vmem:[%s4070_s28 + $0x76] sm:$0x1] %vm568_vm3, %v1563_v32  ;;  %v1700_v4 = vadd.f32 %v1697_v41, %v1671_v39  ;;  %v4423_v39 = vld [vmem:[%s4630_s1 + $0x40] sm:$0xff] }
 0x3e0   : > { %1580 = vst.msk [vmem:[%s4070_s28 + $0x17] sm:$0x1] %vm568_vm3, %v1557_v13  ;;  %v3344_v41 = vld [vmem:[%s3790_s23 + $0x24] sm:$0xf] }
 0x3e1   : > { %1581 = vst.msk [vmem:[%s4070_s28 + $0x27] sm:$0x1] %vm568_vm3, %v1558_v37  ;;  %v1729_v59 = vadd.f32 %v1726_v36, %v1700_v4  ;;  %v3307_v36 = vld [vmem:[%s4630_s1 + $0x28] sm:$0xff]  ;;  %2823 = vrot.lane.b32.xlu0 %v3344_v41, %s3642_s24  ;;  %2794 = vrot.lane.b32.xlu1 %v3344_v41, %s3643_s20 }
 0x3e2   : > { %1582 = vst.msk [vmem:[%s4070_s28 + $0x37] sm:$0x1] %vm568_vm3, %v1559_v38 }
 0x3e3   : > { %1583 = vst.msk [vmem:[%s4070_s28 + $0x47] sm:$0x1] %vm568_vm3, %v1560_v15  ;;  %v1758_v60 = vadd.f32 %v1755_v23, %v1729_v59  ;;  %v4408_v15 = vld [vmem:[%s4630_s1 + $0x30] sm:$0xff] }
 0x3e4   : > { %1584 = vst.msk [vmem:[%s4070_s28 + $0x57] sm:$0x1] %vm568_vm3, %v1561_v34  ;;  %v3304_v34 = vld [vmem:[%s4630_s1 + $0x20] sm:$0xff]  ;;  %3315 = vmatmul.msk.f32.vlgmr.msra.gmra.mxu2 %vm243_vm1, %v4408_v15 }
 0x3e5   : > { %1585 = vst.msk [vmem:[%s4070_s28 + $0x67] sm:$0x1] %vm568_vm3, %v1562_v20  ;;  %v1790_v42 = vadd.f32 %v1787_v10, %v1758_v60 }
 0x3e6   : > { %1586 = vst.msk [vmem:[%s4070_s28 + $0x77] sm:$0x1] %vm568_vm3, %v1563_v32  ;;  %v1816_v28 = vpop.f32.mrf.mxu3 }
 0x3e7   : > { %v1819_v8 = vadd.f32 %v1816_v28, %v1790_v42  ;;  %v2461_v42 = vpop.permute.xlu1 %2460  ;;  %v4441_v28 = vld [vmem:[%s4630_s1 + $0x38] sm:$0xff] }
 0x3e9   : > { %v1848_v17 = vadd.f32 %v1845_v43, %v1819_v8  ;;  %v2734_v43 = vpop.permute.xlu2 %2733 }
 0x3eb   : > { %v1855_v44 = vadd.f32 %v4206_v33, %v1848_v17  ;;  %v1949_v33 = vpop.f32.mrf.mxu2 }
 0x3ed   : > { %v1857_v45 = vmul.f32 0.044715, %v1855_v44  ;;  %v1856_v51 = vmul.f32 0.5, %v1855_v44 }
 0x3ee   : > { %v1974_v55 = vpop.f32.mrf.mxu3 }
 0x3ef   : > { %v1858_v46 = vmul.f32 %v1857_v45, %v1855_v44  ;;  %v2521_v8 = vpop.permute.xlu1 %2520 }
 0x3f1   : > { %v1859_v47 = vmul.f32 %v1858_v46, %v1855_v44  ;;  %v2533_v46 = vld [vmem:[%s4632_s3] sm:$0xff] }
 0x3f3   : > { %v1860_v48 = vadd.f32 %v1859_v47, %v1855_v44  ;;  %v2060_v5 = vpop.f32.mrf.mxu2  ;;  %v2534_v44 = vld [vmem:[%s4632_s3 + $0x8] sm:$0xff] }
 0x3f5   : > { %v1861_v49 = vmul.f32 0.7978846, %v1860_v48 }
 0x3f6   : > { %v2089_v18 = vpop.f32.mrf.mxu3 }
 0x3f7   : > { %3505 = vtanh.f32 %v1861_v49  ;;  %v2647_v48 = vpop.permute.xlu1 %2646 }
 0x3fb   : > { %v2179_v13 = vpop.f32.mrf.mxu2 }
 0x3fd   : > { %v3506_v50 = vpop.eup %3505 }
 0x3fe   : > { %v1863_v52 = vadd.f32 1.0, %v3506_v50 }
 0x400   : > { %v1864_v53 = vmul.f32 %v1863_v52, %v1856_v51 }
 0x402   : > { %3258 = vmatmul.msk.f32.vlgmr.msra.gmra.mxu1 %vm529_vm2, %v1864_v53 }
 0x403   : > { %3285 = vmatpush.msk.msra.mxu1 %vm247_vm0, %v4301_v11  ;;  %v3292_v11 = vld [vmem:[%s4630_s1 + $0x8] sm:$0xff] }
 0x404   : > { %3294 = vmatmul.msk.f32.vlgmr.msrb.gmra.mxu0 %vm243_vm1, %v3292_v11  ;;  %3326 = vmatmul.msk.f32.vlgmr.msrb.gmra.mxu2 %vm243_vm1, %v3292_v11 }
 0x40a   : > { %3271 = vmatmul.msk.f32.vlgmr.msrb.gmra.mxu1 %vm243_vm1, %v4355_v24 }
 0x40b   : > { %3295 = vmatpush.msk.msrb.mxu1 %vm247_vm0, %v4026_v1  ;;  %v1975_v1 = vadd.f32 %v1974_v55, %v1949_v33  ;;  %v2336_v55 = vpop.f32.mrf.mxu2 }
 0x40c   : > { %3306 = vmatmul.msk.f32.vlgmr.msra.gmra.mxu0 %vm243_vm1, %v3304_v34 }
 0x40d   : > { %v2005_v7 = vadd.f32 %v2002_v0, %v1975_v1 }
 0x412   : > { %3286 = vmatmul.msk.f32.vlgmr.msra.gmra.mxu1 %vm243_vm1, %v3910_v27 }
 0x413   : > { %3308 = vmatpush.msk.msra.mxu1 %vm247_vm0, %v2400_v2  ;;  %v2490_v2 = vpop.permute.xlu0 %2489 }
 0x414   : > { %3320 = vmatpush.msk.msrb.mxu0 %vm247_vm0, %v2490_v2 }
 0x415   : > { %3321 = vmatmul.msk.f32.vlgmr.msrb.gmra.mxu0 %vm243_vm1, %v4423_v39 }
 0x416   : > { %3330 = vmatpush.msk.msra.mxu0 %vm247_vm0, %v2647_v48 }
 0x418   : > { %3346 = vmatpush.msk.msrb.mxu0 %vm247_vm0, %v3344_v41 }
 0x41a   : > { %3296 = vmatmul.msk.f32.vlgmr.msrb.gmra.mxu1 %vm243_vm1, %v2256_v16 }
 0x41b   : > { %v2705_v45 = vpop.permute.xlu0 %2704  ;;  %2552 = vmatpush.msrb.mxu1 %v2534_v44 }
 0x41c   : > { %3337 = vmatpush.msk.msra.mxu2 %vm247_vm0, %v2705_v45 }
 0x41d   : > { %3338 = vmatmul.msk.f32.vlgmr.msra.gmra.mxu2 %vm243_vm1, %v3304_v34  ;;  %2553 = vmatpush.msrb.mxu1 %v2533_v46 }
 0x41e   : > { %3331 = vmatmul.msk.f32.vlgmr.msra.gmra.mxu0 %vm243_vm1, %v4330_v29 }
 0x422   : > { %3309 = vmatmul.msk.f32.vlgmr.msra.gmra.mxu1 %vm243_vm1, %v3307_v36 }
 0x423   : > { %3334 = vmatpush.msk.msra.mxu1 %vm247_vm0, %v4054_v25 }
 0x426   : > { %3347 = vmatmul.msk.f32.vlgmr.msrb.gmra.mxu0 %vm243_vm1, %v4408_v15 }
 0x467   : > { %v2455_v1 = vpop.f32.mrf.mxu2 }
 0x47f   : > { %v1887_v54 = vpop.f32.mrf.mxu1 }
 0x480   : > { %v1891_v56 = vrot.slane %v1887_v54, 1  ;;  %v1892_v57 = vrot.slane %v1887_v54, 2  ;;  %v1893_v58 = vrot.slane %v1887_v54, 3  ;;  %1905 = vst.msk [vmem:[%s4070_s28 + $0x8] sm:$0x1] %vm568_vm3, %v1887_v54  ;;  %v1894_v61 = vrot.slane %v1887_v54, 4 }
 0x481   : > { %1913 = vst.msk [vmem:[%s4070_s28 + $0x9] sm:$0x1] %vm568_vm3, %v1887_v54  ;;  %v1895_v27 = vrot.slane %v1887_v54, 5  ;;  %v1896_v63 = vrot.slane %v1887_v54, 6  ;;  %v1897_v3 = vrot.slane %v1887_v54, 7  ;;  %v2283_v17 = vpop.f32.mrf.mxu0 }
 0x482   : > { %1906 = vst.msk [vmem:[%s4070_s28 + $0x18] sm:$0x1] %vm568_vm3, %v1891_v56 }
 0x483   : > { %1907 = vst.msk [vmem:[%s4070_s28 + $0x28] sm:$0x1] %vm568_vm3, %v1892_v57 }
 0x484   : > { %1908 = vst.msk [vmem:[%s4070_s28 + $0x38] sm:$0x1] %vm568_vm3, %v1893_v58 }
 0x485   : > { %1909 = vst.msk [vmem:[%s4070_s28 + $0x48] sm:$0x1] %vm568_vm3, %v1894_v61 }
 0x486   : > { %1910 = vst.msk [vmem:[%s4070_s28 + $0x58] sm:$0x1] %vm568_vm3, %v1895_v27 }
 0x487   : > { %1911 = vst.msk [vmem:[%s4070_s28 + $0x68] sm:$0x1] %vm568_vm3, %v1896_v63  ;;  %v2031_v12 = vpop.f32.mrf.mxu1 }
 0x488   : > { %1912 = vst.msk [vmem:[%s4070_s28 + $0x78] sm:$0x1] %vm568_vm3, %v1897_v3  ;;  %v2034_v14 = vadd.f32 %v2031_v12, %v2005_v7 }
 0x489   : > { %1914 = vst.msk [vmem:[%s4070_s28 + $0x19] sm:$0x1] %vm568_vm3, %v1891_v56  ;;  %v2394_v29 = vpop.f32.mrf.mxu0 }
 0x48a   : > { %1915 = vst.msk [vmem:[%s4070_s28 + $0x29] sm:$0x1] %vm568_vm3, %v1892_v57  ;;  %v2063_v19 = vadd.f32 %v2060_v5, %v2034_v14 }
 0x48b   : > { %1916 = vst.msk [vmem:[%s4070_s28 + $0x39] sm:$0x1] %vm568_vm3, %v1893_v58 }
 0x48c   : > { %1917 = vst.msk [vmem:[%s4070_s28 + $0x49] sm:$0x1] %vm568_vm3, %v1894_v61  ;;  %v2092_v21 = vadd.f32 %v2089_v18, %v2063_v19 }
 0x48d   : > { %1918 = vst.msk [vmem:[%s4070_s28 + $0x59] sm:$0x1] %vm568_vm3, %v1895_v27 }
 0x48e   : > { %1919 = vst.msk [vmem:[%s4070_s28 + $0x69] sm:$0x1] %vm568_vm3, %v1896_v63  ;;  %v2124_v31 = vadd.f32 %v2121_v9, %v2092_v21 }
 0x48f   : > { %1920 = vst.msk [vmem:[%s4070_s28 + $0x79] sm:$0x1] %vm568_vm3, %v1897_v3  ;;  %v2150_v6 = vpop.f32.mrf.mxu1 }
 0x490   : > { %v2153_v37 = vadd.f32 %v2150_v6, %v2124_v31 }
 0x492   : > { %v2182_v38 = vadd.f32 %v2179_v13, %v2153_v37  ;;  %v2513_v5 = vpop.f32.mrf.mxu0  ;;  %v2795_v13 = vpop.permute.xlu1 %2794 }
 0x493   : > { %v2617_v37 = vpop.f32.mrf.mxu2 }
 0x494   : > { %v2189_v40 = vadd.f32 %v2187_v62, %v2182_v38  ;;  %v2824_v62 = vpop.permute.xlu0 %2823 }
 0x495   : > { %3352 = vmatpush.msk.msrb.mxu2 %vm247_vm0, %v2824_v62 }
 0x496   : > { %v2191_v20 = vmul.f32 0.044715, %v2189_v40  ;;  %v2190_v10 = vmul.f32 0.5, %v2189_v40  ;;  %3353 = vmatmul.msk.f32.vlgmr.msrb.gmra.mxu2 %vm243_vm1, %v4423_v39 }
 0x498   : > { %v2192_v35 = vmul.f32 %v2191_v20, %v2189_v40 }
 0x49a   : > { %v2193_v32 = vmul.f32 %v2192_v35, %v2189_v40 }
 0x49c   : > { %v2194_v4 = vadd.f32 %v2193_v32, %v2189_v40 }
 0x49e   : > { %v2195_v23 = vmul.f32 0.7978846, %v2194_v4 }
 0x4a0   : > { %3507 = vtanh.f32 %v2195_v23  ;;  %v2728_v41 = vpop.f32.mrf.mxu2 }
 0x4a6   : > { %v3508_v59 = vpop.eup %3507 }
 0x4a7   : > { %v2197_v30 = vadd.f32 1.0, %v3508_v59 }
 0x4a9   : > { %v2198_v60 = vmul.f32 %v2197_v30, %v2190_v10 }
 0x4ab   : > { %3290 = vmatmul.msk.f32.vlgmr.msra.gmra.mxu3 %vm529_vm2, %v2198_v60 }
 0x4ac   : > { %3317 = vmatpush.msk.msra.mxu3 %vm247_vm0, %v2461_v42 }
 0x4b3   : > { %3303 = vmatmul.msk.f32.vlgmr.msrb.gmra.mxu3 %vm243_vm1, %v4355_v24 }
 0x4b4   : > { %3327 = vmatpush.msk.msrb.mxu3 %vm247_vm0, %v4044_v22  ;;  %v2308_v22 = vpop.f32.mrf.mxu1 }
 0x4b5   : > { %v2309_v33 = vadd.f32 %v2308_v22, %v2283_v17 }
 0x4b7   : > { %v2339_v25 = vadd.f32 %v2336_v55, %v2309_v33 }
 0x4bb   : > { %3318 = vmatmul.msk.f32.vlgmr.msra.gmra.mxu3 %vm243_vm1, %v4441_v28 }
 0x4bc   : > { %3340 = vmatpush.msk.msra.mxu3 %vm247_vm0, %v2734_v43  ;;  %v2423_v61 = vpop.f32.mrf.mxu1 }
 0x4c3   : > { %3328 = vmatmul.msk.f32.vlgmr.msrb.gmra.mxu3 %vm243_vm1, %v2256_v16 }
 0x4c4   : > { %2886 = vmatpush.msrb.mxu3 %v2534_v44  ;;  %v2855_v44 = vpop.permute.xlu2 %2854 }
 0x4c6   : > { %2887 = vmatpush.msrb.mxu3 %v2533_v46 }
 0x4cb   : > { %3341 = vmatmul.msk.f32.vlgmr.msra.gmra.mxu3 %vm243_vm1, %v3307_v36  ;;  %v2670_v36 = vpop.f32.mrf.mxu0 }
 0x4d3   : > { %v2789_v60 = vpop.f32.mrf.mxu0 }
 0x52e   : > { %v2221_v47 = vpop.f32.mrf.mxu3 }
 0x52f   : > { %v2225_v49 = vrot.slane %v2221_v47, 1  ;;  %v2226_v50 = vrot.slane %v2221_v47, 2  ;;  %v2227_v51 = vrot.slane %v2221_v47, 3  ;;  %2239 = vst.msk [vmem:[%s4070_s28 + $0xa] sm:$0x1] %vm568_vm3, %v2221_v47  ;;  %v2228_v52 = vrot.slane %v2221_v47, 4 }
 0x530   : > { %2247 = vst.msk [vmem:[%s4070_s28 + $0xb] sm:$0x1] %vm568_vm3, %v2221_v47  ;;  %v2229_v53 = vrot.slane %v2221_v47, 5  ;;  %v2230_v54 = vrot.slane %v2221_v47, 6  ;;  %v2231_v56 = vrot.slane %v2221_v47, 7 }
 0x531   : > { %2240 = vst.msk [vmem:[%s4070_s28 + $0x1a] sm:$0x1] %vm568_vm3, %v2225_v49 }
 0x532   : > { %2241 = vst.msk [vmem:[%s4070_s28 + $0x2a] sm:$0x1] %vm568_vm3, %v2226_v50 }
 0x533   : > { %2242 = vst.msk [vmem:[%s4070_s28 + $0x3a] sm:$0x1] %vm568_vm3, %v2227_v51 }
 0x534   : > { %2243 = vst.msk [vmem:[%s4070_s28 + $0x4a] sm:$0x1] %vm568_vm3, %v2228_v52 }
 0x535   : > { %2244 = vst.msk [vmem:[%s4070_s28 + $0x5a] sm:$0x1] %vm568_vm3, %v2229_v53 }
 0x536   : > { %2245 = vst.msk [vmem:[%s4070_s28 + $0x6a] sm:$0x1] %vm568_vm3, %v2230_v54  ;;  %v2365_v57 = vpop.f32.mrf.mxu3 }
 0x537   : > { %2246 = vst.msk [vmem:[%s4070_s28 + $0x7a] sm:$0x1] %vm568_vm3, %v2231_v56  ;;  %v2368_v58 = vadd.f32 %v2365_v57, %v2339_v25 }
 0x538   : > { %2248 = vst.msk [vmem:[%s4070_s28 + $0x1b] sm:$0x1] %vm568_vm3, %v2225_v49 }
 0x539   : > { %2249 = vst.msk [vmem:[%s4070_s28 + $0x2b] sm:$0x1] %vm568_vm3, %v2226_v50  ;;  %v2397_v27 = vadd.f32 %v2394_v29, %v2368_v58 }
 0x53a   : > { %2250 = vst.msk [vmem:[%s4070_s28 + $0x3b] sm:$0x1] %vm568_vm3, %v2227_v51 }
 0x53b   : > { %2251 = vst.msk [vmem:[%s4070_s28 + $0x4b] sm:$0x1] %vm568_vm3, %v2228_v52  ;;  %v2426_v63 = vadd.f32 %v2423_v61, %v2397_v27 }
 0x53c   : > { %2252 = vst.msk [vmem:[%s4070_s28 + $0x5b] sm:$0x1] %vm568_vm3, %v2229_v53 }
 0x53d   : > { %2253 = vst.msk [vmem:[%s4070_s28 + $0x6b] sm:$0x1] %vm568_vm3, %v2230_v54  ;;  %v2458_v0 = vadd.f32 %v2455_v1, %v2426_v63 }
 0x53e   : > { %2254 = vst.msk [vmem:[%s4070_s28 + $0x7b] sm:$0x1] %vm568_vm3, %v2231_v56  ;;  %v2484_v3 = vpop.f32.mrf.mxu3 }
 0x53f   : > { %v2487_v7 = vadd.f32 %v2484_v3, %v2458_v0 }
 0x541   : > { %v2516_v12 = vadd.f32 %v2513_v5, %v2487_v7 }
 0x543   : > { %v2523_v14 = vadd.f32 %v2521_v8, %v2516_v12  ;;  %v2847_v8 = vpop.f32.mrf.mxu2 }
 0x545   : > { %v2525_v18 = vmul.f32 0.044715, %v2523_v14  ;;  %v2524_v21 = vmul.f32 0.5, %v2523_v14 }
 0x546   : > { %v2642_v15 = vpop.f32.mrf.mxu3 }
 0x547   : > { %v2526_v19 = vmul.f32 %v2525_v18, %v2523_v14  ;;  %v2643_v35 = vadd.f32 %v2642_v15, %v2617_v37 }
 0x549   : > { %v2527_v9 = vmul.f32 %v2526_v19, %v2523_v14  ;;  %v2673_v4 = vadd.f32 %v2670_v36, %v2643_v35 }
 0x54b   : > { %v2528_v26 = vadd.f32 %v2527_v9, %v2523_v14 }
 0x54d   : > { %v2529_v11 = vmul.f32 0.7978846, %v2528_v26 }
 0x54e   : > { %v2757_v10 = vpop.f32.mrf.mxu3 }
 0x54f   : > { %3509 = vtanh.f32 %v2529_v11 }
 0x555   : > { %v3510_v16 = vpop.eup %3509 }
 0x556   : > { %v2531_v31 = vadd.f32 1.0, %v3510_v16 }
 0x558   : > { %v2532_v6 = vmul.f32 %v2531_v31, %v2524_v21 }
 0x55a   : > { %3322 = vmatmul.msk.f32.vlgmr.msrb.gmra.mxu1 %vm529_vm2, %v2532_v6 }
 0x55b   : > { %3349 = vmatpush.msk.msrb.mxu1 %vm247_vm0, %v2795_v13 }
 0x562   : > { %3335 = vmatmul.msk.f32.vlgmr.msra.gmra.mxu1 %vm243_vm1, %v4355_v24 }
 0x56a   : > { %3350 = vmatmul.msk.f32.vlgmr.msrb.gmra.mxu1 %vm243_vm1, %v4441_v28 }
 0x5d7   : > { %v2555_v38 = vpop.f32.mrf.mxu1 }
 0x5d8   : > { %v2559_v2 = vrot.slane %v2555_v38, 1  ;;  %v2560_v34 = vrot.slane %v2555_v38, 2  ;;  %v2561_v40 = vrot.slane %v2555_v38, 3  ;;  %2573 = vst.msk [vmem:[%s4070_s28 + $0xc] sm:$0x1] %vm568_vm3, %v2555_v38  ;;  %v2562_v20 = vrot.slane %v2555_v38, 4 }
 0x5d9   : > { %2581 = vst.msk [vmem:[%s4070_s28 + $0xd] sm:$0x1] %vm568_vm3, %v2555_v38  ;;  %v2563_v24 = vrot.slane %v2555_v38, 5  ;;  %v2564_v32 = vrot.slane %v2555_v38, 6  ;;  %v2565_v39 = vrot.slane %v2555_v38, 7 }
 0x5da   : > { %2574 = vst.msk [vmem:[%s4070_s28 + $0x1c] sm:$0x1] %vm568_vm3, %v2559_v2 }
 0x5db   : > { %2575 = vst.msk [vmem:[%s4070_s28 + $0x2c] sm:$0x1] %vm568_vm3, %v2560_v34 }
 0x5dc   : > { %2576 = vst.msk [vmem:[%s4070_s28 + $0x3c] sm:$0x1] %vm568_vm3, %v2561_v40 }
 0x5dd   : > { %2577 = vst.msk [vmem:[%s4070_s28 + $0x4c] sm:$0x1] %vm568_vm3, %v2562_v20 }
 0x5de   : > { %2578 = vst.msk [vmem:[%s4070_s28 + $0x5c] sm:$0x1] %vm568_vm3, %v2563_v24 }
 0x5df   : > { %2579 = vst.msk [vmem:[%s4070_s28 + $0x6c] sm:$0x1] %vm568_vm3, %v2564_v32  ;;  %v2699_v23 = vpop.f32.mrf.mxu1 }
 0x5e0   : > { %2580 = vst.msk [vmem:[%s4070_s28 + $0x7c] sm:$0x1] %vm568_vm3, %v2565_v39  ;;  %v2702_v59 = vadd.f32 %v2699_v23, %v2673_v4 }
 0x5e1   : > { %2582 = vst.msk [vmem:[%s4070_s28 + $0x1d] sm:$0x1] %vm568_vm3, %v2559_v2 }
 0x5e2   : > { %2583 = vst.msk [vmem:[%s4070_s28 + $0x2d] sm:$0x1] %vm568_vm3, %v2560_v34  ;;  %v2731_v30 = vadd.f32 %v2728_v41, %v2702_v59 }
 0x5e3   : > { %2584 = vst.msk [vmem:[%s4070_s28 + $0x3d] sm:$0x1] %vm568_vm3, %v2561_v40 }
 0x5e4   : > { %2585 = vst.msk [vmem:[%s4070_s28 + $0x4d] sm:$0x1] %vm568_vm3, %v2562_v20  ;;  %v2760_v42 = vadd.f32 %v2757_v10, %v2731_v30 }
 0x5e5   : > { %2586 = vst.msk [vmem:[%s4070_s28 + $0x5d] sm:$0x1] %vm568_vm3, %v2563_v24 }
 0x5e6   : > { %2587 = vst.msk [vmem:[%s4070_s28 + $0x6d] sm:$0x1] %vm568_vm3, %v2564_v32  ;;  %v2792_v28 = vadd.f32 %v2789_v60, %v2760_v42 }
 0x5e7   : > { %2588 = vst.msk [vmem:[%s4070_s28 + $0x7d] sm:$0x1] %vm568_vm3, %v2565_v39  ;;  %v2818_v43 = vpop.f32.mrf.mxu1 }
 0x5e8   : > { %v2821_v17 = vadd.f32 %v2818_v43, %v2792_v28 }
 0x5ea   : > { %v2850_v22 = vadd.f32 %v2847_v8, %v2821_v17 }
 0x5ec   : > { %v2857_v45 = vadd.f32 %v2855_v44, %v2850_v22 }
 0x5ee   : > { %v2859_v46 = vmul.f32 0.044715, %v2857_v45  ;;  %v2858_v52 = vmul.f32 0.5, %v2857_v45 }
 0x5f0   : > { %v2860_v47 = vmul.f32 %v2859_v46, %v2857_v45 }
 0x5f2   : > { %v2861_v48 = vmul.f32 %v2860_v47, %v2857_v45 }
 0x5f4   : > { %v2862_v49 = vadd.f32 %v2861_v48, %v2857_v45 }
 0x5f6   : > { %v2863_v50 = vmul.f32 0.7978846, %v2862_v49 }
 0x5f8   : > { %3511 = vtanh.f32 %v2863_v50 }
 0x5fe   : > { %v3512_v51 = vpop.eup %3511 }
 0x5ff   : > { %v2865_v53 = vadd.f32 1.0, %v3512_v51 }
 0x601   : > { %v2866_v33 = vmul.f32 %v2865_v53, %v2858_v52 }
 0x603   : > { %3354 = vmatmul.msk.f32.vlgmr.msrb.gmra.mxu3 %vm529_vm2, %v2866_v33 }
 0x686   : > { %v2889_v54 = vpop.f32.mrf.mxu3 }
 0x687   : > { %v2893_v55 = vrot.slane %v2889_v54, 1  ;;  %v2894_v56 = vrot.slane %v2889_v54, 2  ;;  %v2895_v29 = vrot.slane %v2889_v54, 3  ;;  %2907 = vst.msk [vmem:[%s4070_s28 + $0xe] sm:$0x1] %vm568_vm3, %v2889_v54  ;;  %v2896_v25 = vrot.slane %v2889_v54, 4 }
 0x688   : > { %2915 = vst.msk [vmem:[%s4070_s28 + $0xf] sm:$0x1] %vm568_vm3, %v2889_v54  ;;  %v2897_v57 = vrot.slane %v2889_v54, 5  ;;  %v2898_v58 = vrot.slane %v2889_v54, 6  ;;  %v2899_v61 = vrot.slane %v2889_v54, 7 }
 0x689   : > { %2908 = vst.msk [vmem:[%s4070_s28 + $0x1e] sm:$0x1] %vm568_vm3, %v2893_v55 }
 0x68a   : > { %2909 = vst.msk [vmem:[%s4070_s28 + $0x2e] sm:$0x1] %vm568_vm3, %v2894_v56 }
 0x68b   : > { %2910 = vst.msk [vmem:[%s4070_s28 + $0x3e] sm:$0x1] %vm568_vm3, %v2895_v29 }
 0x68c   : > { %2911 = vst.msk [vmem:[%s4070_s28 + $0x4e] sm:$0x1] %vm568_vm3, %v2896_v25 }
 0x68d   : > { %2912 = vst.msk [vmem:[%s4070_s28 + $0x5e] sm:$0x1] %vm568_vm3, %v2897_v57 }
 0x68e   : > { %2913 = vst.msk [vmem:[%s4070_s28 + $0x6e] sm:$0x1] %vm568_vm3, %v2898_v58 }
 0x68f   : > { %2914 = vst.msk [vmem:[%s4070_s28 + $0x7e] sm:$0x1] %vm568_vm3, %v2899_v61 }
 0x690   : > { %2916 = vst.msk [vmem:[%s4070_s28 + $0x1f] sm:$0x1] %vm568_vm3, %v2893_v55 }
 0x691   : > { %2917 = vst.msk [vmem:[%s4070_s28 + $0x2f] sm:$0x1] %vm568_vm3, %v2894_v56 }
 0x692   : > { %2918 = vst.msk [vmem:[%s4070_s28 + $0x3f] sm:$0x1] %vm568_vm3, %v2895_v29 }
 0x693   : > { %2919 = vst.msk [vmem:[%s4070_s28 + $0x4f] sm:$0x1] %vm568_vm3, %v2896_v25 }
 0x694   : > { %2920 = vst.msk [vmem:[%s4070_s28 + $0x5f] sm:$0x1] %vm568_vm3, %v2897_v57 }
 0x695   : > { %2921 = vst.msk [vmem:[%s4070_s28 + $0x6f] sm:$0x1] %vm568_vm3, %v2898_v58 }
 0x696   : > { %2922 = vst.msk [vmem:[%s4070_s28 + $0x7f] sm:$0x1] %vm568_vm3, %v2899_v61 }
 0x697   : > { %s3356_s5 = sshll.u32 %s3621_s21, 1  ;;  %s3357_s29 = sshll.u32 %s3625_s22, 5 }
 0x698   : > { %s2935_s8 = sadd.s32 %s3357_s29, %s3356_s5  ;;  %s2948_s12 = sshll.u32 %s4070_s28, 4  ;;  %s2949_s12 = int_to_ptr.vmem [resolvable:$true] %s2948_s12 }
 0x699   : > { %s3358_s18 = sshll.u32 %s2935_s8, 3  ;;  %s3644_s24 = smov 256  }
 0x69a   : > { %s2937_s23 = scalar_lea.hbm %s4633_s4, %s3358_s18  ;;  %3376 = sst [smem:[#allocation7]] (%p3758_p12), %s3644_s24 }
 0x69b   : > { %s2950_s9 = sshll.u32 %s2937_s23, 4  ;;  %s3645_s20 = smov 512   ;;  %s2951_s9 = int_to_ptr.hbm [resolvable:$true] %s2950_s9 }
 0x69c   : > { %3377 = sst [smem:[#allocation7 + $0x1]] (%p3758_p12), %s3645_s20  ;;  %s3646_s21 = smov 2  }
 0x69d   : > { %3378 = sst [smem:[#allocation7 + $0x2]] (%p3758_p12), %s3646_s21  ;;  %s3647_s22 = smov 128  }
 0x69e   : > { %3379 = sst [smem:[#allocation7 + $0x3]] (%p3758_p12), %s3647_s22  ;;  %s3648_s28 = smov 8  }
 0x69f   : > { %3380 = sst [smem:[#allocation7 + $0x4]] (%p3758_p12), %s3647_s22  ;;  %s3649_s10 = smov [#allocation6]  }
 0x6a0   : > { %3381 = sst [smem:[#allocation7 + $0x5]] (%p3758_p12), %s3648_s28  ;;  %s3650_s30 = smov 0  }
 0x6a1   : > { %3382 = dma.general (%p3758_p12), %s2949_s12, 2048, %s2951_s9, %s2924_s27, %s3649_s10, [#allocation7], %s3650_s30, 0  }
 0x6a2 PF: > { %p3393_p3 = scmp.ge.s32.totalorder %s3637_s25, 2  ;;  %s2978_s7 = sand.u32 1, %s3597_s15  }
 0x6a3   : > { %s2979_s5 = scalar_lea.sflag [#allocation4], %s2978_s7 }
 0x6a4   : > { %p3389_p7 = pnand %p3393_p3, %p3771_p2 }
 0x6a6   : > { %p3390_p9 = pneg %p3389_p7 }
 0x6a8   : > { %3592 = dma.done.wait (%p3390_p9), %s2979_s5, 2048  }
 0x6a9   : > { %3594 = vsyncadd (%p3390_p9), %s2979_s5, 4294965248  ;;  %s20_s25 = sadd.s32 1, %s3637_s25   ;;  %s4649_s11 = sld [smem:[#allocation10_spill]] }
 0x6aa   : > { %p17_p10 = scmp.ge.s32.totalorder %s20_s25, 6   ;;  %s4650_s20 = sld [smem:[#allocation15_spill]] }
 0x6ab   : > { %s4651_s21 = sld [smem:[#allocation11_spill]]  ;;  %s4655_s15 = smov %s3601_s16 }
 0x6ac   : > { %s4652_s22 = sld [smem:[#allocation12_spill]]  ;;  %s4656_s16 = smov %s3605_s17 }
 0x6ad   : > { %s4653_s23 = sld [smem:[#allocation13_spill]]  ;;  %s4657_s17 = smov %s3766_s13 }
 0x6ae   : > { %s4654_s24 = sld [smem:[#allocation14_spill]]  ;;  %s4658_s18 = smov %s3613_s19 }
 0x6af   : > { %s4659_s19 = smov %s4649_s11  ;;  %19 = sbr.rel (!%p17_p10) target bundleno = 9 (0x9), region = 104 }
 0x6b4   :  { %2985 = vsyncpa [#allocation3], 1 }
 0x6b5   :  { %2987 = vsyncpa [#allocation3 + $0x1], 1 }
 0x6b6   :  { %2988 = vsyncpa [#allocation4], 1 }
 0x6b7   :  { %2990 = vsyncpa [#allocation4 + $0x1], 1 }

</bundles_post_ra>
